<compile_context>
chip_gen: v7x
topology: tpu7x:2x2x1
jax: 0.10.0
libtpu: 0.0.40
codegen_flags: <defaults>
</compile_context>

<pallas_src>
import functools
import math

import jax
import jax.numpy as jnp
from jax.experimental import pallas as pl
from jax.experimental.pallas import tpu as pltpu


def _round_up(x, m):
    return (x + m - 1) // m * m


def _aux_kernel(x_ref, w1_ref, t_ref, w2_ref, b2_ref, out_ref, acc_ref, h_ref,
                *, th, w):
    """One fused step over a (th*w)-pixel row tile of one batch image.

    x_ref  : (1, Hp+2, W+2, Cin_p) bf16  zero-padded NHWC image of batch n
                                         (resident across the row-block axis)
    w1_ref : (9, Cin_p, Cmid)      bf16  3x3 weights, tap-major, BN-scale folded
    t_ref  : (1, Cmid)             f32   folded BN shift  beta + s*(b1 - mean)
    w2_ref : (Cmid, Coutp)         bf16  1x1 weights, Cout zero-padded to 128
    b2_ref : (1, Coutp)            f32   1x1 bias (padded)
    out_ref: (th*w, Coutp)         f32   lane-dense output rows
    acc_ref: (th*w, Cmid)          f32   VMEM accumulator for the 3x3 conv
    h_ref  : (th*w, Cmid)          bf16  VMEM scratch for the hidden activation
    """
    row0 = pl.program_id(1) * th
    # 3x3 conv == in-kernel im2col: 9 accumulating K=Cin matmuls over shifted taps.
    for tap in range(9):
        dy, dx = tap // 3, tap % 3
        xt = x_ref[0, pl.ds(row0 + dy, th), pl.ds(dx, w), :]      # (th, w, Cin_p)
        xt = xt.reshape(th * w, xt.shape[-1])
        p = jnp.dot(xt, w1_ref[tap], preferred_element_type=jnp.float32)
        if tap == 0:
            acc_ref[...] = p
        else:
            acc_ref[...] += p
    # Folded BN shift + ReLU.  Dropout2d(0.1) is identity at inference.
    h_ref[...] = jnp.maximum(acc_ref[...] + t_ref[...], 0.0).astype(h_ref.dtype)
    # 1x1 conv == dense layer over channels (lane-dense Coutp=128 output).
    out_ref[...] = (jnp.dot(h_ref[...], w2_ref[...],
                            preferred_element_type=jnp.float32)
                    + b2_ref[...]).astype(out_ref.dtype)


def aux_module_forward(x_nchw, params, *, tile_rows=256):
    """Forward of Aux_Module. x_nchw: (N, Cin, H, W) f32 -> (N, Cout, H, W) f32.

    tile_rows ~ pixels per grid step; 256 is safe everywhere, 512 is worth
    trying on 128-MiB-VMEM parts (v5e/v6e) for large feature maps.
    """
    w1 = params["conv1_w"]          # (Cmid, Cin, 3, 3)  PyTorch OIHW
    b1 = params["conv1_b"]          # (Cmid,)
    gamma, beta = params["bn_gamma"], params["bn_beta"]
    mean, var, eps = params["bn_mean"], params["bn_var"], params["bn_eps"]
    w2 = params["conv2_w"]          # (Cout, Cmid, 1, 1)
    b2 = params["conv2_b"]          # (Cout,)

    N, Cin, H, W = x_nchw.shape
    Cmid = w1.shape[0]
    Cout = w2.shape[0]

    Cin_p = _round_up(Cin, 8)       # contraction dim: sublane multiple only
    Coutp = _round_up(Cout, 128)    # output dim: lane-dense for unmasked vst

    # Row-tile height th: ~tile_rows pixels per step, with th*W a multiple of 8
    # so the output block satisfies the (8,128) rule; keep >= 2 grid steps when
    # N == 1 so both v7x TensorCores get work.
    th_unit = 8 // math.gcd(W, 8)
    th = max(th_unit, (max(1, tile_rows // W) // th_unit) * th_unit)
    if N == 1 and H > th_unit:
        th = min(th, _round_up(pl.cdiv(H, 2), th_unit))
    th = min(th, _round_up(H, th_unit))
    hp = _round_up(H, th)
    n_row_blocks = hp // th
    tm = th * W

    # ---- wrapper-side glue (layout + parameter folding, all O(params)) ----
    scale = gamma / jnp.sqrt(var + eps)                                 # (Cmid,)
    shift = (beta + scale * (b1 - mean)).reshape(1, Cmid).astype(jnp.float32)

    # OIHW -> (tap, Cin, Cmid); fold BN scale into columns in f32, pad Cin, bf16.
    w1_k = jnp.transpose(w1, (2, 3, 1, 0)).reshape(9, Cin, Cmid) * scale[None, None, :]
    w1_k = jnp.pad(w1_k, ((0, 0), (0, Cin_p - Cin), (0, 0))).astype(jnp.bfloat16)

    w2_k = jnp.transpose(w2.reshape(Cout, Cmid), (1, 0))                # (Cmid, Cout)
    w2_k = jnp.pad(w2_k, ((0, 0), (0, Coutp - Cout))).astype(jnp.bfloat16)
    b2_k = jnp.pad(b2, (0, Coutp - Cout)).reshape(1, Coutp).astype(jnp.float32)

    # NCHW -> NHWC, zero-pad spatially for the 3x3 conv (plus bottom rows up to
    # hp) and channels up to Cin_p; cast once to bf16.  The kernel reads this
    # image exactly once per batch — no im2col expansion through HBM.
    x_nhwc = jnp.transpose(x_nchw, (0, 2, 3, 1))
    x_pad = jnp.pad(x_nhwc, ((0, 0), (1, 1 + hp - H), (1, 1),
                             (0, Cin_p - Cin))).astype(jnp.bfloat16)    # (N, hp+2, W+2, Cin_p)

    kernel = functools.partial(_aux_kernel, th=th, w=W)

    flops = 2 * N * hp * W * (9 * Cin_p * Cmid + Cmid * Coutp)
    bytes_accessed = int(x_pad.size * 2 + w1_k.size * 2 + w2_k.size * 2
                         + shift.size * 4 + b2_k.size * 4 + N * hp * W * Coutp * 4)

    out_slab = pl.pallas_call(
        kernel,
        out_shape=jax.ShapeDtypeStruct((N * hp * W, Coutp), jnp.float32),
        grid_spec=pltpu.PrefetchScalarGridSpec(
            num_scalar_prefetch=0,
            grid=(N, n_row_blocks),
            in_specs=[
                # Full padded image of batch n; index constant along r, so it
                # is DMA'd once per batch and reused by every row block.
                pl.BlockSpec((1, hp + 2, W + 2, Cin_p), lambda n, r: (n, 0, 0, 0)),
                pl.BlockSpec((9, Cin_p, Cmid), lambda n, r: (0, 0, 0)),
                pl.BlockSpec((1, Cmid), lambda n, r: (0, 0)),
                pl.BlockSpec((Cmid, Coutp), lambda n, r: (0, 0)),
                pl.BlockSpec((1, Coutp), lambda n, r: (0, 0)),
            ],
            out_specs=pl.BlockSpec((tm, Coutp),
                                   lambda n, r: (n * n_row_blocks + r, 0)),
            scratch_shapes=[pltpu.VMEM((tm, Cmid), jnp.float32),
                            pltpu.VMEM((tm, Cmid), jnp.bfloat16)],
        ),
        compiler_params=pltpu.CompilerParams(
            dimension_semantics=("parallel", "parallel"),
            vmem_limit_bytes=48 * 1024 * 1024,
        ),
        cost_estimate=pl.CostEstimate(
            flops=flops, transcendentals=0, bytes_accessed=bytes_accessed),
    )(x_pad, w1_k, shift, w2_k, b2_k)

    out = out_slab.reshape(N, hp, W, Coutp)[:, :H, :, :Cout]
    # TODO(synk): return NHWC directly when the consumer accepts it (skips this
    # padded-slab slice + transpose roundtrip through HBM).
    return jnp.transpose(out, (0, 3, 1, 2))                             # NCHW


def init_params(key, in_planes, num_classes=19, mid=256):
    ks = jax.random.split(key, 8)
    return {
        "conv1_w": jax.random.normal(ks[0], (mid, in_planes, 3, 3), jnp.float32) * 0.05,
        "conv1_b": jax.random.normal(ks[1], (mid,), jnp.float32) * 0.05,
        "bn_gamma": 1.0 + 0.1 * jax.random.normal(ks[2], (mid,), jnp.float32),
        "bn_beta": 0.1 * jax.random.normal(ks[3], (mid,), jnp.float32),
        "bn_mean": 0.1 * jax.random.normal(ks[4], (mid,), jnp.float32),
        "bn_var": jnp.abs(jax.random.normal(ks[5], (mid,), jnp.float32)) + 0.5,
        "bn_eps": 1e-5,
        "conv2_w": jax.random.normal(ks[6], (num_classes, mid, 1, 1), jnp.float32) * 0.05,
        "conv2_b": jax.random.normal(ks[7], (num_classes,), jnp.float32) * 0.05,
    }


def _reference(x_nchw, p):
    """Pure-JAX f32 reference (NCHW, same semantics) for verification."""
    y = jax.lax.conv_general_dilated(
        x_nchw, p["conv1_w"], window_strides=(1, 1), padding=((1, 1), (1, 1)),
        dimension_numbers=("NCHW", "OIHW", "NCHW"),
        precision=jax.lax.Precision.HIGHEST)
    y = y + p["conv1_b"][None, :, None, None]
    s = p["bn_gamma"] / jnp.sqrt(p["bn_var"] + p["bn_eps"])
    y = (y - p["bn_mean"][None, :, None, None]) * s[None, :, None, None] \
        + p["bn_beta"][None, :, None, None]
    y = jnp.maximum(y, 0.0)
    # Dropout2d(0.1): identity in eval mode.
    y = jax.lax.conv_general_dilated(
        y, p["conv2_w"], window_strides=(1, 1), padding=((0, 0), (0, 0)),
        dimension_numbers=("NCHW", "OIHW", "NCHW"),
        precision=jax.lax.Precision.HIGHEST)
    return y + p["conv2_b"][None, :, None, None]


if __name__ == "__main__":
    key = jax.random.PRNGKey(0)
    k_x, k_p = jax.random.split(key)

    N, Cin, H, W = 2, 4, 16, 16
    num_classes = 19

    x = jax.random.normal(k_x, (N, Cin, H, W), jnp.float32)
    params = init_params(k_p, Cin, num_classes)

    out = jax.block_until_ready(aux_module_forward(x, params))
    ref = jax.block_until_ready(_reference(x, params))

    assert out.shape == (N, num_classes, H, W), out.shape
    max_err = float(jnp.max(jnp.abs(out - ref)))
    # bf16 MXU operands (f32 accumulation) -> tolerance relaxed per review.
    assert jnp.allclose(out, ref, atol=3e-2, rtol=3e-2), max_err

    print("KERNEL_OK")
</pallas_src>

<mosaic_0001>
module attributes {stable_mosaic.version = 11 : i64} {
  func.func @_aux_kernel(%arg0: i32, %arg1: i32, %arg2: memref<1x18x18x8xbf16, #tpu.memory_space<vmem>>, %arg3: memref<9x8x256xbf16, #tpu.memory_space<vmem>>, %arg4: memref<1x256xf32, #tpu.memory_space<vmem>>, %arg5: memref<256x128xbf16, #tpu.memory_space<vmem>>, %arg6: memref<1x128xf32, #tpu.memory_space<vmem>>, %arg7: memref<256x128xf32, #tpu.memory_space<vmem>>, %arg8: memref<256x256xf32, #tpu.memory_space<vmem>>, %arg9: memref<256x256xbf16, #tpu.memory_space<vmem>>) attributes {dimension_semantics = [#tpu.dimension_semantics<parallel>, #tpu.dimension_semantics<parallel>], iteration_bounds = array<i64: 2, 1>, scalar_prefetch = 0 : i64, scratch_operands = 2 : i64, tpu.core_type = #tpu.core_type<tc>, window_params = [{transform_indices = @transform_0, window_bounds = array<i64: 1, 18, 18, 8>}, {pipeline_mode = #tpu.pipeline_mode<synchronous>, transform_indices = @transform_1, window_bounds = array<i64: 9, 8, 256>}, {pipeline_mode = #tpu.pipeline_mode<synchronous>, transform_indices = @transform_2, window_bounds = array<i64: 1, 256>}, {pipeline_mode = #tpu.pipeline_mode<synchronous>, transform_indices = @transform_3, window_bounds = array<i64: 256, 128>}, {pipeline_mode = #tpu.pipeline_mode<synchronous>, transform_indices = @transform_4, window_bounds = array<i64: 1, 128>}, {transform_indices = @transform_5, window_bounds = array<i64: 256, 128>}]} {
    %c16_i32 = arith.constant 16 : i32
    %0 = arith.muli %arg1, %c16_i32 : i32
    %c0_i32 = arith.constant 0 : i32
    %1 = arith.addi %0, %c0_i32 : i32
    %c0 = arith.constant 0 : index
    %2 = arith.index_cast %1 : i32 to index
    %c0_0 = arith.constant 0 : index
    %c0_1 = arith.constant 0 : index
    %3 = vector.load %arg2[%c0, %2, %c0_0, %c0_1] : memref<1x18x18x8xbf16, #tpu.memory_space<vmem>>, vector<1x16x16x8xbf16>
    %4 = vector.shape_cast %3 : vector<1x16x16x8xbf16> to vector<16x16x8xbf16>
    %5 = vector.shape_cast %4 : vector<16x16x8xbf16> to vector<256x8xbf16>
    %c0_2 = arith.constant 0 : index
    %c0_3 = arith.constant 0 : index
    %c0_4 = arith.constant 0 : index
    %6 = vector.load %arg3[%c0_2, %c0_3, %c0_4] : memref<9x8x256xbf16, #tpu.memory_space<vmem>>, vector<1x8x256xbf16>
    %7 = vector.shape_cast %6 : vector<1x8x256xbf16> to vector<8x256xbf16>
    %cst = arith.constant dense<0.000000e+00> : vector<256x256xf32>
    %8 = tpu.matmul %5, %7, %cst {dimension_numbers = #tpu.dot_dimension_numbers<[1], [0], [0], [1], [0, 0, 1, 1], [], []>} : vector<256x8xbf16>, vector<8x256xbf16>, vector<256x256xf32> -> vector<256x256xf32>
    %c0_5 = arith.constant 0 : index
    %c0_6 = arith.constant 0 : index
    %9 = vector.load %arg8[%c0_5, %c0_6] : memref<256x256xf32, #tpu.memory_space<vmem>>, vector<256x256xf32>
    tpu.vector_store %arg8[%c0_5, %c0_6], %8 {strides = array<i32>} : memref<256x256xf32, #tpu.memory_space<vmem>>, vector<256x256xf32>,
    %c0_i32_7 = arith.constant 0 : i32
    %10 = arith.addi %0, %c0_i32_7 : i32
    %c0_8 = arith.constant 0 : index
    %11 = arith.index_cast %10 : i32 to index
    %c1 = arith.constant 1 : index
    %c0_9 = arith.constant 0 : index
    %12 = vector.load %arg2[%c0_8, %11, %c1, %c0_9] : memref<1x18x18x8xbf16, #tpu.memory_space<vmem>>, vector<1x16x16x8xbf16>
    %13 = vector.shape_cast %12 : vector<1x16x16x8xbf16> to vector<16x16x8xbf16>
    %14 = vector.shape_cast %13 : vector<16x16x8xbf16> to vector<256x8xbf16>
    %c1_10 = arith.constant 1 : index
    %c0_11 = arith.constant 0 : index
    %c0_12 = arith.constant 0 : index
    %15 = vector.load %arg3[%c1_10, %c0_11, %c0_12] : memref<9x8x256xbf16, #tpu.memory_space<vmem>>, vector<1x8x256xbf16>
    %16 = vector.shape_cast %15 : vector<1x8x256xbf16> to vector<8x256xbf16>
    %cst_13 = arith.constant dense<0.000000e+00> : vector<256x256xf32>
    %17 = tpu.matmul %14, %16, %cst_13 {dimension_numbers = #tpu.dot_dimension_numbers<[1], [0], [0], [1], [0, 0, 1, 1], [], []>} : vector<256x8xbf16>, vector<8x256xbf16>, vector<256x256xf32> -> vector<256x256xf32>
    %c0_14 = arith.constant 0 : index
    %c0_15 = arith.constant 0 : index
    %18 = vector.load %arg8[%c0_14, %c0_15] : memref<256x256xf32, #tpu.memory_space<vmem>>, vector<256x256xf32>
    %19 = arith.addf %18, %17 : vector<256x256xf32>
    %c0_16 = arith.constant 0 : index
    %c0_17 = arith.constant 0 : index
    %20 = vector.load %arg8[%c0_16, %c0_17] : memref<256x256xf32, #tpu.memory_space<vmem>>, vector<256x256xf32>
    tpu.vector_store %arg8[%c0_16, %c0_17], %19 {strides = array<i32>} : memref<256x256xf32, #tpu.memory_space<vmem>>, vector<256x256xf32>,
    %c0_i32_18 = arith.constant 0 : i32
    %21 = arith.addi %0, %c0_i32_18 : i32
    %c0_19 = arith.constant 0 : index
    %22 = arith.index_cast %21 : i32 to index
    %c2 = arith.constant 2 : index
    %c0_20 = arith.constant 0 : index
    %23 = vector.load %arg2[%c0_19, %22, %c2, %c0_20] : memref<1x18x18x8xbf16, #tpu.memory_space<vmem>>, vector<1x16x16x8xbf16>
    %24 = vector.shape_cast %23 : vector<1x16x16x8xbf16> to vector<16x16x8xbf16>
    %25 = vector.shape_cast %24 : vector<16x16x8xbf16> to vector<256x8xbf16>
    %c2_21 = arith.constant 2 : index
    %c0_22 = arith.constant 0 : index
    %c0_23 = arith.constant 0 : index
    %26 = vector.load %arg3[%c2_21, %c0_22, %c0_23] : memref<9x8x256xbf16, #tpu.memory_space<vmem>>, vector<1x8x256xbf16>
    %27 = vector.shape_cast %26 : vector<1x8x256xbf16> to vector<8x256xbf16>
    %cst_24 = arith.constant dense<0.000000e+00> : vector<256x256xf32>
    %28 = tpu.matmul %25, %27, %cst_24 {dimension_numbers = #tpu.dot_dimension_numbers<[1], [0], [0], [1], [0, 0, 1, 1], [], []>} : vector<256x8xbf16>, vector<8x256xbf16>, vector<256x256xf32> -> vector<256x256xf32>
    %c0_25 = arith.constant 0 : index
    %c0_26 = arith.constant 0 : index
    %29 = vector.load %arg8[%c0_25, %c0_26] : memref<256x256xf32, #tpu.memory_space<vmem>>, vector<256x256xf32>
    %30 = arith.addf %29, %28 : vector<256x256xf32>
    %c0_27 = arith.constant 0 : index
    %c0_28 = arith.constant 0 : index
    %31 = vector.load %arg8[%c0_27, %c0_28] : memref<256x256xf32, #tpu.memory_space<vmem>>, vector<256x256xf32>
    tpu.vector_store %arg8[%c0_27, %c0_28], %30 {strides = array<i32>} : memref<256x256xf32, #tpu.memory_space<vmem>>, vector<256x256xf32>,
    %c1_i32 = arith.constant 1 : i32
    %32 = arith.addi %0, %c1_i32 : i32
    %c0_29 = arith.constant 0 : index
    %33 = arith.index_cast %32 : i32 to index
    %c0_30 = arith.constant 0 : index
    %c0_31 = arith.constant 0 : index
    %34 = vector.load %arg2[%c0_29, %33, %c0_30, %c0_31] : memref<1x18x18x8xbf16, #tpu.memory_space<vmem>>, vector<1x16x16x8xbf16>
    %35 = vector.shape_cast %34 : vector<1x16x16x8xbf16> to vector<16x16x8xbf16>
    %36 = vector.shape_cast %35 : vector<16x16x8xbf16> to vector<256x8xbf16>
    %c3 = arith.constant 3 : index
    %c0_32 = arith.constant 0 : index
    %c0_33 = arith.constant 0 : index
    %37 = vector.load %arg3[%c3, %c0_32, %c0_33] : memref<9x8x256xbf16, #tpu.memory_space<vmem>>, vector<1x8x256xbf16>
    %38 = vector.shape_cast %37 : vector<1x8x256xbf16> to vector<8x256xbf16>
    %cst_34 = arith.constant dense<0.000000e+00> : vector<256x256xf32>
    %39 = tpu.matmul %36, %38, %cst_34 {dimension_numbers = #tpu.dot_dimension_numbers<[1], [0], [0], [1], [0, 0, 1, 1], [], []>} : vector<256x8xbf16>, vector<8x256xbf16>, vector<256x256xf32> -> vector<256x256xf32>
    %c0_35 = arith.constant 0 : index
    %c0_36 = arith.constant 0 : index
    %40 = vector.load %arg8[%c0_35, %c0_36] : memref<256x256xf32, #tpu.memory_space<vmem>>, vector<256x256xf32>
    %41 = arith.addf %40, %39 : vector<256x256xf32>
    %c0_37 = arith.constant 0 : index
    %c0_38 = arith.constant 0 : index
    %42 = vector.load %arg8[%c0_37, %c0_38] : memref<256x256xf32, #tpu.memory_space<vmem>>, vector<256x256xf32>
    tpu.vector_store %arg8[%c0_37, %c0_38], %41 {strides = array<i32>} : memref<256x256xf32, #tpu.memory_space<vmem>>, vector<256x256xf32>,
    %c1_i32_39 = arith.constant 1 : i32
    %43 = arith.addi %0, %c1_i32_39 : i32
    %c0_40 = arith.constant 0 : index
    %44 = arith.index_cast %43 : i32 to index
    %c1_41 = arith.constant 1 : index
    %c0_42 = arith.constant 0 : index
    %45 = vector.load %arg2[%c0_40, %44, %c1_41, %c0_42] : memref<1x18x18x8xbf16, #tpu.memory_space<vmem>>, vector<1x16x16x8xbf16>
    %46 = vector.shape_cast %45 : vector<1x16x16x8xbf16> to vector<16x16x8xbf16>
    %47 = vector.shape_cast %46 : vector<16x16x8xbf16> to vector<256x8xbf16>
    %c4 = arith.constant 4 : index
    %c0_43 = arith.constant 0 : index
    %c0_44 = arith.constant 0 : index
    %48 = vector.load %arg3[%c4, %c0_43, %c0_44] : memref<9x8x256xbf16, #tpu.memory_space<vmem>>, vector<1x8x256xbf16>
    %49 = vector.shape_cast %48 : vector<1x8x256xbf16> to vector<8x256xbf16>
    %cst_45 = arith.constant dense<0.000000e+00> : vector<256x256xf32>
    %50 = tpu.matmul %47, %49, %cst_45 {dimension_numbers = #tpu.dot_dimension_numbers<[1], [0], [0], [1], [0, 0, 1, 1], [], []>} : vector<256x8xbf16>, vector<8x256xbf16>, vector<256x256xf32> -> vector<256x256xf32>
    %c0_46 = arith.constant 0 : index
    %c0_47 = arith.constant 0 : index
    %51 = vector.load %arg8[%c0_46, %c0_47] : memref<256x256xf32, #tpu.memory_space<vmem>>, vector<256x256xf32>
    %52 = arith.addf %51, %50 : vector<256x256xf32>
    %c0_48 = arith.constant 0 : index
    %c0_49 = arith.constant 0 : index
    %53 = vector.load %arg8[%c0_48, %c0_49] : memref<256x256xf32, #tpu.memory_space<vmem>>, vector<256x256xf32>
    tpu.vector_store %arg8[%c0_48, %c0_49], %52 {strides = array<i32>} : memref<256x256xf32, #tpu.memory_space<vmem>>, vector<256x256xf32>,
    %c1_i32_50 = arith.constant 1 : i32
    %54 = arith.addi %0, %c1_i32_50 : i32
    %c0_51 = arith.constant 0 : index
    %55 = arith.index_cast %54 : i32 to index
    %c2_52 = arith.constant 2 : index
    %c0_53 = arith.constant 0 : index
    %56 = vector.load %arg2[%c0_51, %55, %c2_52, %c0_53] : memref<1x18x18x8xbf16, #tpu.memory_space<vmem>>, vector<1x16x16x8xbf16>
    %57 = vector.shape_cast %56 : vector<1x16x16x8xbf16> to vector<16x16x8xbf16>
    %58 = vector.shape_cast %57 : vector<16x16x8xbf16> to vector<256x8xbf16>
    %c5 = arith.constant 5 : index
    %c0_54 = arith.constant 0 : index
    %c0_55 = arith.constant 0 : index
    %59 = vector.load %arg3[%c5, %c0_54, %c0_55] : memref<9x8x256xbf16, #tpu.memory_space<vmem>>, vector<1x8x256xbf16>
    %60 = vector.shape_cast %59 : vector<1x8x256xbf16> to vector<8x256xbf16>
    %cst_56 = arith.constant dense<0.000000e+00> : vector<256x256xf32>
    %61 = tpu.matmul %58, %60, %cst_56 {dimension_numbers = #tpu.dot_dimension_numbers<[1], [0], [0], [1], [0, 0, 1, 1], [], []>} : vector<256x8xbf16>, vector<8x256xbf16>, vector<256x256xf32> -> vector<256x256xf32>
    %c0_57 = arith.constant 0 : index
    %c0_58 = arith.constant 0 : index
    %62 = vector.load %arg8[%c0_57, %c0_58] : memref<256x256xf32, #tpu.memory_space<vmem>>, vector<256x256xf32>
    %63 = arith.addf %62, %61 : vector<256x256xf32>
    %c0_59 = arith.constant 0 : index
    %c0_60 = arith.constant 0 : index
    %64 = vector.load %arg8[%c0_59, %c0_60] : memref<256x256xf32, #tpu.memory_space<vmem>>, vector<256x256xf32>
    tpu.vector_store %arg8[%c0_59, %c0_60], %63 {strides = array<i32>} : memref<256x256xf32, #tpu.memory_space<vmem>>, vector<256x256xf32>,
    %c2_i32 = arith.constant 2 : i32
    %65 = arith.addi %0, %c2_i32 : i32
    %c0_61 = arith.constant 0 : index
    %66 = arith.index_cast %65 : i32 to index
    %c0_62 = arith.constant 0 : index
    %c0_63 = arith.constant 0 : index
    %67 = vector.load %arg2[%c0_61, %66, %c0_62, %c0_63] : memref<1x18x18x8xbf16, #tpu.memory_space<vmem>>, vector<1x16x16x8xbf16>
    %68 = vector.shape_cast %67 : vector<1x16x16x8xbf16> to vector<16x16x8xbf16>
    %69 = vector.shape_cast %68 : vector<16x16x8xbf16> to vector<256x8xbf16>
    %c6 = arith.constant 6 : index
    %c0_64 = arith.constant 0 : index
    %c0_65 = arith.constant 0 : index
    %70 = vector.load %arg3[%c6, %c0_64, %c0_65] : memref<9x8x256xbf16, #tpu.memory_space<vmem>>, vector<1x8x256xbf16>
    %71 = vector.shape_cast %70 : vector<1x8x256xbf16> to vector<8x256xbf16>
    %cst_66 = arith.constant dense<0.000000e+00> : vector<256x256xf32>
    %72 = tpu.matmul %69, %71, %cst_66 {dimension_numbers = #tpu.dot_dimension_numbers<[1], [0], [0], [1], [0, 0, 1, 1], [], []>} : vector<256x8xbf16>, vector<8x256xbf16>, vector<256x256xf32> -> vector<256x256xf32>
    %c0_67 = arith.constant 0 : index
    %c0_68 = arith.constant 0 : index
    %73 = vector.load %arg8[%c0_67, %c0_68] : memref<256x256xf32, #tpu.memory_space<vmem>>, vector<256x256xf32>
    %74 = arith.addf %73, %72 : vector<256x256xf32>
    %c0_69 = arith.constant 0 : index
    %c0_70 = arith.constant 0 : index
    %75 = vector.load %arg8[%c0_69, %c0_70] : memref<256x256xf32, #tpu.memory_space<vmem>>, vector<256x256xf32>
    tpu.vector_store %arg8[%c0_69, %c0_70], %74 {strides = array<i32>} : memref<256x256xf32, #tpu.memory_space<vmem>>, vector<256x256xf32>,
    %c2_i32_71 = arith.constant 2 : i32
    %76 = arith.addi %0, %c2_i32_71 : i32
    %c0_72 = arith.constant 0 : index
    %77 = arith.index_cast %76 : i32 to index
    %c1_73 = arith.constant 1 : index
    %c0_74 = arith.constant 0 : index
    %78 = vector.load %arg2[%c0_72, %77, %c1_73, %c0_74] : memref<1x18x18x8xbf16, #tpu.memory_space<vmem>>, vector<1x16x16x8xbf16>
    %79 = vector.shape_cast %78 : vector<1x16x16x8xbf16> to vector<16x16x8xbf16>
    %80 = vector.shape_cast %79 : vector<16x16x8xbf16> to vector<256x8xbf16>
    %c7 = arith.constant 7 : index
    %c0_75 = arith.constant 0 : index
    %c0_76 = arith.constant 0 : index
    %81 = vector.load %arg3[%c7, %c0_75, %c0_76] : memref<9x8x256xbf16, #tpu.memory_space<vmem>>, vector<1x8x256xbf16>
    %82 = vector.shape_cast %81 : vector<1x8x256xbf16> to vector<8x256xbf16>
    %cst_77 = arith.constant dense<0.000000e+00> : vector<256x256xf32>
    %83 = tpu.matmul %80, %82, %cst_77 {dimension_numbers = #tpu.dot_dimension_numbers<[1], [0], [0], [1], [0, 0, 1, 1], [], []>} : vector<256x8xbf16>, vector<8x256xbf16>, vector<256x256xf32> -> vector<256x256xf32>
    %c0_78 = arith.constant 0 : index
    %c0_79 = arith.constant 0 : index
    %84 = vector.load %arg8[%c0_78, %c0_79] : memref<256x256xf32, #tpu.memory_space<vmem>>, vector<256x256xf32>
    %85 = arith.addf %84, %83 : vector<256x256xf32>
    %c0_80 = arith.constant 0 : index
    %c0_81 = arith.constant 0 : index
    %86 = vector.load %arg8[%c0_80, %c0_81] : memref<256x256xf32, #tpu.memory_space<vmem>>, vector<256x256xf32>
    tpu.vector_store %arg8[%c0_80, %c0_81], %85 {strides = array<i32>} : memref<256x256xf32, #tpu.memory_space<vmem>>, vector<256x256xf32>,
    %c2_i32_82 = arith.constant 2 : i32
    %87 = arith.addi %0, %c2_i32_82 : i32
    %c0_83 = arith.constant 0 : index
    %88 = arith.index_cast %87 : i32 to index
    %c2_84 = arith.constant 2 : index
    %c0_85 = arith.constant 0 : index
    %89 = vector.load %arg2[%c0_83, %88, %c2_84, %c0_85] : memref<1x18x18x8xbf16, #tpu.memory_space<vmem>>, vector<1x16x16x8xbf16>
    %90 = vector.shape_cast %89 : vector<1x16x16x8xbf16> to vector<16x16x8xbf16>
    %91 = vector.shape_cast %90 : vector<16x16x8xbf16> to vector<256x8xbf16>
    %c8 = arith.constant 8 : index
    %c0_86 = arith.constant 0 : index
    %c0_87 = arith.constant 0 : index
    %92 = vector.load %arg3[%c8, %c0_86, %c0_87] : memref<9x8x256xbf16, #tpu.memory_space<vmem>>, vector<1x8x256xbf16>
    %93 = vector.shape_cast %92 : vector<1x8x256xbf16> to vector<8x256xbf16>
    %cst_88 = arith.constant dense<0.000000e+00> : vector<256x256xf32>
    %94 = tpu.matmul %91, %93, %cst_88 {dimension_numbers = #tpu.dot_dimension_numbers<[1], [0], [0], [1], [0, 0, 1, 1], [], []>} : vector<256x8xbf16>, vector<8x256xbf16>, vector<256x256xf32> -> vector<256x256xf32>
    %c0_89 = arith.constant 0 : index
    %c0_90 = arith.constant 0 : index
    %95 = vector.load %arg8[%c0_89, %c0_90] : memref<256x256xf32, #tpu.memory_space<vmem>>, vector<256x256xf32>
    %96 = arith.addf %95, %94 : vector<256x256xf32>
    %c0_91 = arith.constant 0 : index
    %c0_92 = arith.constant 0 : index
    %97 = vector.load %arg8[%c0_91, %c0_92] : memref<256x256xf32, #tpu.memory_space<vmem>>, vector<256x256xf32>
    tpu.vector_store %arg8[%c0_91, %c0_92], %96 {strides = array<i32>} : memref<256x256xf32, #tpu.memory_space<vmem>>, vector<256x256xf32>,
    %c0_93 = arith.constant 0 : index
    %c0_94 = arith.constant 0 : index
    %98 = vector.load %arg8[%c0_93, %c0_94] : memref<256x256xf32, #tpu.memory_space<vmem>>, vector<256x256xf32>
    %c0_95 = arith.constant 0 : index
    %c0_96 = arith.constant 0 : index
    %99 = vector.load %arg4[%c0_95, %c0_96] : memref<1x256xf32, #tpu.memory_space<vmem>>, vector<1x256xf32>
    %100 = vector.broadcast %99 : vector<1x256xf32> to vector<256x256xf32>
    %101 = arith.addf %98, %100 : vector<256x256xf32>
    %cst_97 = arith.constant 0.000000e+00 : f32
    %102 = vector.broadcast %cst_97 : f32 to vector<256x256xf32>
    %103 = arith.maximumf %101, %102 : vector<256x256xf32>
    %104 = arith.truncf %103 : vector<256x256xf32> to vector<256x256xbf16>
    %c0_98 = arith.constant 0 : index
    %c0_99 = arith.constant 0 : index
    %105 = vector.load %arg9[%c0_98, %c0_99] : memref<256x256xbf16, #tpu.memory_space<vmem>>, vector<256x256xbf16>
    tpu.vector_store %arg9[%c0_98, %c0_99], %104 {strides = array<i32>} : memref<256x256xbf16, #tpu.memory_space<vmem>>, vector<256x256xbf16>,
    %c0_100 = arith.constant 0 : index
    %c0_101 = arith.constant 0 : index
    %106 = vector.load %arg9[%c0_100, %c0_101] : memref<256x256xbf16, #tpu.memory_space<vmem>>, vector<256x256xbf16>
    %c0_102 = arith.constant 0 : index
    %c0_103 = arith.constant 0 : index
    %107 = vector.load %arg5[%c0_102, %c0_103] : memref<256x128xbf16, #tpu.memory_space<vmem>>, vector<256x128xbf16>
    %cst_104 = arith.constant dense<0.000000e+00> : vector<256x128xf32>
    %108 = tpu.matmul %106, %107, %cst_104 {dimension_numbers = #tpu.dot_dimension_numbers<[1], [0], [0], [1], [0, 0, 1, 1], [], []>} : vector<256x256xbf16>, vector<256x128xbf16>, vector<256x128xf32> -> vector<256x128xf32>
    %c0_105 = arith.constant 0 : index
    %c0_106 = arith.constant 0 : index
    %109 = vector.load %arg6[%c0_105, %c0_106] : memref<1x128xf32, #tpu.memory_space<vmem>>, vector<1x128xf32>
    %110 = vector.broadcast %109 : vector<1x128xf32> to vector<256x128xf32>
    %111 = arith.addf %108, %110 : vector<256x128xf32>
    %c0_107 = arith.constant 0 : index
    %c0_108 = arith.constant 0 : index
    %112 = vector.load %arg7[%c0_107, %c0_108] : memref<256x128xf32, #tpu.memory_space<vmem>>, vector<256x128xf32>
    tpu.vector_store %arg7[%c0_107, %c0_108], %111 {strides = array<i32>} : memref<256x128xf32, #tpu.memory_space<vmem>>, vector<256x128xf32>,
    return
  }
  func.func @transform_0(%arg0: i32, %arg1: i32) -> (i32, i32, i32, i32) {
    %c0_i32 = arith.constant 0 : i32
    %c0_i32_0 = arith.constant 0 : i32
    %c0_i32_1 = arith.constant 0 : i32
    %c0_i32_2 = arith.constant 0 : i32
    return %arg0, %c0_i32, %c0_i32_0, %c0_i32_1 : i32, i32, i32, i32
  }
  func.func @transform_1(%arg0: i32, %arg1: i32) -> (i32, i32, i32) {
    %c0_i32 = arith.constant 0 : i32
    %c0_i32_0 = arith.constant 0 : i32
    %c0_i32_1 = arith.constant 0 : i32
    %c0_i32_2 = arith.constant 0 : i32
    return %c0_i32, %c0_i32_0, %c0_i32_1 : i32, i32, i32
  }
  func.func @transform_2(%arg0: i32, %arg1: i32) -> (i32, i32) {
    %c0_i32 = arith.constant 0 : i32
    %c0_i32_0 = arith.constant 0 : i32
    %c0_i32_1 = arith.constant 0 : i32
    return %c0_i32, %c0_i32_0 : i32, i32
  }
  func.func @transform_3(%arg0: i32, %arg1: i32) -> (i32, i32) {
    %c0_i32 = arith.constant 0 : i32
    %c0_i32_0 = arith.constant 0 : i32
    %c0_i32_1 = arith.constant 0 : i32
    return %c0_i32, %c0_i32_0 : i32, i32
  }
  func.func @transform_4(%arg0: i32, %arg1: i32) -> (i32, i32) {
    %c0_i32 = arith.constant 0 : i32
    %c0_i32_0 = arith.constant 0 : i32
    %c0_i32_1 = arith.constant 0 : i32
    return %c0_i32, %c0_i32_0 : i32, i32
  }
  func.func @transform_5(%arg0: i32, %arg1: i32) -> (i32, i32) {
    %c1_i32 = arith.constant 1 : i32
    %0 = arith.muli %arg0, %c1_i32 : i32
    %1 = arith.addi %0, %arg1 : i32
    %c0_i32 = arith.constant 0 : i32
    %c0_i32_0 = arith.constant 0 : i32
    return %1, %c0_i32 : i32, i32
  }
}

</mosaic_0001>

<bundles_post_ra>
// kernel: tpu_custom_call.1
= control target key start
LH: loop header
LB: loop body
LE: loop exit
PB: predicated region body
PF: predicated region fallthrough
CT: control target
= control target key end

     0   :  { %10 = vsyncpa [#allocation5], 0  ;;  %s10597_s0 = inlined_call_operand.vmem [shape: bf16[2,18,18,8], index: 0, kind: input, shape index: {}]   ;;  %s10598_s1 = inlined_call_operand.vmem [shape: bf16[9,8,256], index: 1, kind: input, shape index: {}]   ;;  %s10599_s2 = inlined_call_operand.vmem [shape: f32[1,256], index: 2, kind: input, shape index: {}]   ;;  %s10600_s3 = inlined_call_operand.vmem [shape: bf16[256,128], index: 3, kind: input, shape index: {}]   ;;  %s10601_s4 = inlined_call_operand.vmem [shape: f32[1,128], index: 4, kind: input, shape index: {}]   ;;  %s10602_s5 = inlined_call_operand.hbm [shape: f32[512,128], index: 5, kind: output, shape index: {}]  }
   0x1   :  { %12 = vsyncpa [#allocation5 + $0x1], 0  ;;  %s8949_s18 = smov 0   ;;  %s8951_s19 = smov 0  }
   0x2   :  { %s8953_s20 = smov 0   ;;  %s8955_s21 = smov 0  }
   0x3   :  { %s8957_s22 = smov 0   ;;  %s8959_s23 = smov 0  }
   0x4 LB: > { %s7413_s24 = sadd.s32 4294967295, %s8913_s23   ;;  %s7414_s25 = sadd.s32 4294967294, %s8913_s23   ;;  %s8913_s23 = sphi %s8959_s23, %s18_s23   ;;  %s8909_s22 = sphi %s8957_s22, %s10649_s22   ;;  %s8905_s21 = sphi %s8955_s21, %s10648_s21   ;;  %s8901_s20 = sphi %s8953_s20, %s10647_s20   ;;  %s8897_s19 = sphi %s8951_s19, %s10646_s19   ;;  %s8893_s18 = sphi %s8949_s18, %s10645_s18  }
   0x5   : > { %s30_s26 = sadd.s32 1, %s8909_s22  ;;  %s149_s27 = sadd.s32 1, %s8901_s20 }
   0x6   : > { %p32_p0 = scmp.ge.s32.totalorder %s30_s26, 2  ;;  %p159_p1 = scmp.ne.s32.totalorder %s8901_s20, %s8897_s19 }
   0x7   : > { %p160_p2 = scmp.eq.s32.totalorder %s7413_s24, 1  ;;  %p165_p3 = scmp.ne.s32.totalorder %s8897_s19, %s8893_s18 }
   0x8   : > { %s10651_s26 = smov (%p32_p0, %s30_s26), 0  ;;  %p166_p5 = scmp.eq.s32.totalorder %s7414_s25, 1 }
   0x9   : > { %p8989_p4 = por %p160_p2, %p159_p1  ;;  %s146_s29 = ssub.s32 %s8909_s22, %s10651_s26 }
   0xa   : > { %p7417_p6 = scmp.ge.s32.totalorder %s8913_s23, 1  ;;  %p147_p7 = scmp.eq.s32.totalorder %s146_s29, 0 }
   0xb   : > { %p8996_p8 = por %p166_p5, %p165_p3  ;;  %p204_p9 = scmp.lt.s32.totalorder %s8913_s23, 3 }
   0xc   : > { %s9002_s6 = scalar_select %p147_p7, %s8901_s20, %s149_s27  }
   0xd   : > { %p205_p10 = pnand %p7417_p6, %p204_p9 }
   0xf   : > { %208 = sbr.rel (%p205_p10) target bundleno = 1131 (0x46b), region = 40 }
  0x16   : > { %v276_v0 = vld [vmem:[%s10598_s1] sm:$0xff]  ;;  %vm411_vm0 = vcmask 1043456   ;;  %p232_p11 = scmp.lt.s32.totalorder %s8905_s21, 1  ;;  %v8915_v4 = vmov 0   ;;  %v7759_v7 = vld [vmem:[%s10598_s1 + $0x28] sm:$0xff]  ;;  %vm362_vm1 = vcmask 64512  }
  0x17   : > { %v7659_v1 = vld [vmem:[%s10598_s1 + $0x20] sm:$0xff]  ;;  %v7437_v2 = vcombine.high %v276_v0, %v276_v0  ;;  %v7436_v3 = vcombine.low %v276_v0, %v276_v0  ;;  %450 = vmatprep.mubr.bf16.mxu1 %v8915_v4  ;;  %3444 = vmatprep.mubr.bf16.mxu0 %v8915_v4  ;;  %v7777_v8 = vcombine.high %v7759_v7, %v7759_v7  ;;  %vm723_vm2 = vsmask.f32 3328  ;;  %v7455_v11 = vld [vmem:[%s10598_s1 + $0x8] sm:$0xff]  ;;  %s229_s29 = sand.u32 1, %s8897_s19   ;;  %s8069_s11 = sshll.u32 %s8905_s21, 12 }
  0x18   : > { %v7677_v5 = vcombine.high %v7659_v1, %v7659_v1  ;;  %v7676_v6 = vcombine.low %v7659_v1, %v7659_v1  ;;  %s233_s13 = scalar_select %p232_p11, %s8905_s21, 1  ;;  %v7473_v12 = vcombine.high %v7455_v11, %v7455_v11  ;;  %v7472_v13 = vcombine.low %v7455_v11, %v7455_v11 }
  0x19   : > { %7438 = vmatprep.subr.msk.bf16.mxu1 %vm411_vm0, %v7437_v2  ;;  %v413_v9 = vsel %vm411_vm0, %v7436_v3, 0  ;;  %vm724_vm3 = vsmask.f32 7440  ;;  %v7776_v25 = vcombine.low %v7759_v7, %v7759_v7  ;;  %vm1700_vm5 = vcmask 1042432   ;;  %s7418_s7 = sshll.u32 %s229_s29, 8  ;;  %s10542_s15 = scalar_lea.hbm %s10602_s5, %s8069_s11 }
  0x1a   : > { %7678 = vmatprep.subr.msk.bf16.mxu0 %vm411_vm0, %v7677_v5  ;;  %v3407_v10 = vsel %vm411_vm0, %v7676_v6, 0  ;;  %419 = vmatpush1.bf16.msra.mxu1 %v413_v9  ;;  %s8694_s14 = smul.u32 216, %s233_s13  ;;  %v1214_v15 = vsel %vm411_vm0, %v7472_v13, 0  ;;  %vm9044_vm4 = vmor %vm723_vm2, %vm724_vm3  ;;  %vm1701_vm6 = vcmask 1046532   ;;  %s10475_s10 = scalar_lea.vmem [#allocation4], %s7418_s7 }
  0x1b   : > { %3413 = vmatpush1.bf16.msra.mxu0 %v3407_v10  ;;  %7474 = vmatprep.subr.msk.bf16.mxu1 %vm411_vm0, %v7473_v12  ;;  %v4109_v42 = vsel %vm411_vm0, %v7776_v25, 0  ;;  %vm9274_vm7 = vmor %vm1700_vm5, %vm1701_vm6  ;;  %s7332_s12 = sshll.u32 %s10475_s10, 4  ;;  %s10551_s21 = scalar_lea.sflag [#allocation5], %s229_s29  ;;  %s10544_s12 = int_to_ptr.vmem [resolvable:$true] %s7332_s12 }
  0x1c   : > { %7778 = vmatprep.subr.msk.bf16.mxu0 %vm411_vm0, %v7777_v8  ;;  %s9028_s25 = scalar_lea.vmem %s10597_s0, %s8694_s14  ;;  %s8835_s16 = scalar_lea.vmem %s10544_s12, 4096 }
  0x1d   : > { %v8755_v14 = vld [vmem:[%s9028_s25] sm:$0xff]   ;;  %v7611_v16 = vld [vmem:[%s9028_s25 + $0xc] sm:$0xf]  ;;  %v7612_v17 = vld [vmem:[%s9028_s25 + $0x10] sm:$0xf]  ;;  %p8836_p12 = scmp.ne.s32.totalorder %s10544_s12, %s8835_s16  ;;  %s8916_s17 = smov [#allocation4]  }
  0x1e   : > { %7439 = vmatmul.mubr.msk.bf16.vlgmr.msra.gmra.mrb[0].mxu1 %vm362_vm1, %v8755_v14  ;;  %v7613_v18 = vld [vmem:[%s9028_s25 + $0x14] sm:$0x1]  ;;  %v2920_v19 = vshrl.u32 %v7611_v16, 16  ;;  %v2923_v20 = vshll.u32 %v7611_v16, 16  ;;  %v2929_v21 = vshll.u32 %v7612_v17, 16  ;;  %v2933_v22 = vshrl.u32 %v7612_v17, 16 }
  0x1f   : > { %460 = vmatprep.mubr.bf16.mxu1 %v8915_v4  ;;  %1220 = vmatpush1.bf16.msra.mxu1 %v1214_v15  ;;  %v8758_v23 = vld [vmem:[%s9028_s25 + $0xc] sm:$0xff]   ;;  %v2939_v24 = vshll.u32 %v7613_v18, 16  ;;  %v7614_v26 = vld [vmem:[%s9028_s25 + $0x18] sm:$0xf]  ;;  %v7615_v31 = vld [vmem:[%s9028_s25 + $0x1c] sm:$0xf]  ;;  %p8837_p13 = pnand %p8836_p12, %p8989_p4 }
  0x20   : > { %v2922_v27 = vrot.slane %v2920_v19, 4  ;;  %v2925_v28 = vrot.slane %v2923_v20, 5  ;;  %v2931_v29 = vrot.slane %v2929_v21, 5  ;;  %v2935_v30 = vrot.slane %v2933_v22, 4  ;;  %v7616_v33 = vld [vmem:[%s9028_s25 + $0x20] sm:$0x1] }
  0x21   : > { %v2941_v32 = vrot.slane %v2939_v24, 5  ;;  %v2944_v34 = vshrl.u32 %v7614_v26, 16  ;;  %v2947_v35 = vshll.u32 %v7614_v26, 16  ;;  %v2953_v36 = vshll.u32 %v7615_v31, 16  ;;  %v7617_v46 = vld [vmem:[%s9028_s25 + $0x24] sm:$0xf]  ;;  %p8838_p0 = pneg %p8837_p13 }
  0x22   : > { %v2926_v37 = vor.u32 %v2925_v28, %v2922_v27  ;;  %v2936_v38 = vor.u32 %v2935_v30, %v2931_v29  ;;  %v2957_v39 = vshrl.u32 %v7615_v31, 16  ;;  %v2963_v40 = vshll.u32 %v7616_v33, 16  ;;  %v7618_v51 = vld [vmem:[%s9028_s25 + $0x28] sm:$0xf]  ;;  %v7619_v53 = vld [vmem:[%s9028_s25 + $0x2c] sm:$0x1] }
  0x23   : > { %v2946_v43 = vrot.slane %v2944_v34, 4  ;;  %v2949_v44 = vrot.slane %v2947_v35, 5  ;;  %v2955_v45 = vrot.slane %v2953_v36, 5  ;;  %v2968_v54 = vshrl.u32 %v7617_v46, 16  ;;  %v7620_v1 = vld [vmem:[%s9028_s25 + $0x30] sm:$0xf] }
  0x24   : > { %v2927_v47 = vrot.slane %v2926_v37, 4  ;;  %v2937_v48 = vrot.slane %v2936_v38, 4  ;;  %v2959_v49 = vrot.slane %v2957_v39, 4  ;;  %v2965_v50 = vrot.slane %v2963_v40, 5  ;;  %v7621_v6 = vld [vmem:[%s9028_s25 + $0x34] sm:$0xf] }
  0x25   : > { %v2950_v52 = vor.u32 %v2949_v44, %v2946_v43  ;;  %v2971_v55 = vshll.u32 %v7617_v46, 16  ;;  %v2977_v56 = vshll.u32 %v7618_v51, 16  ;;  %v2981_v60 = vshrl.u32 %v7618_v51, 16  ;;  %v8761_v7 = vld [vmem:[%s9028_s25 + $0x18] sm:$0xff]   ;;  %v7624_v27 = vld [vmem:[%s9028_s25 + $0x40] sm:$0xf] }
  0x26   : > { %7440 = vmatmul.mubr.msk.bf16.gmra.mrb[4].mxu1 %vm362_vm1, %v8758_v23  ;;  %v2932_v57 = vsel %vm9044_vm4, %v2927_v47, %v2931_v29  ;;  %v2942_v58 = vsel %vm9044_vm4, %v2937_v48, %v2941_v32  ;;  %v2960_v59 = vor.u32 %v2959_v49, %v2955_v45  ;;  %v2970_v63 = vrot.slane %v2968_v54, 4  ;;  %v7622_v17 = vld [vmem:[%s9028_s25 + $0x38] sm:$0x1]  ;;  %v7623_v26 = vld [vmem:[%s9028_s25 + $0x3c] sm:$0xf]  ;;  %v8762_v28 = vld [vmem:[%s9028_s25 + $0x24] sm:$0xff]  }
  0x27   : > { %470 = vmatprep.mubr.bf16.mxu1 %v8915_v4  ;;  %v7660_v61 = vcombine.low %v2932_v57, %v2942_v58  ;;  %v2951_v62 = vrot.slane %v2950_v52, 4  ;;  %v2973_v0 = vrot.slane %v2971_v55, 5  ;;  %v2979_v3 = vrot.slane %v2977_v56, 5  ;;  %v7626_v43 = vld [vmem:[%s9028_s25 + $0x48] sm:$0xf]  ;;  %v8763_v52 = vld [vmem:[%s9028_s25 + $0x30] sm:$0xff]  }
  0x28   : > { %v2961_v2 = vrot.slane %v2960_v59, 4  ;;  %v2983_v5 = vrot.slane %v2981_v60, 4  ;;  %v2987_v9 = vshll.u32 %v7619_v53, 16  ;;  %v2992_v10 = vshrl.u32 %v7620_v1, 16  ;;  %v7627_v48 = vld [vmem:[%s9028_s25 + $0x4c] sm:$0xf] }
  0x29   : > { %7679 = vmatmul.mubr.msk.bf16.vlgmr.msra.gmra.mrb[0].mxu0 %vm362_vm1, %v7660_v61  ;;  %v2974_v8 = vor.u32 %v2973_v0, %v2970_v63  ;;  %v2995_v11 = vshll.u32 %v7620_v1, 16  ;;  %v2956_v12 = vsel %vm9044_vm4, %v2951_v62, %v2955_v45  ;;  %v3001_v15 = vshll.u32 %v7621_v6, 16  ;;  %v7625_v49 = vld [vmem:[%s9028_s25 + $0x44] sm:$0x1]  ;;  %s8839_s24 = sshll.u32 %s8916_s17, 4  ;;  %s8840_s24 = int_to_ptr.vmem [resolvable:$false] %s8839_s24 }
  0x2a   : > { %4115 = vmatpush1.bf16.msra.mxu0 %v4109_v42  ;;  %3454 = vmatprep.mubr.bf16.mxu0 %v8915_v4  ;;  %v2966_v13 = vsel %vm9044_vm4, %v2961_v2, %v2965_v50  ;;  %v2984_v14 = vor.u32 %v2983_v5, %v2979_v3  ;;  %v3005_v18 = vshrl.u32 %v7621_v6, 16  ;;  %v2994_v20 = vrot.slane %v2992_v10, 4  ;;  %v7628_v5 = vld [vmem:[%s9028_s25 + $0x50] sm:$0x1]  ;;  %v7629_v6 = vld [vmem:[%s9028_s25 + $0x54] sm:$0xf]  ;;  %p8842_p1 = scmp.lt.s32.totalorder %s10544_s12, %s8840_s24 }
  0x2b   : > { %v2975_v16 = vrot.slane %v2974_v8, 4  ;;  %v7661_v19 = vcombine.low %v2956_v12, %v2966_v13  ;;  %v2997_v21 = vrot.slane %v2995_v11, 5  ;;  %v2989_v23 = vrot.slane %v2987_v9, 5  ;;  %v8764_v9 = vld [vmem:[%s9028_s25 + $0x3c] sm:$0xff]  }
  0x2c   : > { %v2985_v22 = vrot.slane %v2984_v14, 4  ;;  %v3003_v24 = vrot.slane %v3001_v15, 5  ;;  %v3007_v25 = vrot.slane %v3005_v18, 4  ;;  %v3011_v29 = vshll.u32 %v7622_v17, 16 }
  0x2d   : > { %v2980_v30 = vsel %vm9044_vm4, %v2975_v16, %v2979_v3  ;;  %v2998_v31 = vor.u32 %v2997_v21, %v2994_v20  ;;  %v3016_v32 = vshrl.u32 %v7623_v26, 16  ;;  %v3019_v33 = vshll.u32 %v7623_v26, 16 }
  0x2e   : > { %7441 = vmatmul.mubr.msk.bf16.gmra.mrb[8].mxu1 %vm362_vm1, %v8761_v7  ;;  %v2990_v34 = vsel %vm9044_vm4, %v2985_v22, %v2989_v23  ;;  %v3008_v35 = vor.u32 %v3007_v25, %v3003_v24  ;;  %v3025_v36 = vshll.u32 %v7624_v27, 16  ;;  %v3029_v37 = vshrl.u32 %v7624_v27, 16  ;;  %v7630_v7 = vld [vmem:[%s9028_s25 + $0x58] sm:$0xf]  ;;  %v7632_v22 = vld [vmem:[%s9028_s25 + $0x60] sm:$0xf] }
  0x2f   : > { %480 = vmatprep.mubr.bf16.mxu1 %v8915_v4  ;;  %v3013_v38 = vrot.slane %v3011_v29, 5  ;;  %v7662_v39 = vcombine.low %v2980_v30, %v2990_v34  ;;  %v3018_v40 = vrot.slane %v3016_v32, 4  ;;  %v3021_v42 = vrot.slane %v3019_v33, 5  ;;  %v7633_v27 = vld [vmem:[%s9028_s25 + $0x64] sm:$0xf] }
  0x30   : > { %v2999_v44 = vrot.slane %v2998_v31, 4  ;;  %v3009_v45 = vrot.slane %v3008_v35, 4  ;;  %v3027_v46 = vrot.slane %v3025_v36, 5  ;;  %v3031_v47 = vrot.slane %v3029_v37, 4  ;;  %v8765_v31 = vld [vmem:[%s9028_s25 + $0x48] sm:$0xff]  }
  0x31   : > { %7680 = vmatmul.mubr.msk.bf16.gmra.mrb[4].mxu0 %vm362_vm1, %v7661_v19  ;;  %v3040_v50 = vshrl.u32 %v7626_v43, 16  ;;  %v3043_v51 = vshll.u32 %v7626_v43, 16  ;;  %v3022_v53 = vor.u32 %v3021_v42, %v3018_v40  ;;  %v3049_v54 = vshll.u32 %v7627_v48, 16 }
  0x32   : > { %3464 = vmatprep.mubr.bf16.mxu0 %v8915_v4  ;;  %v3053_v55 = vshrl.u32 %v7627_v48, 16  ;;  %v3004_v56 = vsel %vm9044_vm4, %v2999_v44, %v3003_v24  ;;  %v3014_v57 = vsel %vm9044_vm4, %v3009_v45, %v3013_v38  ;;  %v3032_v58 = vor.u32 %v3031_v47, %v3027_v46  ;;  %v7635_v45 = vld [vmem:[%s9028_s25 + $0x6c] sm:$0xf] }
  0x33   : > { %v3035_v59 = vshll.u32 %v7625_v49, 16  ;;  %v3042_v60 = vrot.slane %v3040_v50, 4  ;;  %v3045_v61 = vrot.slane %v3043_v51, 5  ;;  %v7663_v62 = vcombine.low %v3004_v56, %v3014_v57  ;;  %v7634_v49 = vld [vmem:[%s9028_s25 + $0x68] sm:$0x1] }
  0x34   : > { %v3023_v63 = vrot.slane %v3022_v53, 4  ;;  %v3051_v0 = vrot.slane %v3049_v54, 5  ;;  %v3055_v1 = vrot.slane %v3053_v55, 4  ;;  %v3033_v2 = vrot.slane %v3032_v58, 4  ;;  %v7636_v50 = vld [vmem:[%s9028_s25 + $0x70] sm:$0xf] }
  0x35   : > { %v3037_v3 = vrot.slane %v3035_v59, 5  ;;  %v3046_v8 = vor.u32 %v3045_v61, %v3042_v60  ;;  %v3059_v12 = vshll.u32 %v7628_v5, 16  ;;  %v3064_v13 = vshrl.u32 %v7629_v6, 16  ;;  %v8766_v53 = vld [vmem:[%s9028_s25 + $0x54] sm:$0xff]  }
  0x36   : > { %7442 = vmatmul.mubr.msk.bf16.gmra.mrb[12].mxu1 %vm362_vm1, %v8762_v28  ;;  %v3028_v10 = vsel %vm9044_vm4, %v3023_v63, %v3027_v46  ;;  %v3056_v11 = vor.u32 %v3055_v1, %v3051_v0  ;;  %v3067_v15 = vshll.u32 %v7629_v6, 16  ;;  %v3073_v16 = vshll.u32 %v7630_v7, 16  ;;  %v7631_v28 = vld [vmem:[%s9028_s25 + $0x5c] sm:$0x1] }
  0x37   : > { %490 = vmatprep.mubr.bf16.mxu1 %v8915_v4  ;;  %v3038_v14 = vsel %vm9044_vm4, %v3033_v2, %v3037_v3  ;;  %v3077_v17 = vshrl.u32 %v7630_v7, 16  ;;  %v3047_v18 = vrot.slane %v3046_v8, 4  ;;  %v3061_v21 = vrot.slane %v3059_v12, 5  ;;  %v7637_v3 = vld [vmem:[%s9028_s25 + $0x74] sm:$0x1] }
  0x38   : > { %v7664_v19 = vcombine.low %v3028_v10, %v3038_v14  ;;  %v3057_v20 = vrot.slane %v3056_v11, 4  ;;  %v3066_v23 = vrot.slane %v3064_v13, 4  ;;  %v3069_v24 = vrot.slane %v3067_v15, 5  ;;  %v7638_v7 = vld [vmem:[%s9028_s25 + $0x78] sm:$0xf]  ;;  %v8767_v10 = vld [vmem:[%s9028_s25 + $0x60] sm:$0xff]  }
  0x39   : > { %7681 = vmatmul.mubr.msk.bf16.gmra.mrb[8].mxu0 %vm362_vm1, %v7662_v39  ;;  %v3075_v25 = vrot.slane %v3073_v16, 5  ;;  %v3079_v26 = vrot.slane %v3077_v17, 4  ;;  %v3052_v29 = vsel %vm9044_vm4, %v3047_v18, %v3051_v0  ;;  %v3088_v30 = vshrl.u32 %v7632_v22, 16  ;;  %v7639_v8 = vld [vmem:[%s9028_s25 + $0x7c] sm:$0xf] }
  0x3a   : > { %3474 = vmatprep.mubr.bf16.mxu0 %v8915_v4  ;;  %v3062_v32 = vsel %vm9044_vm4, %v3057_v20, %v3061_v21  ;;  %v3091_v33 = vshll.u32 %v7632_v22, 16  ;;  %v3097_v34 = vshll.u32 %v7633_v27, 16  ;;  %v3101_v35 = vshrl.u32 %v7633_v27, 16 }
  0x3b   : > { %v3070_v36 = vor.u32 %v3069_v24, %v3066_v23  ;;  %v3080_v37 = vor.u32 %v3079_v26, %v3075_v25  ;;  %v3083_v38 = vshll.u32 %v7631_v28, 16  ;;  %v7665_v39 = vcombine.low %v3052_v29, %v3062_v32  ;;  %v7641_v23 = vld [vmem:[%s9028_s25 + $0x84] sm:$0xf]  ;;  %v7642_v28 = vld [vmem:[%s9028_s25 + $0x88] sm:$0xf]  ;;  %v8768_v32 = vld [vmem:[%s9028_s25 + $0x6c] sm:$0xff]  }
  0x3c   : > { %v3090_v40 = vrot.slane %v3088_v30, 4  ;;  %v3093_v42 = vrot.slane %v3091_v33, 5  ;;  %v3099_v43 = vrot.slane %v3097_v34, 5  ;;  %v3103_v44 = vrot.slane %v3101_v35, 4  ;;  %v7640_v29 = vld [vmem:[%s9028_s25 + $0x80] sm:$0x1] }
  0x3d   : > { %v3071_v46 = vrot.slane %v3070_v36, 4  ;;  %v3081_v47 = vrot.slane %v3080_v37, 4  ;;  %v3085_v48 = vrot.slane %v3083_v38, 5  ;;  %v3112_v51 = vshrl.u32 %v7635_v45, 16 }
  0x3e   : > { %7443 = vmatmul.mubr.msk.bf16.gmra.mrb[16].mxu1 %vm362_vm1, %v8763_v52  ;;  %v3115_v52 = vshll.u32 %v7635_v45, 16  ;;  %v3094_v54 = vor.u32 %v3093_v42, %v3090_v40  ;;  %v3104_v55 = vor.u32 %v3103_v44, %v3099_v43  ;;  %v3107_v56 = vshll.u32 %v7634_v49, 16 }
  0x3f   : > { %500 = vmatprep.mubr.bf16.mxu1 %v8915_v4  ;;  %v3076_v57 = vsel %vm9044_vm4, %v3071_v46, %v3075_v25  ;;  %v3086_v58 = vsel %vm9044_vm4, %v3081_v47, %v3085_v48  ;;  %v3121_v59 = vshll.u32 %v7636_v50, 16  ;;  %v3125_v60 = vshrl.u32 %v7636_v50, 16  ;;  %v7644_v46 = vld [vmem:[%s9028_s25 + $0x90] sm:$0xf] }
  0x40   : > { %v3114_v61 = vrot.slane %v3112_v51, 4  ;;  %v7666_v63 = vcombine.low %v3076_v57, %v3086_v58  ;;  %v3095_v0 = vrot.slane %v3094_v54, 4  ;;  %v3105_v1 = vrot.slane %v3104_v55, 4  ;;  %v9156_v47 = vld [vmem:[%s10598_s1 + $0x30] sm:$0xff]  ;;  %v7643_v51 = vld [vmem:[%s9028_s25 + $0x8c] sm:$0x1] }
  0x41   : > { %7682 = vmatmul.mubr.msk.bf16.gmra.mrb[12].mxu0 %vm362_vm1, %v7663_v62  ;;  %v3117_v62 = vrot.slane %v3115_v52, 5  ;;  %v3109_v2 = vrot.slane %v3107_v56, 5  ;;  %v3123_v5 = vrot.slane %v3121_v59, 5  ;;  %v3127_v6 = vrot.slane %v3125_v60, 4  ;;  %v7645_v52 = vld [vmem:[%s9028_s25 + $0x94] sm:$0xf] }
  0x42   : > { %3484 = vmatprep.mubr.bf16.mxu0 %v8915_v4  ;;  %v3100_v11 = vsel %vm9044_vm4, %v3095_v0, %v3099_v43  ;;  %v3131_v13 = vshll.u32 %v7637_v3, 16  ;;  %v3136_v14 = vshrl.u32 %v7638_v7, 16  ;;  %v3139_v16 = vshll.u32 %v7638_v7, 16  ;;  %v8769_v57 = vld [vmem:[%s9028_s25 + $0x78] sm:$0xff]  }
  0x43   : > { %v3110_v12 = vsel %vm9044_vm4, %v3105_v1, %v3109_v2  ;;  %v3128_v15 = vor.u32 %v3127_v6, %v3123_v5  ;;  %v3145_v17 = vshll.u32 %v7639_v8, 16  ;;  %v3149_v18 = vshrl.u32 %v7639_v8, 16  ;;  %v7646_v7 = vld [vmem:[%s9028_s25 + $0x98] sm:$0x1] }
  0x44   : > { %v3133_v21 = vrot.slane %v3131_v13, 5  ;;  %v3138_v22 = vrot.slane %v3136_v14, 4  ;;  %v3141_v25 = vrot.slane %v3139_v16, 5  ;;  %v3160_v30 = vshrl.u32 %v7641_v23, 16 }
  0x45   : > { %v3129_v24 = vrot.slane %v3128_v15, 4  ;;  %v3147_v26 = vrot.slane %v3145_v17, 5  ;;  %v3151_v27 = vrot.slane %v3149_v18, 4  ;;  %v3169_v34 = vshll.u32 %v7642_v28, 16  ;;  %v8770_v15 = vld [vmem:[%s9028_s25 + $0x84] sm:$0xff]  }
  0x46   : > { %7444 = vmatmul.mubr.msk.bf16.gmra.mrb[20].mxu1 %vm362_vm1, %v8764_v9  ;;  %v3118_v9 = vor.u32 %v3117_v62, %v3114_v61  ;;  %v3173_v35 = vshrl.u32 %v7642_v28, 16  ;;  %v3142_v37 = vor.u32 %v3141_v25, %v3138_v22  ;;  %v3162_v40 = vrot.slane %v3160_v30, 4  ;;  %v7650_v22 = vld [vmem:[%s9028_s25 + $0xa8] sm:$0xf]  ;;  %v7651_v25 = vld [vmem:[%s9028_s25 + $0xac] sm:$0xf] }
  0x47   : > { %510 = vmatprep.mubr.bf16.mxu1 %v8915_v4  ;;  %v3134_v36 = vsel %vm9044_vm4, %v3129_v24, %v3133_v21  ;;  %v3152_v38 = vor.u32 %v3151_v27, %v3147_v26  ;;  %v3171_v44 = vrot.slane %v3169_v34, 5  ;;  %v3184_v54 = vshrl.u32 %v7644_v46, 16 }
  0x48   : > { %v3119_v20 = vrot.slane %v3118_v9, 4  ;;  %v3175_v45 = vrot.slane %v3173_v35, 4  ;;  %v3143_v48 = vrot.slane %v3142_v37, 4  ;;  %v3187_v55 = vshll.u32 %v7644_v46, 16  ;;  %v8771_v37 = vld [vmem:[%s9028_s25 + $0x90] sm:$0xff]  }
  0x49   : > { %7683 = vmatmul.mubr.msk.bf16.gmra.mrb[16].mxu0 %vm362_vm1, %v7664_v19  ;;  %v7667_v19 = vcombine.low %v3100_v11, %v3110_v12  ;;  %v3153_v49 = vrot.slane %v3152_v38, 4  ;;  %v7845_v56 = vcombine.high %v9156_v47, %v9156_v47  ;;  %v3179_v59 = vshll.u32 %v7643_v51, 16  ;;  %v7648_v11 = vld [vmem:[%s9028_s25 + $0xa0] sm:$0xf]  ;;  %v7652_v46 = vld [vmem:[%s9028_s25 + $0xb0] sm:$0x1] }
  0x4a   : > { %3494 = vmatprep.mubr.bf16.mxu0 %v8915_v4  ;;  %v3124_v33 = vsel %vm9044_vm4, %v3119_v20, %v3123_v5  ;;  %v3176_v58 = vor.u32 %v3175_v45, %v3171_v44  ;;  %v3148_v60 = vsel %vm9044_vm4, %v3143_v48, %v3147_v26  ;;  %v3193_v62 = vshll.u32 %v7645_v52, 16  ;;  %v7654_v51 = vld [vmem:[%s9028_s25 + $0xb8] sm:$0xf] }
  0x4b   : > { %v7668_v43 = vcombine.low %v3124_v33, %v3134_v36  ;;  %7846 = vmatprep.subr.msk.bf16.mxu0 %vm411_vm0, %v7845_v56  ;;  %v3186_v1 = vrot.slane %v3184_v54, 4  ;;  %v3189_v2 = vrot.slane %v3187_v55, 5  ;;  %v3181_v6 = vrot.slane %v3179_v59, 5 }
  0x4c   : > { %v3177_v5 = vrot.slane %v3176_v58, 4  ;;  %v3195_v8 = vrot.slane %v3193_v62, 5  ;;  %v3203_v14 = vshll.u32 %v7646_v7, 16  ;;  %v3221_v21 = vshrl.u32 %v7648_v11, 16 }
  0x4d   : > { %v3190_v13 = vor.u32 %v3189_v2, %v3186_v1  ;;  %v3232_v33 = vshrl.u32 %v7650_v22, 16  ;;  %v3235_v34 = vshll.u32 %v7650_v22, 16  ;;  %v3241_v35 = vshll.u32 %v7651_v25, 16  ;;  %v675_v1 = vld [vmem:[%s9028_s25] sm:$0xf] }
  0x4e   : > { %7445 = vmatmul.mubr.msk.bf16.gmra.mrb[24].mxu1 %vm362_vm1, %v8765_v31  ;;  %v3163_v31 = vshll.u32 %v7641_v23, 16  ;;  %v3182_v16 = vsel %vm9044_vm4, %v3177_v5, %v3181_v6  ;;  %v3205_v24 = vrot.slane %v3203_v14, 5  ;;  %v3245_v36 = vshrl.u32 %v7651_v25, 16  ;;  %v676_v2 = vld [vmem:[%s9028_s25 + $0x4] sm:$0xf]  ;;  %v8773_v25 = vld [vmem:[%s9028_s25 + $0xa8] sm:$0xff]  }
  0x4f   : > { %520 = vmatprep.mubr.bf16.mxu1 %v8915_v4  ;;  %v3191_v26 = vrot.slane %v3190_v13, 4  ;;  %v3237_v45 = vrot.slane %v3235_v34, 5  ;;  %v3243_v48 = vrot.slane %v3241_v35, 5  ;;  %v3269_v62 = vshrl.u32 %v7654_v51, 16 }
  0x50   : > { %v3165_v42 = vrot.slane %v3163_v31, 5  ;;  %v7649_v31 = vld [vmem:[%s9028_s25 + $0xa4] sm:$0x1]  ;;  %v727_v13 = vshrl.u32 %v675_v1, 16  ;;  %v730_v14 = vshll.u32 %v675_v1, 16 }
  0x51   : > { %7684 = vmatmul.mubr.msk.bf16.gmra.mrb[20].mxu0 %vm362_vm1, %v7665_v39  ;;  %v3155_v39 = vshll.u32 %v7640_v29, 16  ;;  %v3196_v38 = vsel %vm9044_vm4, %v3191_v26, %v3195_v8  ;;  %v682_v1 = vld [vmem:[%s9028_s25 + $0x1c] sm:$0xf] }
  0x52   : > { %3504 = vmatprep.mubr.bf16.mxu0 %v8915_v4  ;;  %v729_v26 = vrot.slane %v727_v13, 4 }
  0x53   : > { %v3157_v50 = vrot.slane %v3155_v39, 5 }
  0x55   : > { %v3158_v61 = vsel %vm9044_vm4, %v3153_v49, %v3157_v50  ;;  %v3247_v49 = vrot.slane %v3245_v36, 4  ;;  %v7653_v50 = vld [vmem:[%s9028_s25 + $0xb4] sm:$0xf] }
  0x56   : > { %7446 = vmatmul.mubr.msk.bf16.gmra.mrb[28].mxu1 %vm362_vm1, %v8766_v53  ;;  %v3166_v53 = vor.u32 %v3165_v42, %v3162_v40  ;;  %v7669_v3 = vcombine.low %v3148_v60, %v3158_v61  ;;  %v3227_v40 = vshll.u32 %v7649_v31, 16  ;;  %v3256_v58 = vshrl.u32 %v7653_v50, 16 }
  0x57   : > { %530 = vmatprep.mubr.bf16.mxu1 %v8915_v4  ;;  %v3248_v59 = vor.u32 %v3247_v49, %v3243_v48  ;;  %v3259_v60 = vshll.u32 %v7653_v50, 16  ;;  %v3265_v61 = vshll.u32 %v7654_v51, 16  ;;  %v7658_v50 = vld [vmem:[%s9028_s25 + $0xc8] sm:$0x1] }
  0x58   : > { %v3167_v0 = vrot.slane %v3166_v53, 4  ;;  %v3229_v54 = vrot.slane %v3227_v40, 5  ;;  %v3258_v7 = vrot.slane %v3256_v58, 4 }
  0x59   : > { %7685 = vmatmul.mubr.msk.bf16.gmra.mrb[24].mxu0 %vm362_vm1, %v7666_v63  ;;  %v3197_v63 = vshrl.u32 %v7645_v52, 16 }
  0x5a   : > { %3514 = vmatprep.mubr.bf16.mxu0 %v8915_v4  ;;  %v3172_v12 = vsel %vm9044_vm4, %v3167_v0, %v3171_v44  ;;  %v3234_v44 = vrot.slane %v3232_v33, 4 }
  0x5b   : > { %v3199_v9 = vrot.slane %v3197_v63, 4  ;;  %v7670_v23 = vcombine.low %v3172_v12, %v3182_v16  ;;  %v8772_v63 = vld [vmem:[%s9028_s25 + $0x9c] sm:$0xff]   ;;  %v740_v16 = vshrl.u32 %v676_v2, 16 }
  0x5c   : > { %v3238_v56 = vor.u32 %v3237_v45, %v3234_v44  ;;  %v7655_v12 = vld [vmem:[%s9028_s25 + $0xbc] sm:$0x1] }
  0x5d   : > { %v3200_v20 = vor.u32 %v3199_v9, %v3195_v8  ;;  %v3249_v8 = vrot.slane %v3248_v59, 4  ;;  %v3261_v9 = vrot.slane %v3259_v60, 5  ;;  %v681_v60 = vld [vmem:[%s9028_s25 + $0x18] sm:$0xf] }
  0x5e   : > { %7447 = vmatmul.mubr.msk.bf16.gmra.mrb[32].mxu1 %vm362_vm1, %v8767_v10  ;;  %v7647_v10 = vld [vmem:[%s9028_s25 + $0x9c] sm:$0xf]  ;;  %v3239_v5 = vrot.slane %v3238_v56, 4 }
  0x5f   : > { %540 = vmatprep.mubr.bf16.mxu1 %v8915_v4  ;;  %v3208_v17 = vshrl.u32 %v7647_v10, 16  ;;  %v3211_v18 = vshll.u32 %v7647_v10, 16  ;;  %v3201_v30 = vrot.slane %v3200_v20, 4  ;;  %v9209_v10 = vrot.slane %v3265_v61, 5  ;;  %v7657_v20 = vld [vmem:[%s9028_s25 + $0xc4] sm:$0xf] }
  0x60   : > { %v3262_v22 = vor.u32 %v3261_v9, %v3258_v7  ;;  %v3289_v33 = vshll.u32 %v7657_v20, 16  ;;  %v3293_v34 = vshrl.u32 %v7657_v20, 16  ;;  %v8774_v61 = vld [vmem:[%s9028_s25 + $0xb4] sm:$0xff]   ;;  %v7696_v9 = vld [vmem:[%s9028_s25 + $0x10] sm:$0xf] }
  0x61   : > { %7686 = vmatmul.mubr.msk.bf16.gmra.mrb[28].mxu0 %vm362_vm1, %v7667_v19  ;;  %v3217_v19 = vshll.u32 %v7648_v11, 16  ;;  %v3210_v27 = vrot.slane %v3208_v17, 4  ;;  %v3213_v28 = vrot.slane %v3211_v18, 5  ;;  %v3206_v42 = vsel %vm9044_vm4, %v3201_v30, %v3205_v24  ;;  %v677_v30 = vld [vmem:[%s9028_s25 + $0x8] sm:$0x1] }
  0x62   : > { %3524 = vmatprep.mubr.bf16.mxu0 %v8915_v4  ;;  %v7671_v52 = vcombine.low %v3196_v38, %v3206_v42  ;;  %v3271_v11 = vrot.slane %v3269_v62, 4  ;;  %v3244_v18 = vsel %vm9044_vm4, %v3239_v5, %v3243_v48  ;;  %v3275_v24 = vshll.u32 %v7655_v12, 16  ;;  %v678_v38 = vld [vmem:[%s9028_s25 + $0xc] sm:$0xf] }
  0x63   : > { %v3219_v29 = vrot.slane %v3217_v19, 5  ;;  %v3214_v39 = vor.u32 %v3213_v28, %v3210_v27  ;;  %v7656_v19 = vld [vmem:[%s9028_s25 + $0xc0] sm:$0xf]  ;;  %v732_v27 = vrot.slane %v730_v14, 5  ;;  %v3263_v36 = vrot.slane %v3262_v22, 4 }
  0x64   : > { %v3280_v31 = vshrl.u32 %v7656_v19, 16  ;;  %v746_v44 = vshll.u32 %v677_v30, 16  ;;  %v9231_v48 = vrot.slane %v3289_v33, 5  ;;  %v3295_v49 = vrot.slane %v3293_v34, 4  ;;  %v7695_v22 = vld [vmem:[%s9028_s25 + $0xc] sm:$0xe] }
  0x65   : > { %v3215_v53 = vrot.slane %v3214_v39, 4  ;;  %v679_v39 = vld [vmem:[%s9028_s25 + $0x10] sm:$0xf]  ;;  %v733_v42 = vor.u32 %v732_v27, %v729_v26  ;;  %v751_v51 = vshrl.u32 %v678_v38, 16  ;;  %v784_v14 = vshll.u32 %v682_v1, 16 }
  0x66   : > { %7448 = vmatmul.mubr.msk.bf16.gmra.mrb[36].mxu1 %vm362_vm1, %v8768_v32  ;;  %v3223_v32 = vrot.slane %v3221_v21, 4  ;;  %v3282_v45 = vrot.slane %v3280_v31, 4  ;;  %v748_v59 = vrot.slane %v746_v44, 5  ;;  %v683_v26 = vld [vmem:[%s9028_s25 + $0x20] sm:$0x1] }
  0x67   : > { %550 = vmatprep.mubr.bf16.mxu1 %v8915_v4  ;;  %v3220_v0 = vsel %vm9044_vm4, %v3215_v53, %v3219_v29  ;;  %v760_v53 = vshll.u32 %v679_v39, 16  ;;  %v684_v31 = vld [vmem:[%s9028_s25 + $0x24] sm:$0xf]  ;;  %v794_v44 = vshll.u32 %v683_v26, 16 }
  0x69   : > { %7687 = vmatmul.mubr.msk.bf16.gmra.mrb[32].mxu0 %vm362_vm1, %v7668_v43  ;;  %v3224_v43 = vor.u32 %v3223_v32, %v3219_v29  ;;  %v742_v29 = vrot.slane %v740_v16, 4  ;;  %v3283_v32 = vshll.u32 %v7656_v19, 16 }
  0x6a   : > { %3534 = vmatprep.mubr.bf16.mxu0 %v8915_v4 }
  0x6b   : > { %v3225_v55 = vrot.slane %v3224_v43, 4 }
  0x6e   : > { %7449 = vmatmul.mubr.msk.bf16.gmra.mrb[40].mxu1 %vm362_vm1, %v8769_v57  ;;  %v3251_v57 = vshll.u32 %v7652_v46, 16  ;;  %v3285_v46 = vrot.slane %v3283_v32, 5 }
  0x6f   : > { %560 = vmatprep.mubr.bf16.mxu1 %v8915_v4 }
  0x70   : > { %v3253_v6 = vrot.slane %v3251_v57, 5  ;;  %v734_v57 = vrot.slane %v733_v42, 4  ;;  %v3286_v62 = vor.u32 %v3285_v46, %v3282_v45  ;;  %v799_v45 = vshrl.u32 %v684_v31, 16 }
  0x71   : > { %7688 = vmatmul.mubr.msk.bf16.gmra.mrb[36].mxu0 %vm362_vm1, %v7669_v3  ;;  %v3230_v3 = vsel %vm9044_vm4, %v3225_v55, %v3229_v54  ;;  %v764_v54 = vshrl.u32 %v679_v39, 16  ;;  %v3268_v55 = vsel %vm9044_vm4, %v3263_v36, %v9209_v10  ;;  %v685_v36 = vld [vmem:[%s9028_s25 + $0x28] sm:$0xf] }
  0x72   : > { %3544 = vmatprep.mubr.bf16.mxu0 %v8915_v4  ;;  %v7672_v17 = vcombine.low %v3220_v0, %v3230_v3  ;;  %v3254_v21 = vsel %vm9044_vm4, %v3249_v8, %v3253_v6  ;;  %v3299_v0 = vshll.u32 %v7658_v50, 16  ;;  %v753_v3 = vrot.slane %v751_v51, 4 }
  0x73   : > { %v7673_v35 = vcombine.low %v3244_v18, %v3254_v21  ;;  %v9247_v6 = vrot.slane %v760_v53, 5  ;;  %v766_v7 = vrot.slane %v764_v54, 4  ;;  %v3287_v16 = vrot.slane %v3286_v62, 4 }
  0x74   : > { %v3301_v18 = vrot.slane %v3299_v0, 5  ;;  %v808_v50 = vshll.u32 %v685_v36, 16  ;;  %v812_v51 = vshrl.u32 %v685_v36, 16  ;;  %v801_v62 = vrot.slane %v799_v45, 4 }
  0x75   : > { %v767_v21 = vor.u32 %v766_v7, %v9247_v6  ;;  %v3292_v32 = vsel %vm9044_vm4, %v3287_v16, %v9231_v48  ;;  %v7844_v7 = vcombine.low %v9156_v47, %v9156_v47 }
  0x76   : > { %7450 = vmatmul.mubr.msk.bf16.gmra.mrb[44].mxu1 %vm362_vm1, %v8770_v15  ;;  %v736_v15 = vshll.u32 %v676_v2, 16  ;;  %v680_v2 = vld [vmem:[%s9028_s25 + $0x14] sm:$0x1] }
  0x77   : > { %570 = vmatprep.mubr.bf16.mxu1 %v8915_v4  ;;  %v770_v19 = vshll.u32 %v680_v2, 16  ;;  %v814_v2 = vrot.slane %v812_v51, 4 }
  0x78   : > { %v9222_v28 = vrot.slane %v736_v15, 5  ;;  %v788_v15 = vshrl.u32 %v682_v1, 16  ;;  %v9293_v1 = vrot.slane %v808_v50, 5 }
  0x79   : > { %7689 = vmatmul.mubr.msk.bf16.gmra.mrb[40].mxu0 %vm362_vm1, %v7670_v23  ;;  %v3272_v23 = vor.u32 %v3271_v11, %v9209_v10  ;;  %v775_v10 = vshrl.u32 %v681_v60, 16  ;;  %v778_v11 = vshll.u32 %v681_v60, 16  ;;  %v772_v34 = vrot.slane %v770_v19, 5  ;;  %v7700_v60 = vld [vmem:[%s9028_s25 + $0x20] sm:$0x1] }
  0x7a   : > { %3554 = vmatprep.mubr.bf16.mxu0 %v8915_v4  ;;  %v743_v43 = vor.u32 %v742_v29, %v9222_v28  ;;  %v739_v12 = vsel %vm9044_vm4, %v734_v57, %v9222_v28  ;;  %v9261_v29 = vrot.slane %v784_v14, 5  ;;  %v790_v30 = vrot.slane %v788_v15, 4  ;;  %v7698_v57 = vld [vmem:[%s9028_s25 + $0x18] sm:$0xe] }
  0x7b   : > { %v3273_v40 = vrot.slane %v3272_v23, 4  ;;  %v3895_v23 = vrot.slane %v7696_v9, 5  ;;  %v777_v27 = vrot.slane %v775_v10, 4  ;;  %v780_v28 = vrot.slane %v778_v11, 5  ;;  %v688_v9 = vld [vmem:[%s9028_s25 + $0x34] sm:$0xf] }
  0x7c   : > { %v744_v58 = vrot.slane %v743_v43, 4  ;;  %v791_v46 = vor.u32 %v790_v30, %v9261_v29  ;;  %v7744_v11 = vrot.slane %v7698_v57, 9  ;;  %v815_v16 = vor.u32 %v814_v2, %v9293_v1  ;;  %v689_v30 = vld [vmem:[%s9028_s25 + $0x38] sm:$0x1] }
  0x7d   : > { %v3897_v39 = vrot.slane %v3895_v23, 4  ;;  %v781_v43 = vor.u32 %v780_v28, %v777_v27  ;;  %v832_v19 = vshll.u32 %v688_v9, 16  ;;  %v842_v45 = vshll.u32 %v689_v30, 16  ;;  %v7706_v57 = vld [vmem:[%s9028_s25 + $0x38] sm:$0x1] }
  0x7e   : > { %7451 = vmatmul.mubr.msk.bf16.gmra.mrb[48].mxu1 %vm362_vm1, %v8771_v37  ;;  %v3277_v37 = vrot.slane %v3275_v24, 5  ;;  %v749_v13 = vsel %vm9044_vm4, %v744_v58, %v748_v59  ;;  %v796_v59 = vrot.slane %v794_v44, 5  ;;  %v816_v28 = vrot.slane %v815_v16, 4 }
  0x7f   : > { %580 = vmatprep.mubr.bf16.mxu1 %v8915_v4  ;;  %v7456_v24 = vcombine.low %v739_v12, %v749_v13  ;;  %v782_v58 = vrot.slane %v781_v43, 4  ;;  %v3905_v13 = vrot.slane %v7700_v60, 5  ;;  %v844_v60 = vrot.slane %v842_v45, 5 }
  0x80   : > { %v3278_v56 = vsel %vm9044_vm4, %v3273_v40, %v3277_v37  ;;  %v3919_v16 = vrot.slane %v7706_v57, 5 }
  0x81   : > { %7690 = vmatmul.mubr.msk.bf16.gmra.mrb[44].mxu0 %vm362_vm1, %v7671_v52  ;;  %v754_v52 = vshll.u32 %v678_v38, 16  ;;  %v7674_v8 = vcombine.low %v3268_v55, %v3278_v56  ;;  %v768_v38 = vrot.slane %v767_v21, 4  ;;  %v787_v10 = vsel %vm9044_vm4, %v782_v58, %v9261_v29  ;;  %v693_v58 = vld [vmem:[%s9028_s25 + $0x48] sm:$0xf] }
  0x82   : > { %3564 = vmatprep.mubr.bf16.mxu0 %v8915_v4  ;;  %v4671_v21 = vsel %vm411_vm0, %v7844_v7, 0 }
  0x83   : > { %v756_v5 = vrot.slane %v754_v52, 5  ;;  %v773_v54 = vsel %vm9044_vm4, %v768_v38, %v772_v34 }
  0x85   : > { %v757_v20 = vor.u32 %v756_v5, %v753_v3  ;;  %v686_v5 = vld [vmem:[%s9028_s25 + $0x2c] sm:$0x1] }
  0x86   : > { %7452 = vmatmul.mubr.msk.bf16.gmra.mrb[52].mxu1 %vm362_vm1, %v8772_v63  ;;  %v3296_v63 = vor.u32 %v3295_v49, %v9231_v48  ;;  %v7699_v48 = vld [vmem:[%s9028_s25 + $0x1c] sm:$0xf]  ;;  %v802_v49 = vshll.u32 %v684_v31, 16 }
  0x87   : > { %590 = vmatprep.mubr.bf16.mxu1 %v8915_v4  ;;  %v758_v37 = vrot.slane %v757_v20, 4  ;;  %v836_v20 = vshrl.u32 %v688_v9, 16 }
  0x88   : > { %v804_v0 = vrot.slane %v802_v49, 5  ;;  %v7705_v49 = vld [vmem:[%s9028_s25 + $0x34] sm:$0xf] }
  0x89   : > { %7691 = vmatmul.mubr.msk.bf16.gmra.mrb[48].mxu0 %vm362_vm1, %v7672_v17  ;;  %v3297_v17 = vrot.slane %v3296_v63, 4  ;;  %v763_v53 = vsel %vm9044_vm4, %v758_v37, %v9247_v6  ;;  %v792_v63 = vrot.slane %v791_v46, 4  ;;  %v838_v34 = vrot.slane %v836_v20, 4  ;;  %v690_v37 = vld [vmem:[%s9028_s25 + $0x3c] sm:$0xf] }
  0x8a   : > { %3574 = vmatprep.mubr.bf16.mxu0 %v8915_v4  ;;  %v7457_v3 = vcombine.low %v763_v53, %v773_v54  ;;  %v805_v15 = vor.u32 %v804_v0, %v801_v62  ;;  %v847_v50 = vshrl.u32 %v690_v37, 16  ;;  %v850_v51 = vshll.u32 %v690_v37, 16  ;;  %v692_v62 = vld [vmem:[%s9028_s25 + $0x44] sm:$0x1]  ;;  %v697_v37 = vld [vmem:[%s9028_s25 + $0x58] sm:$0xf] }
  0x8b   : > { %v3302_v33 = vsel %vm9044_vm4, %v3297_v17, %v3301_v18  ;;  %v797_v14 = vsel %vm9044_vm4, %v792_v63, %v796_v59  ;;  %v818_v17 = vshll.u32 %v686_v5, 16  ;;  %v694_v63 = vld [vmem:[%s9028_s25 + $0x4c] sm:$0xf]  ;;  %v7708_v5 = vld [vmem:[%s9028_s25 + $0x40] sm:$0xf] }
  0x8c   : > { %v7675_v52 = vcombine.low %v3292_v32, %v3302_v33  ;;  %v7458_v26 = vcombine.low %v787_v10, %v797_v14  ;;  %v806_v27 = vrot.slane %v805_v15, 4  ;;  %v9319_v33 = vrot.slane %v832_v19, 5  ;;  %v7707_v19 = vld [vmem:[%s9028_s25 + $0x3c] sm:$0xe] }
  0x8d   : > { %v820_v29 = vrot.slane %v818_v17, 5  ;;  %v849_v2 = vrot.slane %v847_v50, 4  ;;  %v871_v10 = vshrl.u32 %v693_v58, 16  ;;  %v904_v50 = vshll.u32 %v697_v37, 16 }
  0x8e   : > { %7453 = vmatmul.mubr.msk.bf16.gmra.mrb[56].mxu1 %vm362_vm1, %v8773_v25  ;;  %v7697_v25 = vld [vmem:[%s9028_s25 + $0x14] sm:$0x1]  ;;  %v811_v43 = vsel %vm9044_vm4, %v806_v27, %v9293_v1 }
  0x8f   : > { %600 = vmatprep.mubr.bf16.mxu1 %v8915_v4  ;;  %v3898_v40 = vrot.slane %v7697_v25, 5  ;;  %v7702_v25 = vld [vmem:[%s9028_s25 + $0x28] sm:$0xf]  ;;  %v821_v44 = vsel %vm9044_vm4, %v816_v28, %v820_v29 }
  0x90   : > { %v3909_v36 = vrot.slane %v7702_v25, 5  ;;  %v7459_v59 = vcombine.low %v811_v43, %v821_v44  ;;  %v695_v25 = vld [vmem:[%s9028_s25 + $0x50] sm:$0x1] }
  0x91   : > { %7692 = vmatmul.mubr.msk.bf16.gmra.mrb[52].mxu0 %vm362_vm1, %v7673_v35  ;;  %v7743_v35 = vrot.slane %v7695_v22, 9  ;;  %v3899_v56 = vsel %vm9274_vm7, %v3897_v39, %v3898_v40  ;;  %v691_v39 = vld [vmem:[%s9028_s25 + $0x40] sm:$0xf]  ;;  %v890_v43 = vshll.u32 %v695_v25, 16 }
  0x92   : > { %3584 = vmatprep.mubr.bf16.mxu0 %v8915_v4  ;;  %v856_v54 = vshll.u32 %v691_v39, 16 }
  0x93   : > { %v3896_v55 = vsel %vm9274_vm7, %v7743_v35, %v3895_v23  ;;  %v7703_v35 = vld [vmem:[%s9028_s25 + $0x2c] sm:$0x1] }
  0x94   : > { %v7760_v6 = vcombine.low %v3896_v55, %v3899_v56  ;;  %v3912_v53 = vrot.slane %v7703_v35, 5  ;;  %v860_v55 = vshrl.u32 %v691_v39, 16  ;;  %v7704_v56 = vld [vmem:[%s9028_s25 + $0x30] sm:$0xe] }
  0x95   : > { %v7746_v14 = vrot.slane %v7704_v56, 9  ;;  %v7507_v56 = vld [vmem:[%s10598_s1 + $0x10] sm:$0xff] }
  0x96   : > { %7454 = vmatmul.mubr.msk.bf16.gmra.mrb[60].mxu1 %vm362_vm1, %v8774_v61  ;;  %v3902_v61 = vrot.slane %v7699_v48, 5  ;;  %v839_v48 = vor.u32 %v838_v34, %v9319_v33  ;;  %v862_v9 = vrot.slane %v860_v55, 4  ;;  %v7710_v55 = vld [vmem:[%s9028_s25 + $0x48] sm:$0xe] }
  0x97   : > { %1251 = vmatprep.mubr.bf16.mxu1 %v8915_v4 }
  0x98   : > { %v3904_v12 = vrot.slane %v3902_v61, 4  ;;  %v3903_v22 = vsel %vm9274_vm7, %v7744_v11, %v3902_v61  ;;  %v3916_v61 = vrot.slane %v7705_v49, 5  ;;  %v840_v1 = vrot.slane %v839_v48, 4 }
  0x99   : > { %7693 = vmatmul.mubr.msk.bf16.gmra.mrb[56].mxu0 %vm362_vm1, %v7674_v8  ;;  %v687_v8 = vld [vmem:[%s9028_s25 + $0x30] sm:$0xf]  ;;  %v874_v11 = vshll.u32 %v693_v58, 16 }
  0x9a   : > { %3594 = vmatprep.mubr.bf16.mxu0 %v8915_v4  ;;  %v823_v47 = vshrl.u32 %v687_v8, 16  ;;  %v826_v18 = vshll.u32 %v687_v8, 16  ;;  %v3906_v23 = vsel %vm9274_vm7, %v3904_v12, %v3905_v13  ;;  %v9346_v8 = vrot.slane %v856_v54, 5 }
  0x9b   : > { %v7761_v40 = vcombine.low %v3903_v22, %v3906_v23  ;;  %v880_v12 = vshll.u32 %v694_v63, 16  ;;  %v884_v13 = vshrl.u32 %v694_v63, 16  ;;  %v3918_v15 = vrot.slane %v3916_v61, 4  ;;  %v7709_v23 = vld [vmem:[%s9028_s25 + $0x44] sm:$0x1] }
  0x9c   : > { %v825_v31 = vrot.slane %v823_v47, 4  ;;  %v828_v32 = vrot.slane %v826_v18, 5  ;;  %v866_v18 = vshll.u32 %v692_v62, 16  ;;  %v863_v22 = vor.u32 %v862_v9, %v9346_v8  ;;  %v7712_v63 = vld [vmem:[%s9028_s25 + $0x50] sm:$0x1] }
  0x9d   : > { %v876_v27 = vrot.slane %v874_v11, 5  ;;  %v9359_v28 = vrot.slane %v880_v12, 5  ;;  %v886_v29 = vrot.slane %v884_v13, 4  ;;  %v3917_v30 = vsel %vm9274_vm7, %v7746_v14, %v3916_v61  ;;  %v699_v11 = vld [vmem:[%s9028_s25 + $0x60] sm:$0xf] }
  0x9e   : > { %7475 = vmatmul.mubr.msk.bf16.vlgmr.msra.gmra.mrb[0].mxu1 %vm362_vm1, %v7456_v24  ;;  %v7701_v24 = vld [vmem:[%s9028_s25 + $0x24] sm:$0xe]  ;;  %v829_v46 = vor.u32 %v828_v32, %v825_v31  ;;  %v3920_v31 = vsel %vm9274_vm7, %v3918_v15, %v3919_v16  ;;  %v696_v32 = vld [vmem:[%s9028_s25 + $0x54] sm:$0xf]  ;;  %v868_v35 = vrot.slane %v866_v18, 5  ;;  %v7748_v9 = vrot.slane %v7710_v55, 9 }
  0x9f   : > { %1261 = vmatprep.mubr.bf16.mxu1 %v8915_v4  ;;  %v7745_v38 = vrot.slane %v7701_v24, 9  ;;  %v3923_v24 = vrot.slane %v7708_v5, 5  ;;  %v887_v45 = vor.u32 %v886_v29, %v9359_v28  ;;  %v895_v48 = vshrl.u32 %v696_v32, 16  ;;  %v700_v12 = vld [vmem:[%s9028_s25 + $0x64] sm:$0xf] }
  0xa0   : > { %v830_v0 = vrot.slane %v829_v46, 4  ;;  %v7711_v46 = vld [vmem:[%s9028_s25 + $0x4c] sm:$0xf]  ;;  %v898_v49 = vshll.u32 %v696_v32, 16  ;;  %v7525_v5 = vcombine.high %v7507_v56, %v7507_v56  ;;  %v922_v25 = vshll.u32 %v699_v11, 16 }
  0xa1   : > { %7694 = vmatmul.mubr.msk.bf16.gmra.mrb[60].mxu0 %vm362_vm1, %v7675_v52  ;;  %v3911_v52 = vrot.slane %v3909_v36, 4  ;;  %v3925_v39 = vrot.slane %v3923_v24, 4  ;;  %v888_v62 = vrot.slane %v887_v45, 4  ;;  %v702_v29 = vld [vmem:[%s9028_s25 + $0x6c] sm:$0xf] }
  0xa2   : > { %4146 = vmatprep.mubr.bf16.mxu0 %v8915_v4  ;;  %v835_v20 = vsel %vm9044_vm4, %v830_v0, %v9319_v33  ;;  %v897_v0 = vrot.slane %v895_v48, 4  ;;  %7526 = vmatprep.subr.msk.bf16.mxu1 %vm411_vm0, %v7525_v5 }
  0xa3   : > { %v3913_v7 = vsel %vm9274_vm7, %v3911_v52, %v3912_v53  ;;  %v7763_v52 = vcombine.low %v3917_v30, %v3920_v31 }
  0xa6   : > { %7476 = vmatmul.mubr.msk.bf16.gmra.mrb[4].mxu1 %vm362_vm1, %v7457_v3  ;;  %v852_v3 = vrot.slane %v850_v51, 5  ;;  %v908_v51 = vshrl.u32 %v697_v37, 16 }
  0xa7   : > { %1271 = vmatprep.mubr.bf16.mxu1 %v8915_v4 }
  0xa8   : > { %v853_v47 = vor.u32 %v852_v3, %v849_v2  ;;  %v9387_v2 = vrot.slane %v904_v50, 5  ;;  %v910_v3 = vrot.slane %v908_v51, 4  ;;  %v7716_v50 = vld [vmem:[%s9028_s25 + $0x60] sm:$0xe] }
  0xa9   : > { %7779 = vmatmul.mubr.msk.bf16.vlgmr.msra.gmra.mrb[0].mxu0 %vm362_vm1, %v7760_v6  ;;  %v3910_v6 = vsel %vm9274_vm7, %v7745_v38, %v3909_v36  ;;  %v7747_v36 = vrot.slane %v7707_v19, 9  ;;  %v864_v38 = vrot.slane %v863_v22, 4  ;;  %v7713_v22 = vld [vmem:[%s9028_s25 + $0x54] sm:$0xe] }
  0xaa   : > { %4677 = vmatpush1.bf16.msra.mxu0 %v4671_v21  ;;  %4156 = vmatprep.mubr.bf16.mxu0 %v8915_v4  ;;  %v7762_v17 = vcombine.low %v3910_v6, %v3913_v7  ;;  %v845_v21 = vsel %vm9044_vm4, %v840_v1, %v844_v60  ;;  %v854_v34 = vrot.slane %v853_v47, 4  ;;  %v3930_v60 = vrot.slane %v7711_v46, 5  ;;  %v704_v46 = vld [vmem:[%s9028_s25 + $0x74] sm:$0x1] }
  0xab   : > { %v7460_v33 = vcombine.low %v835_v20, %v845_v21  ;;  %v3924_v54 = vsel %vm9274_vm7, %v7747_v36, %v3923_v24  ;;  %v869_v57 = vsel %vm9044_vm4, %v864_v38, %v868_v35  ;;  %v900_v1 = vrot.slane %v898_v49, 5  ;;  %v9408_v21 = vld [vmem:[%s10598_s1 + $0x38] sm:$0xff] }
  0xac   : > { %v859_v53 = vsel %vm9044_vm4, %v854_v34, %v9346_v8  ;;  %v7524_v6 = vcombine.low %v7507_v56, %v7507_v56  ;;  %v698_v8 = vld [vmem:[%s9028_s25 + $0x5c] sm:$0x1]  ;;  %v3932_v16 = vrot.slane %v3930_v60, 4  ;;  %v911_v19 = vor.u32 %v910_v3, %v9387_v2  ;;  %v705_v3 = vld [vmem:[%s9028_s25 + $0x78] sm:$0xf] }
  0xad   : > { %v7461_v7 = vcombine.low %v859_v53, %v869_v57  ;;  %v901_v18 = vor.u32 %v900_v1, %v897_v0  ;;  %v914_v20 = vshll.u32 %v698_v8, 16  ;;  %v919_v24 = vshrl.u32 %v699_v11, 16  ;;  %v7718_v57 = vld [vmem:[%s9028_s25 + $0x68] sm:$0x1]  ;;  %v9444_v0 = vld [vmem:[%s9028_s25 + $0x70] sm:$0xf] }
  0xae   : > { %7477 = vmatmul.mubr.msk.bf16.gmra.mrb[8].mxu1 %vm362_vm1, %v7458_v26  ;;  %v873_v26 = vrot.slane %v871_v10, 4  ;;  %v9393_v10 = vld [vmem:[%s9028_s25 + $0x58] sm:$0xf]  ;;  %v1919_v13 = vsel %vm411_vm0, %v7524_v6, 0  ;;  %v3931_v30 = vsel %vm9274_vm7, %v7748_v9, %v3930_v60  ;;  %v7929_v34 = vcombine.high %v9408_v21, %v9408_v21 }
  0xaf   : > { %1281 = vmatprep.mubr.bf16.mxu1 %v8915_v4  ;;  %1925 = vmatpush1.bf16.msra.mxu1 %v1919_v13  ;;  %v3937_v32 = vrot.slane %v9393_v10, 5  ;;  %v902_v36 = vrot.slane %v901_v18, 4  ;;  %v912_v37 = vrot.slane %v911_v19, 4  ;;  %v916_v38 = vrot.slane %v914_v20, 5  ;;  %v7719_v18 = vld [vmem:[%s9028_s25 + $0x6c] sm:$0xe] }
  0xb0   : > { %v877_v44 = vor.u32 %v876_v27, %v873_v26  ;;  %v928_v26 = vshll.u32 %v700_v12, 16  ;;  %v932_v27 = vshrl.u32 %v700_v12, 16  ;;  %7930 = vmatprep.subr.msk.bf16.mxu0 %vm411_vm0, %v7929_v34  ;;  %v7749_v48 = vrot.slane %v7713_v22, 9  ;;  %v7721_v19 = vld [vmem:[%s9028_s25 + $0x74] sm:$0x1] }
  0xb1   : > { %7780 = vmatmul.mubr.msk.bf16.gmra.mrb[4].mxu0 %vm362_vm1, %v7761_v40  ;;  %v3926_v40 = vrot.slane %v7709_v23, 5  ;;  %v7715_v23 = vld [vmem:[%s9028_s25 + $0x5c] sm:$0x1]  ;;  %v3939_v51 = vrot.slane %v3937_v32, 4  ;;  %v943_v53 = vshrl.u32 %v702_v29, 16  ;;  %v907_v56 = vsel %vm9044_vm4, %v902_v36, %v9387_v2 }
  0xb2   : > { %4166 = vmatprep.mubr.bf16.mxu0 %v8915_v4  ;;  %v878_v61 = vrot.slane %v877_v44, 4  ;;  %v9428_v44 = vrot.slane %v928_v26, 5  ;;  %v934_v45 = vrot.slane %v932_v27, 4  ;;  %v3940_v49 = vrot.slane %v7715_v23, 5 }
  0xb3   : > { %v3927_v58 = vsel %vm9274_vm7, %v3925_v39, %v3926_v40  ;;  %v9425_v39 = vld [vmem:[%s9028_s25 + $0x64] sm:$0xf]  ;;  %v921_v40 = vrot.slane %v919_v24, 4  ;;  %v917_v60 = vsel %vm9044_vm4, %v912_v37, %v916_v38  ;;  %v3938_v1 = vsel %vm9274_vm7, %v7749_v48, %v3937_v32 }
  0xb4   : > { %v7764_v14 = vcombine.low %v3924_v54, %v3927_v58  ;;  %v883_v15 = vsel %vm9044_vm4, %v878_v61, %v9359_v28  ;;  %v701_v28 = vld [vmem:[%s9028_s25 + $0x68] sm:$0x1]  ;;  %v946_v54 = vshll.u32 %v702_v29, 16  ;;  %v962_v2 = vshll.u32 %v704_v46, 16  ;;  %v707_v29 = vld [vmem:[%s9028_s25 + $0x80] sm:$0x1] }
  0xb5   : > { %v7750_v6 = vrot.slane %v7716_v50, 9  ;;  %v7463_v9 = vcombine.low %v907_v56, %v917_v60  ;;  %v3941_v10 = vsel %vm9274_vm7, %v3939_v51, %v3940_v49  ;;  %v3951_v20 = vrot.slane %v9444_v0, 5  ;;  %v708_v32 = vld [vmem:[%s9028_s25 + $0x84] sm:$0xf]  ;;  %v7722_v60 = vld [vmem:[%s9028_s25 + $0x78] sm:$0xe] }
  0xb6   : > { %7478 = vmatmul.mubr.msk.bf16.gmra.mrb[12].mxu1 %vm362_vm1, %v7459_v59  ;;  %v892_v59 = vrot.slane %v890_v43, 5  ;;  %v924_v43 = vrot.slane %v922_v25, 5  ;;  %v948_v8 = vrot.slane %v946_v54, 5  ;;  %v967_v22 = vshrl.u32 %v705_v3, 16 }
  0xb7   : > { %1291 = vmatprep.mubr.bf16.mxu1 %v8915_v4  ;;  %v970_v23 = vshll.u32 %v705_v3, 16  ;;  %v7766_v24 = vcombine.low %v3938_v1, %v3941_v10  ;;  %v7751_v34 = vrot.slane %v7719_v18, 9  ;;  %v3953_v48 = vrot.slane %v3951_v20, 4  ;;  %v7724_v1 = vld [vmem:[%s9028_s25 + $0x80] sm:$0x1] }
  0xb8   : > { %v893_v47 = vsel %vm9044_vm4, %v888_v62, %v892_v59  ;;  %v925_v61 = vor.u32 %v924_v43, %v921_v40  ;;  %v935_v62 = vor.u32 %v934_v45, %v9428_v44  ;;  %v709_v40 = vld [vmem:[%s9028_s25 + $0x88] sm:$0xf]  ;;  %v969_v43 = vrot.slane %v967_v22, 4  ;;  %v712_v3 = vld [vmem:[%s9028_s25 + $0x94] sm:$0xf] }
  0xb9   : > { %7781 = vmatmul.mubr.msk.bf16.gmra.mrb[8].mxu0 %vm362_vm1, %v7762_v17  ;;  %v3933_v17 = vrot.slane %v7712_v63, 5  ;;  %v7462_v35 = vcombine.low %v883_v15, %v893_v47  ;;  %v3944_v63 = vrot.slane %v9425_v39, 5  ;;  %v964_v47 = vrot.slane %v962_v2, 5  ;;  %v710_v2 = vld [vmem:[%s9028_s25 + $0x8c] sm:$0x1] }
  0xba   : > { %4176 = vmatprep.mubr.bf16.mxu0 %v8915_v4  ;;  %v926_v13 = vrot.slane %v925_v61, 4  ;;  %v986_v49 = vshll.u32 %v707_v29, 16  ;;  %v991_v50 = vshrl.u32 %v708_v32, 16  ;;  %v994_v51 = vshll.u32 %v708_v32, 16  ;;  %v711_v61 = vld [vmem:[%s9028_s25 + $0x90] sm:$0xf] }
  0xbb   : > { %v3934_v31 = vsel %vm9274_vm7, %v3932_v16, %v3933_v17  ;;  %v3946_v15 = vrot.slane %v3944_v63, 4  ;;  %v3947_v16 = vrot.slane %v7718_v57, 5  ;;  %v706_v17 = vld [vmem:[%s9028_s25 + $0x7c] sm:$0xf]  ;;  %v7752_v18 = vrot.slane %v7722_v60, 9 }
  0xbc   : > { %v7765_v55 = vcombine.low %v3931_v30, %v3934_v31  ;;  %v931_v27 = vsel %vm9044_vm4, %v926_v13, %v9428_v44  ;;  %v976_v30 = vshll.u32 %v706_v17, 16  ;;  %v980_v31 = vshrl.u32 %v706_v17, 16  ;;  %v7727_v29 = vld [vmem:[%s9028_s25 + $0x8c] sm:$0x1] }
  0xbd   : > { %v3948_v37 = vsel %vm9274_vm7, %v3946_v15, %v3947_v16  ;;  %v972_v44 = vrot.slane %v970_v23, 5  ;;  %v993_v10 = vrot.slane %v991_v50, 4  ;;  %v1018_v15 = vshll.u32 %v711_v61, 16 }
  0xbe   : > { %7479 = vmatmul.mubr.msk.bf16.gmra.mrb[16].mxu1 %vm362_vm1, %v7460_v33  ;;  %v703_v33 = vld [vmem:[%s9028_s25 + $0x70] sm:$0xf]  ;;  %v978_v45 = vrot.slane %v976_v30, 5  ;;  %v982_v46 = vrot.slane %v980_v31, 4  ;;  %v1024_v16 = vshll.u32 %v712_v3, 16  ;;  %v1028_v17 = vshrl.u32 %v712_v3, 16 }
  0xbf   : > { %1301 = vmatprep.mubr.bf16.mxu1 %v8915_v4  ;;  %v952_v58 = vshll.u32 %v703_v33, 16  ;;  %v956_v59 = vshrl.u32 %v703_v33, 16  ;;  %v3945_v33 = vsel %vm9274_vm7, %v7750_v6, %v3944_v63  ;;  %v973_v56 = vor.u32 %v972_v44, %v969_v43  ;;  %v715_v43 = vld [vmem:[%s9028_s25 + $0xa0] sm:$0xf]  ;;  %v7730_v3 = vld [vmem:[%s9028_s25 + $0x98] sm:$0x1] }
  0xc0   : > { %v983_v57 = vor.u32 %v982_v46, %v978_v45  ;;  %v3952_v63 = vsel %vm9274_vm7, %v7751_v34, %v3951_v20  ;;  %v3961_v22 = vrot.slane %v7724_v1, 5  ;;  %v1010_v23 = vshll.u32 %v710_v2, 16  ;;  %v7728_v1 = vld [vmem:[%s9028_s25 + $0x90] sm:$0xe] }
  0xc1   : > { %7782 = vmatmul.mubr.msk.bf16.gmra.mrb[12].mxu0 %vm362_vm1, %v7763_v52  ;;  %v938_v52 = vshll.u32 %v701_v28, 16  ;;  %v954_v11 = vrot.slane %v952_v58, 5  ;;  %v958_v12 = vrot.slane %v956_v59, 4  ;;  %v1000_v58 = vshll.u32 %v709_v40, 16 }
  0xc2   : > { %4186 = vmatprep.mubr.bf16.mxu0 %v8915_v4  ;;  %v1004_v59 = vshrl.u32 %v709_v40, 16  ;;  %v984_v6 = vrot.slane %v983_v57, 4  ;;  %v1020_v31 = vrot.slane %v1018_v15, 5  ;;  %v9504_v32 = vrot.slane %v1024_v16, 5  ;;  %v714_v40 = vld [vmem:[%s9028_s25 + $0x9c] sm:$0xf] }
  0xc3   : > { %v940_v5 = vrot.slane %v938_v52, 5  ;;  %v959_v26 = vor.u32 %v958_v12, %v954_v11  ;;  %v7767_v52 = vcombine.low %v3945_v33, %v3948_v37  ;;  %v9493_v12 = vrot.slane %v1000_v58, 5 }
  0xc4   : > { %v1006_v13 = vrot.slane %v1004_v59, 4  ;;  %v1030_v33 = vrot.slane %v1028_v17, 4  ;;  %v7754_v15 = vrot.slane %v7728_v1, 9  ;;  %v3975_v17 = vrot.slane %v7730_v3, 5 }
  0xc5   : > { %v960_v39 = vrot.slane %v959_v26, 4 }
  0xc6   : > { %7480 = vmatmul.mubr.msk.bf16.gmra.mrb[20].mxu1 %vm362_vm1, %v7461_v7  ;;  %v945_v7 = vrot.slane %v943_v53, 4  ;;  %v1007_v26 = vor.u32 %v1006_v13, %v9493_v12  ;;  %v1031_v50 = vor.u32 %v1030_v33, %v9504_v32  ;;  %v718_v13 = vld [vmem:[%s9028_s25 + $0xac] sm:$0xf]  ;;  %v7731_v33 = vld [vmem:[%s9028_s25 + $0x9c] sm:$0xe] }
  0xc7   : > { %1311 = vmatprep.mubr.bf16.mxu1 %v8915_v4  ;;  %v965_v54 = vsel %vm9044_vm4, %v960_v39, %v964_v47 }
  0xc8   : > { %v949_v25 = vor.u32 %v948_v8, %v945_v7  ;;  %v988_v7 = vrot.slane %v986_v49, 5 }
  0xc9   : > { %7783 = vmatmul.mubr.msk.bf16.gmra.mrb[16].mxu0 %vm362_vm1, %v7764_v14  ;;  %v936_v14 = vrot.slane %v935_v62, 4 }
  0xca   : > { %4196 = vmatprep.mubr.bf16.mxu0 %v8915_v4  ;;  %v950_v38 = vrot.slane %v949_v25, 4 }
  0xcb   : > { %v941_v28 = vsel %vm9044_vm4, %v936_v14, %v940_v5  ;;  %v974_v5 = vrot.slane %v973_v56, 4  ;;  %v1015_v14 = vshrl.u32 %v711_v61, 16  ;;  %v1052_v56 = vshrl.u32 %v715_v43, 16 }
  0xcc   : > { %v7464_v36 = vcombine.low %v931_v27, %v941_v28  ;;  %v955_v53 = vsel %vm9044_vm4, %v950_v38, %v954_v11  ;;  %v996_v11 = vrot.slane %v994_v51, 5  ;;  %v7725_v27 = vld [vmem:[%s9028_s25 + $0x84] sm:$0xe]  ;;  %v1012_v38 = vrot.slane %v1010_v23, 5 }
  0xcd   : > { %v7465_v62 = vcombine.low %v955_v53, %v965_v54  ;;  %v1017_v30 = vrot.slane %v1015_v14, 4  ;;  %v7753_v39 = vrot.slane %v7725_v27, 9  ;;  %v1039_v53 = vshrl.u32 %v714_v40, 16 }
  0xce   : > { %7481 = vmatmul.mubr.msk.bf16.gmra.mrb[24].mxu1 %vm362_vm1, %v7462_v35  ;;  %v3954_v35 = vrot.slane %v7721_v19, 5  ;;  %v979_v19 = vsel %vm9044_vm4, %v974_v5, %v978_v45  ;;  %v997_v25 = vor.u32 %v996_v11, %v993_v10  ;;  %v1008_v45 = vrot.slane %v1007_v26, 4  ;;  %v716_v10 = vld [vmem:[%s9028_s25 + $0xa4] sm:$0x1] }
  0xcf   : > { %1321 = vmatprep.mubr.bf16.mxu1 %v8915_v4  ;;  %v1021_v49 = vor.u32 %v1020_v31, %v1017_v30  ;;  %v1042_v54 = vshll.u32 %v714_v40, 16  ;;  %v1041_v5 = vrot.slane %v1039_v53, 4  ;;  %v1076_v26 = vshrl.u32 %v718_v13, 16  ;;  %v719_v40 = vld [vmem:[%s9028_s25 + $0xb0] sm:$0x1] }
  0xd0   : > { %v3955_v0 = vsel %vm9274_vm7, %v3953_v48, %v3954_v35  ;;  %v713_v35 = vld [vmem:[%s9028_s25 + $0x98] sm:$0x1]  ;;  %v998_v44 = vrot.slane %v997_v25, 4  ;;  %v3968_v48 = vrot.slane %v7727_v29, 5  ;;  %v1013_v59 = vsel %vm9044_vm4, %v1008_v45, %v1012_v38 }
  0xd1   : > { %7784 = vmatmul.mubr.msk.bf16.gmra.mrb[20].mxu0 %vm362_vm1, %v7765_v55  ;;  %v7723_v55 = vld [vmem:[%s9028_s25 + $0x7c] sm:$0xf]  ;;  %v7768_v47 = vcombine.low %v3952_v63, %v3955_v0  ;;  %v1034_v51 = vshll.u32 %v713_v35, 16  ;;  %v1032_v63 = vrot.slane %v1031_v50, 4  ;;  %v1072_v25 = vshll.u32 %v718_v13, 16 }
  0xd2   : > { %4206 = vmatprep.mubr.bf16.mxu0 %v8915_v4  ;;  %v3958_v8 = vrot.slane %v7723_v55, 5  ;;  %v1048_v55 = vshll.u32 %v715_v43, 16  ;;  %v1003_v58 = vsel %vm9044_vm4, %v998_v44, %v9493_v12  ;;  %v717_v12 = vld [vmem:[%s9028_s25 + $0xa8] sm:$0xf]  ;;  %v7733_v35 = vld [vmem:[%s9028_s25 + $0xa4] sm:$0x1] }
  0xd3   : > { %v1036_v0 = vrot.slane %v1034_v51, 5  ;;  %v1063_v23 = vshrl.u32 %v717_v12, 16  ;;  %v1074_v38 = vrot.slane %v1072_v25, 5  ;;  %v720_v44 = vld [vmem:[%s9028_s25 + $0xb4] sm:$0xf]  ;;  %v3982_v50 = vrot.slane %v7733_v35, 5 }
  0xd4   : > { %v3960_v20 = vrot.slane %v3958_v8, 4  ;;  %v3959_v34 = vsel %vm9274_vm7, %v7752_v18, %v3958_v8  ;;  %v1054_v8 = vrot.slane %v1052_v56, 4  ;;  %v721_v45 = vld [vmem:[%s9028_s25 + $0xb8] sm:$0xf]  ;;  %v1087_v56 = vshrl.u32 %v720_v44, 16 }
  0xd6   : > { %7482 = vmatmul.mubr.msk.bf16.gmra.mrb[28].mxu1 %vm362_vm1, %v7463_v9  ;;  %v7726_v9 = vld [vmem:[%s9028_s25 + $0x88] sm:$0xf]  ;;  %v3962_v37 = vsel %vm9274_vm7, %v3960_v20, %v3961_v22  ;;  %v1058_v20 = vshll.u32 %v716_v10, 16  ;;  %v7732_v22 = vld [vmem:[%s9028_s25 + $0xa0] sm:$0xf] }
  0xd7   : > { %1331 = vmatprep.mubr.bf16.mxu1 %v8915_v4  ;;  %v3965_v28 = vrot.slane %v7726_v9, 5  ;;  %v7769_v57 = vcombine.low %v3959_v34, %v3962_v37  ;;  %v7467_v9 = vcombine.low %v1003_v58, %v1013_v59  ;;  %v3979_v34 = vrot.slane %v7732_v22, 5  ;;  %v722_v10 = vld [vmem:[%s9028_s25 + $0xbc] sm:$0x1] }
  0xd8   : > { %v1096_v58 = vshll.u32 %v721_v45, 16  ;;  %v1100_v59 = vshrl.u32 %v721_v45, 16 }
  0xd9   : > { %7785 = vmatmul.mubr.msk.bf16.gmra.mrb[24].mxu0 %vm362_vm1, %v7766_v24  ;;  %v989_v24 = vsel %vm9044_vm4, %v984_v6, %v988_v7  ;;  %v3967_v46 = vrot.slane %v3965_v28, 4  ;;  %v3966_v60 = vsel %vm9274_vm7, %v7753_v39, %v3965_v28  ;;  %v1044_v6 = vrot.slane %v1042_v54, 5 }
  0xda   : > { %4216 = vmatprep.mubr.bf16.mxu0 %v8915_v4  ;;  %v1050_v7 = vrot.slane %v1048_v55, 5  ;;  %v1078_v39 = vrot.slane %v1076_v26, 4  ;;  %v1082_v54 = vshll.u32 %v719_v40, 16  ;;  %v7735_v55 = vld [vmem:[%s9028_s25 + $0xac] sm:$0xf] }
  0xdb   : > { %v3969_v61 = vsel %vm9274_vm7, %v3967_v46, %v3968_v48  ;;  %v1045_v18 = vor.u32 %v1044_v6, %v1041_v5  ;;  %v7755_v48 = vrot.slane %v7731_v33, 9  ;;  %v3986_v3 = vrot.slane %v7735_v55, 5  ;;  %v7736_v5 = vld [vmem:[%s9028_s25 + $0xb0] sm:$0x1]  ;;  %v7741_v40 = vld [vmem:[%s9028_s25 + $0xc4] sm:$0xf] }
  0xdc   : > { %v7770_v11 = vcombine.low %v3966_v60, %v3969_v61  ;;  %v1079_v53 = vor.u32 %v1078_v39, %v1074_v38  ;;  %v1084_v1 = vrot.slane %v1082_v54, 5  ;;  %v1089_v6 = vrot.slane %v1087_v56, 4  ;;  %v1606_v39 = vld [vmem:[%s9028_s25 + $0x8] sm:$0x1] }
  0xdd   : > { %v1046_v30 = vrot.slane %v1045_v18, 4  ;;  %v3980_v61 = vsel %vm9274_vm7, %v7755_v48, %v3979_v34  ;;  %v1106_v18 = vshll.u32 %v722_v10, 16 }
  0xde   : > { %7483 = vmatmul.mubr.msk.bf16.gmra.mrb[32].mxu1 %vm362_vm1, %v7464_v36  ;;  %v7466_v36 = vcombine.low %v979_v19, %v989_v24  ;;  %v1055_v19 = vor.u32 %v1054_v8, %v1050_v7  ;;  %v1066_v24 = vshll.u32 %v717_v12, 16  ;;  %v1098_v8 = vrot.slane %v1096_v58, 5 }
  0xdf   : > { %1341 = vmatprep.mubr.bf16.mxu1 %v8915_v4  ;;  %v1051_v46 = vsel %vm9044_vm4, %v1046_v30, %v1050_v7  ;;  %v1605_v30 = vld [vmem:[%s9028_s25 + $0x4] sm:$0xf] }
  0xe0   : > { %v1056_v31 = vrot.slane %v1055_v19, 4  ;;  %v1068_v37 = vrot.slane %v1066_v24, 5  ;;  %v7738_v19 = vld [vmem:[%s9028_s25 + $0xb8] sm:$0xf]  ;;  %v7737_v24 = vld [vmem:[%s9028_s25 + $0xb4] sm:$0xe] }
  0xe1   : > { %7786 = vmatmul.mubr.msk.bf16.gmra.mrb[28].mxu0 %vm362_vm1, %v7767_v52  ;;  %v7729_v52 = vld [vmem:[%s9028_s25 + $0x94] sm:$0xf] }
  0xe2   : > { %4226 = vmatprep.mubr.bf16.mxu0 %v8915_v4  ;;  %v3972_v2 = vrot.slane %v7729_v52, 5 }
  0xe4   : > { %v3974_v16 = vrot.slane %v3972_v2, 4  ;;  %v3973_v28 = vsel %vm9274_vm7, %v7754_v15, %v3972_v2  ;;  %v7734_v2 = vld [vmem:[%s9028_s25 + $0xa8] sm:$0xe]  ;;  %v3989_v15 = vrot.slane %v7736_v5, 5 }
  0xe5   : > { %v7756_v13 = vrot.slane %v7734_v2, 9 }
  0xe6   : > { %7484 = vmatmul.mubr.msk.bf16.gmra.mrb[36].mxu1 %vm362_vm1, %v7465_v62  ;;  %v1022_v62 = vrot.slane %v1021_v49, 4  ;;  %v3976_v29 = vsel %vm9274_vm7, %v3974_v16, %v3975_v17  ;;  %v3981_v49 = vrot.slane %v3979_v34, 4 }
  0xe7   : > { %1351 = vmatprep.mubr.bf16.mxu1 %v8915_v4  ;;  %v7771_v43 = vcombine.low %v3973_v28, %v3976_v29  ;;  %v3987_v22 = vsel %vm9274_vm7, %v7756_v13, %v3986_v3  ;;  %v7739_v28 = vld [vmem:[%s9028_s25 + $0xbc] sm:$0x1]  ;;  %v3993_v29 = vrot.slane %v7738_v19, 5 }
  0xe8   : > { %v1027_v14 = vsel %vm9044_vm4, %v1022_v62, %v9504_v32  ;;  %v1060_v32 = vrot.slane %v1058_v20, 5  ;;  %v3983_v62 = vsel %vm9274_vm7, %v3981_v49, %v3982_v50  ;;  %v3996_v33 = vrot.slane %v7739_v28, 5  ;;  %v7740_v50 = vld [vmem:[%s9028_s25 + $0xc0] sm:$0xe]  ;;  %v1613_v28 = vld [vmem:[%s9028_s25 + $0x24] sm:$0xe] }
  0xe9   : > { %7787 = vmatmul.mubr.msk.bf16.gmra.mrb[32].mxu0 %vm362_vm1, %v7768_v47  ;;  %v1037_v47 = vsel %vm9044_vm4, %v1032_v63, %v1036_v0  ;;  %v1080_v0 = vrot.slane %v1079_v53, 4  ;;  %v1708_v49 = vrot.slane %v1606_v39, 5  ;;  %v1608_v53 = vld [vmem:[%s9028_s25 + $0x10] sm:$0xf]  ;;  %v7758_v56 = vrot.slane %v7740_v50, 9 }
  0xea   : > { %4236 = vmatprep.mubr.bf16.mxu0 %v8915_v4  ;;  %v7468_v27 = vcombine.low %v1027_v14, %v1037_v47  ;;  %v1061_v51 = vsel %vm9044_vm4, %v1056_v31, %v1060_v32  ;;  %v3988_v14 = vrot.slane %v3986_v3, 4  ;;  %v7757_v32 = vrot.slane %v7737_v24, 9  ;;  %v9642_v24 = vld [vmem:[%s10598_s1 + $0x40] sm:$0xff]  ;;  %v8785_v50 = vld [vmem:[%s9028_s25 + $0x30] sm:$0xff]  }
  0xeb   : > { %v7469_v60 = vcombine.low %v1051_v46, %v1061_v51  ;;  %v1085_v16 = vsel %vm9044_vm4, %v1080_v0, %v1084_v1  ;;  %v4000_v51 = vrot.slane %v7741_v40, 5  ;;  %v1616_v40 = vld [vmem:[%s9028_s25 + $0x30] sm:$0xe] }
  0xed   : > { %v4002_v58 = vrot.slane %v4000_v51, 4  ;;  %v4001_v5 = vsel %vm9274_vm7, %v7758_v56, %v4000_v51 }
  0xee   : > { %7485 = vmatmul.mubr.msk.bf16.gmra.mrb[40].mxu1 %vm362_vm1, %v7466_v36  ;;  %v1065_v36 = vrot.slane %v1063_v23, 4  ;;  %v3990_v23 = vsel %vm9274_vm7, %v3988_v14, %v3989_v15  ;;  %v1610_v15 = vld [vmem:[%s9028_s25 + $0x18] sm:$0xe] }
  0xef   : > { %1361 = vmatprep.mubr.bf16.mxu1 %v8915_v4  ;;  %v7773_v31 = vcombine.low %v3987_v22, %v3990_v23  ;;  %v1614_v22 = vld [vmem:[%s9028_s25 + $0x28] sm:$0xf]  ;;  %v8782_v23 = vld [vmem:[%s9028_s25 + $0x18] sm:$0xff]  }
  0xf0   : > { %v1069_v52 = vor.u32 %v1068_v37, %v1065_v36  ;;  %v3995_v36 = vrot.slane %v3993_v29, 4  ;;  %v1604_v37 = vld [vmem:[%s9028_s25] sm:$0xe] }
  0xf1   : > { %7788 = vmatmul.mubr.msk.bf16.gmra.mrb[36].mxu0 %vm362_vm1, %v7769_v57  ;;  %v1090_v57 = vshll.u32 %v720_v44, 16  ;;  %v3994_v44 = vsel %vm9274_vm7, %v7757_v32, %v3993_v29  ;;  %v7491_v45 = vrot.slane %v1604_v37, 9  ;;  %v1615_v29 = vld [vmem:[%s9028_s25 + $0x2c] sm:$0x1]  ;;  %v7494_v32 = vrot.slane %v1613_v28, 9 }
  0xf2   : > { %4246 = vmatprep.mubr.bf16.mxu0 %v8915_v4  ;;  %v1070_v63 = vrot.slane %v1069_v52, 4  ;;  %v3997_v46 = vsel %vm9274_vm7, %v3995_v36, %v3996_v33  ;;  %v7742_v52 = vld [vmem:[%s9028_s25 + $0xc8] sm:$0x1] }
  0xf3   : > { %v1092_v7 = vrot.slane %v1090_v57, 5  ;;  %v7774_v54 = vcombine.low %v3994_v44, %v3997_v46  ;;  %v8784_v36 = vld [vmem:[%s9028_s25 + $0x24] sm:$0xff]  }
  0xf4   : > { %v1075_v12 = vsel %vm9044_vm4, %v1070_v63, %v1074_v38  ;;  %v1705_v38 = vrot.slane %v1605_v30, 5  ;;  %v7575_v63 = vld [vmem:[%s10598_s1 + $0x18] sm:$0xff]  ;;  %v8029_v30 = vcombine.high %v9642_v24, %v9642_v24 }
  0xf5   : > { %v1093_v17 = vor.u32 %v1092_v7, %v1089_v6  ;;  %v7470_v20 = vcombine.low %v1075_v12, %v1085_v16  ;;  %v7593_v2 = vcombine.high %v7575_v63, %v7575_v63  ;;  %v7592_v3 = vcombine.low %v7575_v63, %v7575_v63  ;;  %v1612_v16 = vld [vmem:[%s9028_s25 + $0x20] sm:$0x1] }
  0xf6   : > { %7486 = vmatmul.mubr.msk.bf16.gmra.mrb[44].mxu1 %vm362_vm1, %v7467_v9  ;;  %v1102_v9 = vrot.slane %v1100_v59, 4  ;;  %v1707_v48 = vrot.slane %v1705_v38, 4  ;;  %v1706_v55 = vsel %vm9274_vm7, %v7491_v45, %v1705_v38  ;;  %v4003_v59 = vrot.slane %v7742_v52, 5 }
  0xf7   : > { %1371 = vmatprep.mubr.bf16.mxu1 %v8915_v4  ;;  %v1094_v25 = vrot.slane %v1093_v17, 4  ;;  %7594 = vmatprep.subr.msk.bf16.mxu1 %vm411_vm0, %v7593_v2  ;;  %v2481_v10 = vsel %vm411_vm0, %v7592_v3, 0  ;;  %v1722_v19 = vrot.slane %v1612_v16, 5  ;;  %v7495_v45 = vrot.slane %v1616_v40, 9  ;;  %v1624_v2 = vld [vmem:[%s9028_s25 + $0x50] sm:$0x1] }
  0xf8   : > { %v1103_v47 = vor.u32 %v1102_v9, %v1098_v8  ;;  %v1709_v57 = vsel %vm9274_vm7, %v1707_v48, %v1708_v49  ;;  %v4004_v6 = vsel %vm9274_vm7, %v4002_v58, %v4003_v59  ;;  %v1611_v9 = vld [vmem:[%s9028_s25 + $0x1c] sm:$0xf]  ;;  %v1620_v49 = vld [vmem:[%s9028_s25 + $0x40] sm:$0xf] }
  0xf9   : > { %7789 = vmatmul.mubr.msk.bf16.gmra.mrb[40].mxu0 %vm362_vm1, %v7770_v11  ;;  %v7772_v11 = vcombine.low %v3980_v61, %v3983_v62  ;;  %v1099_v34 = vsel %vm9044_vm4, %v1094_v25, %v1098_v8  ;;  %v1712_v61 = vrot.slane %v1608_v53, 5  ;;  %v1609_v62 = vld [vmem:[%s9028_s25 + $0x14] sm:$0x1]  ;;  %v7508_v0 = vcombine.low %v1706_v55, %v1709_v57  ;;  %v1621_v55 = vld [vmem:[%s9028_s25 + $0x44] sm:$0x1] }
  0xfa   : > { %4256 = vmatprep.mubr.bf16.mxu0 %v8915_v4  ;;  %v1104_v26 = vrot.slane %v1103_v47, 4  ;;  %v1715_v8 = vrot.slane %v1609_v62, 5  ;;  %v1719_v14 = vrot.slane %v1611_v9, 5  ;;  %v7493_v47 = vrot.slane %v1610_v15, 9  ;;  %v8787_v9 = vld [vmem:[%s9028_s25 + $0x48] sm:$0xff]  }
  0xfb   : > { %v1714_v7 = vrot.slane %v1712_v61, 4  ;;  %v1740_v53 = vrot.slane %v1620_v49, 5  ;;  %v1743_v59 = vrot.slane %v1621_v55, 5  ;;  %v1634_v49 = vld [vmem:[%s9028_s25 + $0x78] sm:$0xe] }
  0xfc   : > { %v1720_v25 = vsel %vm9274_vm7, %v7493_v47, %v1719_v14  ;;  %v1638_v55 = vld [vmem:[%s9028_s25 + $0x88] sm:$0xf] }
  0xfd   : > { %v1716_v13 = vsel %vm9274_vm7, %v1714_v7, %v1715_v8  ;;  %v1742_v58 = vrot.slane %v1740_v53, 4  ;;  %v1750_v7 = vrot.slane %v1624_v2, 5  ;;  %v1626_v8 = vld [vmem:[%s9028_s25 + $0x58] sm:$0xf]  ;;  %v1641_v2 = vld [vmem:[%s9028_s25 + $0x94] sm:$0xf] }
  0xfe   : > { %7487 = vmatmul.mubr.msk.bf16.gmra.mrb[48].mxu1 %vm362_vm1, %v7468_v27  ;;  %v1108_v27 = vrot.slane %v1106_v18, 5  ;;  %v1721_v18 = vrot.slane %v1719_v14, 4  ;;  %v1627_v14 = vld [vmem:[%s9028_s25 + $0x5c] sm:$0x1] }
  0xff   : > { %1381 = vmatprep.mubr.bf16.mxu1 %v8915_v4  ;;  %v1744_v63 = vsel %vm9274_vm7, %v1742_v58, %v1743_v59  ;;  %v1757_v47 = vrot.slane %v1627_v14, 5  ;;  %v1782_v59 = vrot.slane %v1638_v55, 5  ;;  %v1644_v14 = vld [vmem:[%s9028_s25 + $0xa0] sm:$0xf] }
 0x100   : > { %v1109_v35 = vsel %vm9044_vm4, %v1104_v26, %v1108_v27  ;;  %v1723_v26 = vsel %vm9274_vm7, %v1721_v18, %v1722_v19  ;;  %v1629_v18 = vld [vmem:[%s9028_s25 + $0x64] sm:$0xf]  ;;  %v8788_v19 = vld [vmem:[%s9028_s25 + $0x54] sm:$0xff]  }
 0x101   : > { %7790 = vmatmul.mubr.msk.bf16.gmra.mrb[44].mxu0 %vm362_vm1, %v7771_v43  ;;  %v7471_v43 = vcombine.low %v1099_v34, %v1109_v35  ;;  %v1729_v34 = vrot.slane %v1615_v29, 5  ;;  %v1617_v35 = vld [vmem:[%s9028_s25 + $0x34] sm:$0xf] }
 0x102   : > { %4266 = vmatprep.mubr.bf16.mxu0 %v8915_v4  ;;  %v1733_v39 = vrot.slane %v1617_v35, 5  ;;  %v1631_v35 = vld [vmem:[%s9028_s25 + $0x6c] sm:$0xe] }
 0x104   : > { %v1735_v46 = vrot.slane %v1733_v39, 4  ;;  %v1734_v51 = vsel %vm9274_vm7, %v7495_v45, %v1733_v39 }
 0x106   : > { %7488 = vmatmul.mubr.msk.bf16.gmra.mrb[52].mxu1 %vm362_vm1, %v7469_v60  ;;  %v1607_v60 = vld [vmem:[%s9028_s25 + $0xc] sm:$0xe] }
 0x107   : > { %1391 = vmatprep.mubr.bf16.mxu1 %v8915_v4  ;;  %v7492_v1 = vrot.slane %v1607_v60, 9  ;;  %v1623_v60 = vld [vmem:[%s9028_s25 + $0x4c] sm:$0xf] }
 0x109   : > { %7791 = vmatmul.mubr.msk.bf16.gmra.mrb[48].mxu0 %vm362_vm1, %v7772_v11  ;;  %v7775_v11 = vcombine.low %v4001_v5, %v4004_v6  ;;  %v1713_v12 = vsel %vm9274_vm7, %v7492_v1, %v1712_v61  ;;  %v8786_v61 = vld [vmem:[%s9028_s25 + $0x3c] sm:$0xff]   ;;  %v1622_v1 = vld [vmem:[%s9028_s25 + $0x48] sm:$0xe] }
 0x10a   : > { %4276 = vmatprep.mubr.bf16.mxu0 %v8915_v4  ;;  %v7509_v17 = vcombine.low %v1713_v12, %v1716_v13  ;;  %v7497_v5 = vrot.slane %v1622_v1, 9  ;;  %v1754_v12 = vrot.slane %v1626_v8, 5  ;;  %v1625_v13 = vld [vmem:[%s9028_s25 + $0x54] sm:$0xe]  ;;  %v1640_v8 = vld [vmem:[%s9028_s25 + $0x90] sm:$0xe] }
 0x10b   : > { %v7498_v16 = vrot.slane %v1625_v13, 9 }
 0x10e   : > { %7489 = vmatmul.mubr.msk.bf16.gmra.mrb[56].mxu1 %vm362_vm1, %v7470_v20  ;;  %v7928_v20 = vcombine.low %v9408_v21, %v9408_v21  ;;  %v1726_v21 = vrot.slane %v1614_v22, 5 }
 0x10f   : > { %1401 = vmatprep.mubr.bf16.mxu1 %v8915_v4 }
 0x110   : > { %v5597_v27 = vsel %vm411_vm0, %v7928_v20, 0  ;;  %v1728_v33 = vrot.slane %v1726_v21, 4  ;;  %v1727_v37 = vsel %vm9274_vm7, %v7494_v32, %v1726_v21  ;;  %v1755_v20 = vsel %vm9274_vm7, %v7498_v16, %v1754_v12 }
 0x111   : > { %7792 = vmatmul.mubr.msk.bf16.gmra.mrb[52].mxu0 %vm362_vm1, %v7773_v31  ;;  %v7510_v31 = vcombine.low %v1720_v25, %v1723_v26  ;;  %v1628_v25 = vld [vmem:[%s9028_s25 + $0x60] sm:$0xe]  ;;  %v1630_v26 = vld [vmem:[%s9028_s25 + $0x68] sm:$0x1] }
 0x112   : > { %4286 = vmatprep.mubr.bf16.mxu0 %v8915_v4  ;;  %v1730_v38 = vsel %vm9274_vm7, %v1728_v33, %v1729_v34  ;;  %v1764_v29 = vrot.slane %v1630_v26, 5  ;;  %v1647_v26 = vld [vmem:[%s9028_s25 + $0xac] sm:$0xf] }
 0x113   : > { %v7511_v44 = vcombine.low %v1727_v37, %v1730_v38  ;;  %v7500_v38 = vrot.slane %v1631_v35, 9 }
 0x116   : > { %7490 = vmatmul.mubr.msk.bf16.gmra.mrb[60].mxu1 %vm362_vm1, %v7471_v43  ;;  %v1618_v43 = vld [vmem:[%s9028_s25 + $0x38] sm:$0x1] }
 0x117   : > { %1956 = vmatprep.mubr.bf16.mxu1 %v8915_v4  ;;  %v1736_v48 = vrot.slane %v1618_v43, 5  ;;  %v1635_v43 = vld [vmem:[%s9028_s25 + $0x7c] sm:$0xf] }
 0x119   : > { %7793 = vmatmul.mubr.msk.bf16.gmra.mrb[56].mxu0 %vm362_vm1, %v7774_v54  ;;  %v1737_v52 = vsel %vm9274_vm7, %v1735_v46, %v1736_v48  ;;  %v1619_v54 = vld [vmem:[%s9028_s25 + $0x3c] sm:$0xe]  ;;  %v1775_v48 = vrot.slane %v1635_v43, 5  ;;  %v1649_v43 = vld [vmem:[%s9028_s25 + $0xb4] sm:$0xe] }
 0x11a   : > { %4296 = vmatprep.mubr.bf16.mxu0 %v8915_v4  ;;  %v7512_v56 = vcombine.low %v1734_v51, %v1737_v52  ;;  %v7496_v57 = vrot.slane %v1619_v54, 9  ;;  %v7501_v52 = vrot.slane %v1634_v49, 9 }
 0x11c   : > { %v1741_v62 = vsel %vm9274_vm7, %v7496_v57, %v1740_v53  ;;  %v1777_v53 = vrot.slane %v1775_v48, 4  ;;  %v1776_v57 = vsel %vm9274_vm7, %v7501_v52, %v1775_v48  ;;  %v8796_v52 = vld [vmem:[%s9028_s25 + $0xb4] sm:$0xff]  }
 0x11d   : > { %v7513_v3 = vcombine.low %v1741_v62, %v1744_v63 }
 0x11e   : > { %7527 = vmatmul.mubr.msk.bf16.vlgmr.msra.gmra.mrb[0].mxu1 %vm362_vm1, %v7508_v0  ;;  %v1747_v0 = vrot.slane %v1623_v60, 5  ;;  %v1637_v60 = vld [vmem:[%s9028_s25 + $0x84] sm:$0xe] }
 0x11f   : > { %1966 = vmatprep.mubr.bf16.mxu1 %v8915_v4  ;;  %2487 = vmatpush1.bf16.msra.mxu1 %v2481_v10  ;;  %v7502_v63 = vrot.slane %v1637_v60, 9 }
 0x120   : > { %v1749_v6 = vrot.slane %v1747_v0, 4  ;;  %v1748_v10 = vsel %vm9274_vm7, %v7497_v5, %v1747_v0  ;;  %v1784_v0 = vrot.slane %v1782_v59, 4 }
 0x121   : > { %7794 = vmatmul.mubr.msk.bf16.gmra.mrb[60].mxu0 %vm362_vm1, %v7775_v11  ;;  %v1783_v5 = vsel %vm9274_vm7, %v7502_v63, %v1782_v59 }
 0x122   : > { %4708 = vmatprep.mubr.bf16.mxu0 %v8915_v4  ;;  %v1751_v11 = vsel %vm9274_vm7, %v1749_v6, %v1750_v7  ;;  %v1789_v7 = vrot.slane %v1641_v2, 5  ;;  %v7866_v2 = vld [vmem:[%s9028_s25 + $0x24] sm:$0xf] }
 0x123   : > { %v7514_v15 = vcombine.low %v1748_v10, %v1751_v11  ;;  %v7503_v11 = vrot.slane %v1640_v8, 9  ;;  %v5134_v8 = vshrl.u32 %v7866_v2, 16 }
 0x125   : > { %v1790_v16 = vsel %vm9274_vm7, %v7503_v11, %v1789_v7 }
 0x126   : > { %7528 = vmatmul.mubr.msk.bf16.gmra.mrb[4].mxu1 %vm362_vm1, %v7509_v17  ;;  %v1756_v17 = vrot.slane %v1754_v12, 4  ;;  %v1791_v12 = vrot.slane %v1789_v7, 4 }
 0x127   : > { %1976 = vmatprep.mubr.bf16.mxu1 %v8915_v4 }
 0x128   : > { %v1758_v22 = vsel %vm9274_vm7, %v1756_v17, %v1757_v47  ;;  %v1796_v47 = vrot.slane %v1644_v14, 5 }
 0x129   : > { %7847 = vmatmul.mubr.msk.bf16.vlgmr.msra.gmra.mrb[0].mxu0 %vm362_vm1, %v8782_v23  ;;  %v1761_v23 = vrot.slane %v1629_v18, 5  ;;  %v7515_v21 = vcombine.low %v1755_v20, %v1758_v22  ;;  %v1643_v18 = vld [vmem:[%s9028_s25 + $0x9c] sm:$0xe] }
 0x12a   : > { %5603 = vmatpush1.bf16.msra.mxu0 %v5597_v27  ;;  %4718 = vmatprep.mubr.bf16.mxu0 %v8915_v4  ;;  %v7499_v27 = vrot.slane %v1628_v25, 9  ;;  %v7504_v22 = vrot.slane %v1643_v18, 9 }
 0x12b   : > { %8030 = vmatprep.subr.msk.bf16.mxu0 %vm411_vm0, %v8029_v30  ;;  %v1763_v28 = vrot.slane %v1761_v23, 4  ;;  %v1632_v30 = vld [vmem:[%s9028_s25 + $0x70] sm:$0xf] }
 0x12c   : > { %v1762_v32 = vsel %vm9274_vm7, %v7499_v27, %v1761_v23  ;;  %v1768_v34 = vrot.slane %v1632_v30, 5  ;;  %v1798_v23 = vrot.slane %v1796_v47, 4  ;;  %v1797_v27 = vsel %vm9274_vm7, %v7504_v22, %v1796_v47  ;;  %v1646_v30 = vld [vmem:[%s9028_s25 + $0xa8] sm:$0xe]  ;;  %v7869_v22 = vld [vmem:[%s9028_s25 + $0x30] sm:$0xf] }
 0x12d   : > { %v1765_v33 = vsel %vm9274_vm7, %v1763_v28, %v1764_v29  ;;  %v1803_v29 = vrot.slane %v1647_v26, 5 }
 0x12e   : > { %7529 = vmatmul.mubr.msk.bf16.gmra.mrb[8].mxu1 %vm362_vm1, %v7510_v31  ;;  %v8789_v31 = vld [vmem:[%s9028_s25 + $0x60] sm:$0xff]   ;;  %v7516_v37 = vcombine.low %v1762_v32, %v1765_v33  ;;  %v1770_v39 = vrot.slane %v1768_v34, 4  ;;  %v1769_v45 = vsel %vm9274_vm7, %v7500_v38, %v1768_v34  ;;  %v7505_v33 = vrot.slane %v1646_v30, 9 }
 0x12f   : > { %1986 = vmatprep.mubr.bf16.mxu1 %v8915_v4  ;;  %v1805_v34 = vrot.slane %v1803_v29, 4  ;;  %v5158_v30 = vshrl.u32 %v7869_v22, 16 }
 0x130   : > { %v1804_v38 = vsel %vm9274_vm7, %v7505_v33, %v1803_v29  ;;  %v8802_v29 = vld [vmem:[%s9028_s25 + $0x18] sm:$0xff]  }
 0x131   : > { %7848 = vmatmul.mubr.msk.bf16.gmra.mrb[4].mxu0 %vm362_vm1, %v8784_v36  ;;  %v1633_v36 = vld [vmem:[%s9028_s25 + $0x74] sm:$0x1] }
 0x132   : > { %4728 = vmatprep.mubr.bf16.mxu0 %v8915_v4  ;;  %v1771_v40 = vrot.slane %v1633_v36, 5  ;;  %v1650_v36 = vld [vmem:[%s9028_s25 + $0xb8] sm:$0xf] }
 0x134   : > { %v1772_v46 = vsel %vm9274_vm7, %v1770_v39, %v1771_v40  ;;  %v1810_v40 = vrot.slane %v1650_v36, 5 }
 0x135   : > { %v7517_v51 = vcombine.low %v1769_v45, %v1772_v46  ;;  %v7506_v46 = vrot.slane %v1649_v43, 9 }
 0x136   : > { %7530 = vmatmul.mubr.msk.bf16.gmra.mrb[12].mxu1 %vm362_vm1, %v7511_v44  ;;  %v8790_v44 = vld [vmem:[%s9028_s25 + $0x6c] sm:$0xff]   ;;  %v1812_v48 = vrot.slane %v1810_v40, 4 }
 0x137   : > { %1996 = vmatprep.mubr.bf16.mxu1 %v8915_v4 }
 0x139   : > { %7849 = vmatmul.mubr.msk.bf16.gmra.mrb[8].mxu0 %vm362_vm1, %v8785_v50  ;;  %v1636_v50 = vld [vmem:[%s9028_s25 + $0x80] sm:$0x1] }
 0x13a   : > { %4738 = vmatprep.mubr.bf16.mxu0 %v8915_v4  ;;  %v1778_v54 = vrot.slane %v1636_v50, 5  ;;  %v7863_v50 = vld [vmem:[%s9028_s25 + $0x18] sm:$0xf] }
 0x13b   : > { %v5110_v55 = vshrl.u32 %v7863_v50, 16 }
 0x13c   : > { %v1779_v58 = vsel %vm9274_vm7, %v1777_v53, %v1778_v54  ;;  %v1811_v53 = vsel %vm9274_vm7, %v7506_v46, %v1810_v40 }
 0x13d   : > { %v7518_v62 = vcombine.low %v1776_v57, %v1779_v58  ;;  %v5112_v60 = vrot.slane %v5110_v55, 4 }
 0x13e   : > { %7531 = vmatmul.mubr.msk.bf16.gmra.mrb[16].mxu1 %vm362_vm1, %v7512_v56  ;;  %v8791_v56 = vld [vmem:[%s9028_s25 + $0x78] sm:$0xff]  }
 0x13f   : > { %2006 = vmatprep.mubr.bf16.mxu1 %v8915_v4 }
 0x141   : > { %7850 = vmatmul.mubr.msk.bf16.gmra.mrb[12].mxu0 %vm362_vm1, %v8786_v61  ;;  %v1639_v61 = vld [vmem:[%s9028_s25 + $0x8c] sm:$0x1] }
 0x142   : > { %4748 = vmatprep.mubr.bf16.mxu0 %v8915_v4  ;;  %v1785_v1 = vrot.slane %v1639_v61, 5 }
 0x144   : > { %v1786_v6 = vsel %vm9274_vm7, %v1784_v0, %v1785_v1  ;;  %v7865_v0 = vld [vmem:[%s9028_s25 + $0x20] sm:$0x1] }
 0x145   : > { %v7519_v10 = vcombine.low %v1783_v5, %v1786_v6  ;;  %v8797_v1 = vld [vmem:[%s9028_s25 + $0xc0] sm:$0xff]   ;;  %v5129_v7 = vshll.u32 %v7865_v0, 16 }
 0x146   : > { %7532 = vmatmul.mubr.msk.bf16.gmra.mrb[20].mxu1 %vm362_vm1, %v7513_v3  ;;  %v8792_v3 = vld [vmem:[%s9028_s25 + $0x84] sm:$0xff]  }
 0x147   : > { %2016 = vmatprep.mubr.bf16.mxu1 %v8915_v4 }
 0x149   : > { %7851 = vmatmul.mubr.msk.bf16.gmra.mrb[16].mxu0 %vm362_vm1, %v8787_v9  ;;  %v1642_v9 = vld [vmem:[%s9028_s25 + $0x98] sm:$0x1] }
 0x14a   : > { %4758 = vmatprep.mubr.bf16.mxu0 %v8915_v4  ;;  %v1792_v13 = vrot.slane %v1642_v9, 5  ;;  %v5137_v9 = vshll.u32 %v7866_v2, 16 }
 0x14c   : > { %v1793_v17 = vsel %vm9274_vm7, %v1791_v12, %v1792_v13  ;;  %v8800_v12 = vld [vmem:[%s9028_s25 + $0xc] sm:$0xff]  }
 0x14d   : > { %v7520_v20 = vcombine.low %v1790_v16, %v1793_v17  ;;  %v5136_v16 = vrot.slane %v5134_v8, 4  ;;  %v5139_v17 = vrot.slane %v5137_v9, 5 }
 0x14e   : > { %7533 = vmatmul.mubr.msk.bf16.gmra.mrb[24].mxu1 %vm362_vm1, %v7514_v15  ;;  %v8793_v15 = vld [vmem:[%s9028_s25 + $0x90] sm:$0xff]  }
 0x14f   : > { %2026 = vmatprep.mubr.bf16.mxu1 %v8915_v4 }
 0x151   : > { %7852 = vmatmul.mubr.msk.bf16.gmra.mrb[20].mxu0 %vm362_vm1, %v8788_v19  ;;  %v1645_v19 = vld [vmem:[%s9028_s25 + $0xa4] sm:$0x1] }
 0x152   : > { %4768 = vmatprep.mubr.bf16.mxu0 %v8915_v4  ;;  %v1799_v25 = vrot.slane %v1645_v19, 5  ;;  %v8801_v19 = vld [vmem:[%s9028_s25 + $0xcc] sm:$0xff]  }
 0x154   : > { %v1800_v28 = vsel %vm9274_vm7, %v1798_v23, %v1799_v25  ;;  %v7870_v23 = vld [vmem:[%s9028_s25 + $0x34] sm:$0xf] }
 0x155   : > { %v7521_v32 = vcombine.low %v1797_v27, %v1800_v28  ;;  %v5171_v33 = vshrl.u32 %v7870_v23, 16 }
 0x156   : > { %7534 = vmatmul.mubr.msk.bf16.gmra.mrb[28].mxu1 %vm362_vm1, %v7515_v21  ;;  %v8794_v21 = vld [vmem:[%s9028_s25 + $0x9c] sm:$0xff]  }
 0x157   : > { %2036 = vmatprep.mubr.bf16.mxu1 %v8915_v4 }
 0x159   : > { %7853 = vmatmul.mubr.msk.bf16.gmra.mrb[24].mxu0 %vm362_vm1, %v8789_v31  ;;  %v1648_v31 = vld [vmem:[%s9028_s25 + $0xb0] sm:$0x1] }
 0x15a   : > { %4778 = vmatprep.mubr.bf16.mxu0 %v8915_v4  ;;  %v1806_v35 = vrot.slane %v1648_v31, 5  ;;  %v5161_v31 = vshll.u32 %v7869_v22, 16 }
 0x15c   : > { %v1807_v39 = vsel %vm9274_vm7, %v1805_v34, %v1806_v35  ;;  %v8028_v34 = vcombine.low %v9642_v24, %v9642_v24  ;;  %v5163_v40 = vrot.slane %v5161_v31, 5  ;;  %v7873_v24 = vld [vmem:[%s9028_s25 + $0x40] sm:$0xf] }
 0x15d   : > { %v7522_v45 = vcombine.low %v1804_v38, %v1807_v39  ;;  %v5160_v39 = vrot.slane %v5158_v30, 4 }
 0x15e   : > { %7535 = vmatmul.mubr.msk.bf16.gmra.mrb[32].mxu1 %vm362_vm1, %v7516_v37  ;;  %v8795_v37 = vld [vmem:[%s9028_s25 + $0xa8] sm:$0xff]   ;;  %v6299_v46 = vsel %vm411_vm0, %v8028_v34, 0 }
 0x15f   : > { %2046 = vmatprep.mubr.bf16.mxu1 %v8915_v4 }
 0x161   : > { %7854 = vmatmul.mubr.msk.bf16.gmra.mrb[28].mxu0 %vm362_vm1, %v8790_v44  ;;  %v1651_v44 = vld [vmem:[%s9028_s25 + $0xbc] sm:$0x1] }
 0x162   : > { %4788 = vmatprep.mubr.bf16.mxu0 %v8915_v4  ;;  %v1813_v49 = vrot.slane %v1651_v44, 5  ;;  %v5173_v44 = vrot.slane %v5171_v33, 4 }
 0x164   : > { %v1814_v54 = vsel %vm9274_vm7, %v1812_v48, %v1813_v49  ;;  %v7872_v48 = vld [vmem:[%s9028_s25 + $0x3c] sm:$0xf] }
 0x165   : > { %v7523_v59 = vcombine.low %v1811_v53, %v1814_v54  ;;  %v5182_v55 = vshrl.u32 %v7872_v48, 16 }
 0x166   : > { %7536 = vmatmul.mubr.msk.bf16.gmra.mrb[36].mxu1 %vm362_vm1, %v7517_v51  ;;  %v7864_v51 = vld [vmem:[%s9028_s25 + $0x1c] sm:$0xf] }
 0x167   : > { %2056 = vmatprep.mubr.bf16.mxu1 %v8915_v4  ;;  %v5119_v57 = vshll.u32 %v7864_v51, 16  ;;  %v5123_v58 = vshrl.u32 %v7864_v51, 16 }
 0x169   : > { %7855 = vmatmul.mubr.msk.bf16.gmra.mrb[32].mxu0 %vm362_vm1, %v8791_v56  ;;  %v5113_v56 = vshll.u32 %v7863_v50, 16  ;;  %v5125_v63 = vrot.slane %v5123_v58, 4  ;;  %v8805_v50 = vld [vmem:[%s9028_s25 + $0x24] sm:$0xff]   ;;  %v5195_v58 = vshrl.u32 %v7873_v24, 16 }
 0x16a   : > { %4798 = vmatprep.mubr.bf16.mxu0 %v8915_v4 }
 0x16b   : > { %v5115_v61 = vrot.slane %v5113_v56, 5  ;;  %v5185_v56 = vshll.u32 %v7872_v48, 16 }
 0x16d   : > { %v5116_v5 = vor.u32 %v5115_v61, %v5112_v60  ;;  %v7876_v60 = vld [vmem:[%s9028_s25 + $0x4c] sm:$0xf]  ;;  %v5187_v2 = vrot.slane %v5185_v56, 5 }
 0x16e   : > { %7537 = vmatmul.mubr.msk.bf16.gmra.mrb[40].mxu1 %vm362_vm1, %v7518_v62  ;;  %v5121_v62 = vrot.slane %v5119_v57, 5  ;;  %v5191_v57 = vshll.u32 %v7873_v24, 16  ;;  %v5215_v9 = vshll.u32 %v7876_v60, 16  ;;  %v7880_v24 = vld [vmem:[%s9028_s25 + $0x5c] sm:$0x1]  ;;  %v8808_v56 = vld [vmem:[%s9028_s25 + $0x48] sm:$0xff]  }
 0x16f   : > { %2066 = vmatprep.mubr.bf16.mxu1 %v8915_v4  ;;  %v5117_v13 = vrot.slane %v5116_v5, 4  ;;  %v5197_v5 = vrot.slane %v5195_v58, 4 }
 0x170   : > { %v5126_v6 = vor.u32 %v5125_v63, %v5121_v62 }
 0x171   : > { %7856 = vmatmul.mubr.msk.bf16.gmra.mrb[36].mxu0 %vm362_vm1, %v8792_v3  ;;  %v7867_v3 = vld [vmem:[%s9028_s25 + $0x28] sm:$0xf]  ;;  %v5122_v25 = vsel %vm9044_vm4, %v5117_v13, %v5121_v62 }
 0x172   : > { %4808 = vmatprep.mubr.bf16.mxu0 %v8915_v4  ;;  %v5147_v11 = vshrl.u32 %v7867_v3, 16  ;;  %v5127_v14 = vrot.slane %v5126_v6, 4  ;;  %v7874_v6 = vld [vmem:[%s9028_s25 + $0x44] sm:$0x1] }
 0x174   : > { %v5149_v18 = vrot.slane %v5147_v11, 4  ;;  %v8806_v11 = vld [vmem:[%s9028_s25 + $0x30] sm:$0xff]  }
 0x176   : > { %7538 = vmatmul.mubr.msk.bf16.gmra.mrb[44].mxu1 %vm362_vm1, %v7519_v10  ;;  %v5143_v10 = vshll.u32 %v7867_v3, 16  ;;  %v5193_v3 = vrot.slane %v5191_v57, 5 }
 0x177   : > { %2076 = vmatprep.mubr.bf16.mxu1 %v8915_v4 }
 0x178   : > { %v5145_v47 = vrot.slane %v5143_v10, 5  ;;  %v5219_v10 = vshrl.u32 %v7876_v60, 16 }
 0x179   : > { %7857 = vmatmul.mubr.msk.bf16.gmra.mrb[40].mxu0 %vm362_vm1, %v8793_v15  ;;  %v5131_v15 = vrot.slane %v5129_v7, 5 }
 0x17a   : > { %4818 = vmatprep.mubr.bf16.mxu0 %v8915_v4  ;;  %v5150_v27 = vor.u32 %v5149_v18, %v5145_v47  ;;  %v5217_v18 = vrot.slane %v5215_v9, 5 }
 0x17b   : > { %v5132_v26 = vsel %vm9044_vm4, %v5127_v14, %v5131_v15  ;;  %v5198_v15 = vor.u32 %v5197_v5, %v5193_v3 }
 0x17c   : > { %v7912_v35 = vcombine.low %v5122_v25, %v5132_v26  ;;  %v7879_v25 = vld [vmem:[%s9028_s25 + $0x58] sm:$0xf] }
 0x17d   : > { %v5239_v33 = vshll.u32 %v7879_v25, 16  ;;  %v5243_v34 = vshrl.u32 %v7879_v25, 16 }
 0x17e   : > { %7539 = vmatmul.mubr.msk.bf16.gmra.mrb[48].mxu1 %vm362_vm1, %v7520_v20  ;;  %v7868_v20 = vld [vmem:[%s9028_s25 + $0x2c] sm:$0x1] }
 0x17f   : > { %2086 = vmatprep.mubr.bf16.mxu1 %v8915_v4  ;;  %v5153_v28 = vshll.u32 %v7868_v20, 16  ;;  %v7877_v20 = vld [vmem:[%s9028_s25 + $0x50] sm:$0x1] }
 0x180   : > { %v5225_v30 = vshll.u32 %v7877_v20, 16 }
 0x181   : > { %7858 = vmatmul.mubr.msk.bf16.gmra.mrb[44].mxu0 %vm362_vm1, %v8794_v21  ;;  %v5140_v21 = vor.u32 %v5139_v17, %v5136_v16  ;;  %v5155_v38 = vrot.slane %v5153_v28, 5  ;;  %v5201_v16 = vshll.u32 %v7874_v6, 16  ;;  %v7883_v6 = vld [vmem:[%s9028_s25 + $0x68] sm:$0x1] }
 0x182   : > { %4828 = vmatprep.mubr.bf16.mxu0 %v8915_v4 }
 0x183   : > { %v5141_v36 = vrot.slane %v5140_v21, 4  ;;  %v5199_v21 = vrot.slane %v5198_v15, 4 }
 0x185   : > { %v5146_v49 = vsel %vm9044_vm4, %v5141_v36, %v5145_v47 }
 0x186   : > { %7540 = vmatmul.mubr.msk.bf16.gmra.mrb[52].mxu1 %vm362_vm1, %v7521_v32  ;;  %v5167_v32 = vshll.u32 %v7870_v23, 16  ;;  %v7878_v23 = vld [vmem:[%s9028_s25 + $0x54] sm:$0xf] }
 0x187   : > { %2096 = vmatprep.mubr.bf16.mxu1 %v8915_v4  ;;  %v5230_v31 = vshrl.u32 %v7878_v23, 16 }
 0x188   : > { %v5169_v43 = vrot.slane %v5167_v32, 5  ;;  %v5233_v32 = vshll.u32 %v7878_v23, 16 }
 0x189   : > { %7859 = vmatmul.mubr.msk.bf16.gmra.mrb[48].mxu0 %vm362_vm1, %v8795_v37  ;;  %v5151_v37 = vrot.slane %v5150_v27, 4  ;;  %v5203_v27 = vrot.slane %v5201_v16, 5 }
 0x18a   : > { %4838 = vmatprep.mubr.bf16.mxu0 %v8915_v4  ;;  %v5174_v53 = vor.u32 %v5173_v44, %v5169_v43  ;;  %v5235_v44 = vrot.slane %v5233_v32, 5 }
 0x18b   : > { %v5156_v51 = vsel %vm9044_vm4, %v5151_v37, %v5155_v38  ;;  %v5204_v37 = vsel %vm9044_vm4, %v5199_v21, %v5203_v27 }
 0x18c   : > { %v7913_v61 = vcombine.low %v5146_v49, %v5156_v51  ;;  %v5175_v63 = vrot.slane %v5174_v53, 4  ;;  %v7881_v49 = vld [vmem:[%s9028_s25 + $0x60] sm:$0xf] }
 0x18d   : > { %v5254_v57 = vshrl.u32 %v7881_v49, 16  ;;  %v5257_v58 = vshll.u32 %v7881_v49, 16  ;;  %v7891_v49 = vld [vmem:[%s9028_s25 + $0x88] sm:$0xf] }
 0x18e   : > { %7541 = vmatmul.mubr.msk.bf16.gmra.mrb[56].mxu1 %vm362_vm1, %v7522_v45  ;;  %v7871_v45 = vld [vmem:[%s9028_s25 + $0x38] sm:$0x1] }
 0x18f   : > { %2106 = vmatprep.mubr.bf16.mxu1 %v8915_v4  ;;  %v5177_v54 = vshll.u32 %v7871_v45, 16  ;;  %v5241_v45 = vrot.slane %v5239_v33, 5 }
 0x191   : > { %7860 = vmatmul.mubr.msk.bf16.gmra.mrb[52].mxu0 %vm362_vm1, %v8796_v52  ;;  %v5164_v52 = vor.u32 %v5163_v40, %v5160_v39  ;;  %v5179_v0 = vrot.slane %v5177_v54, 5  ;;  %v5227_v40 = vrot.slane %v5225_v30, 5 }
 0x192   : > { %4848 = vmatprep.mubr.bf16.mxu0 %v8915_v4 }
 0x193   : > { %v5165_v62 = vrot.slane %v5164_v52, 4  ;;  %v5180_v13 = vsel %vm9044_vm4, %v5175_v63, %v5179_v0 }
 0x196   : > { %7542 = vmatmul.mubr.msk.bf16.gmra.mrb[60].mxu1 %vm362_vm1, %v7523_v59  ;;  %v7875_v59 = vld [vmem:[%s9028_s25 + $0x48] sm:$0xf] }
 0x197   : > { %2518 = vmatprep.mubr.bf16.mxu1 %v8915_v4  ;;  %v5206_v7 = vshrl.u32 %v7875_v59, 16  ;;  %v5209_v8 = vshll.u32 %v7875_v59, 16 }
 0x199   : > { %7861 = vmatmul.mubr.msk.bf16.gmra.mrb[56].mxu0 %vm362_vm1, %v8797_v1  ;;  %v5184_v1 = vrot.slane %v5182_v55, 4  ;;  %v5208_v17 = vrot.slane %v5206_v7, 4  ;;  %v5211_v47 = vrot.slane %v5209_v8, 5  ;;  %v5249_v55 = vshll.u32 %v7880_v24, 16  ;;  %v7884_v7 = vld [vmem:[%s9028_s25 + $0x6c] sm:$0xf] }
 0x19a   : > { %4858 = vmatprep.mubr.bf16.mxu0 %v8915_v4  ;;  %v7885_v8 = vld [vmem:[%s9028_s25 + $0x70] sm:$0xf]  ;;  %v5278_v15 = vshrl.u32 %v7884_v7, 16  ;;  %v5281_v16 = vshll.u32 %v7884_v7, 16  ;;  %v7890_v24 = vld [vmem:[%s9028_s25 + $0x84] sm:$0xf] }
 0x19b   : > { %v5188_v14 = vor.u32 %v5187_v2, %v5184_v1  ;;  %v5212_v28 = vor.u32 %v5211_v47, %v5208_v17  ;;  %v5251_v0 = vrot.slane %v5249_v55, 5  ;;  %v5256_v1 = vrot.slane %v5254_v57, 4 }
 0x19c   : > { %v5259_v2 = vrot.slane %v5257_v58, 5  ;;  %v5287_v17 = vshll.u32 %v7885_v8, 16  ;;  %v5291_v47 = vshrl.u32 %v7885_v8, 16  ;;  %v5283_v21 = vrot.slane %v5281_v16, 5  ;;  %v7892_v8 = vld [vmem:[%s9028_s25 + $0x8c] sm:$0x1] }
 0x19d   : > { %v5189_v26 = vrot.slane %v5188_v14, 4  ;;  %v5213_v38 = vrot.slane %v5212_v28, 4  ;;  %v5273_v14 = vshll.u32 %v7883_v6, 16  ;;  %v5329_v57 = vshll.u32 %v7890_v24, 16  ;;  %v8812_v16 = vld [vmem:[%s9028_s25 + $0x78] sm:$0xff]  }
 0x19e   : > { %7595 = vmatmul.mubr.msk.bf16.vlgmr.msra.gmra.mrb[0].mxu1 %vm362_vm1, %v8800_v12  ;;  %v5170_v12 = vsel %vm9044_vm4, %v5165_v62, %v5169_v43  ;;  %v5232_v43 = vrot.slane %v5230_v31, 4  ;;  %v5289_v27 = vrot.slane %v5287_v17, 5  ;;  %v5293_v28 = vrot.slane %v5291_v47, 4 }
 0x19f   : > { %2528 = vmatprep.mubr.bf16.mxu1 %v8915_v4  ;;  %v7914_v22 = vcombine.low %v5170_v12, %v5180_v13  ;;  %v5194_v36 = vsel %vm9044_vm4, %v5189_v26, %v5193_v3  ;;  %v5218_v51 = vsel %vm9044_vm4, %v5213_v38, %v5217_v18  ;;  %v5260_v12 = vor.u32 %v5259_v2, %v5256_v1 }
 0x1a0   : > { %v7915_v48 = vcombine.low %v5194_v36, %v5204_v37  ;;  %v5236_v53 = vor.u32 %v5235_v44, %v5232_v43  ;;  %v5275_v25 = vrot.slane %v5273_v14, 5  ;;  %v5280_v26 = vrot.slane %v5278_v15, 4 }
 0x1a1   : > { %7862 = vmatmul.mubr.msk.bf16.gmra.mrb[60].mxu0 %vm362_vm1, %v8801_v19  ;;  %v5221_v19 = vrot.slane %v5219_v10, 4  ;;  %v8809_v10 = vld [vmem:[%s9028_s25 + $0x54] sm:$0xff]   ;;  %v5294_v38 = vor.u32 %v5293_v28, %v5289_v27  ;;  %v5335_v58 = vshll.u32 %v7891_v49, 16  ;;  %v5345_v15 = vshll.u32 %v7892_v8, 16 }
 0x1a2   : > { %5634 = vmatprep.mubr.bf16.mxu0 %v8915_v4  ;;  %v5237_v62 = vrot.slane %v5236_v53, 4  ;;  %v5284_v37 = vor.u32 %v5283_v21, %v5280_v26  ;;  %v7902_v8 = vld [vmem:[%s9028_s25 + $0xb4] sm:$0xf] }
 0x1a4   : > { %v5242_v9 = vsel %vm9044_vm4, %v5237_v62, %v5241_v45 }
 0x1a6   : > { %7596 = vmatmul.mubr.msk.bf16.gmra.mrb[4].mxu1 %vm362_vm1, %v8802_v29  ;;  %v5222_v29 = vor.u32 %v5221_v19, %v5217_v18  ;;  %v7887_v18 = vld [vmem:[%s9028_s25 + $0x78] sm:$0xf]  ;;  %v7888_v19 = vld [vmem:[%s9028_s25 + $0x7c] sm:$0xf] }
 0x1a7   : > { %2538 = vmatprep.mubr.bf16.mxu1 %v8915_v4  ;;  %v5302_v30 = vshrl.u32 %v7887_v18, 16  ;;  %v5305_v31 = vshll.u32 %v7887_v18, 16  ;;  %v5311_v32 = vshll.u32 %v7888_v19, 16  ;;  %v5315_v33 = vshrl.u32 %v7888_v19, 16 }
 0x1a8   : > { %v5223_v39 = vrot.slane %v5222_v29, 4  ;;  %v7886_v29 = vld [vmem:[%s9028_s25 + $0x74] sm:$0x1] }
 0x1a9   : > { %7931 = vmatmul.mubr.msk.bf16.vlgmr.msra.gmra.mrb[0].mxu0 %vm362_vm1, %v7912_v35  ;;  %v8807_v35 = vld [vmem:[%s9028_s25 + $0x3c] sm:$0xff]   ;;  %v5307_v43 = vrot.slane %v5305_v31, 5  ;;  %v5313_v44 = vrot.slane %v5311_v32, 5 }
 0x1aa   : > { %6305 = vmatpush1.bf16.msra.mxu0 %v6299_v46  ;;  %5644 = vmatprep.mubr.bf16.mxu0 %v8915_v4  ;;  %v5245_v46 = vrot.slane %v5243_v34, 4  ;;  %v5228_v52 = vsel %vm9044_vm4, %v5223_v39, %v5227_v40  ;;  %v8810_v34 = vld [vmem:[%s9028_s25 + $0x60] sm:$0xff]   ;;  %v5297_v39 = vshll.u32 %v7886_v29, 16  ;;  %v5304_v40 = vrot.slane %v5302_v30, 4  ;;  %v7895_v29 = vld [vmem:[%s9028_s25 + $0x98] sm:$0x1] }
 0x1ab   : > { %v7896_v30 = vld [vmem:[%s9028_s25 + $0x9c] sm:$0xf]  ;;  %v7897_v31 = vld [vmem:[%s9028_s25 + $0xa0] sm:$0xf] }
 0x1ac   : > { %v5246_v54 = vor.u32 %v5245_v46, %v5241_v45  ;;  %v5317_v45 = vrot.slane %v5315_v33, 4  ;;  %v7889_v46 = vld [vmem:[%s9028_s25 + $0x80] sm:$0x1]  ;;  %v5308_v53 = vor.u32 %v5307_v43, %v5304_v40  ;;  %v8813_v33 = vld [vmem:[%s9028_s25 + $0x84] sm:$0xff]   ;;  %v5383_v40 = vshll.u32 %v7897_v31, 16 }
 0x1ad   : > { %v5321_v55 = vshll.u32 %v7889_v46, 16  ;;  %v5387_v43 = vshrl.u32 %v7897_v31, 16  ;;  %v7904_v31 = vld [vmem:[%s9028_s25 + $0xbc] sm:$0x1] }
 0x1ae   : > { %7597 = vmatmul.mubr.msk.bf16.gmra.mrb[8].mxu1 %vm362_vm1, %v8805_v50  ;;  %v7882_v50 = vld [vmem:[%s9028_s25 + $0x64] sm:$0xf]  ;;  %v5247_v63 = vrot.slane %v5246_v54, 4  ;;  %v5318_v54 = vor.u32 %v5317_v45, %v5313_v44  ;;  %v7900_v45 = vld [vmem:[%s9028_s25 + $0xac] sm:$0xf] }
 0x1af   : > { %2548 = vmatprep.mubr.bf16.mxu1 %v8915_v4  ;;  %v5263_v59 = vshll.u32 %v7882_v50, 16  ;;  %v5267_v60 = vshrl.u32 %v7882_v50, 16  ;;  %v5285_v50 = vrot.slane %v5284_v37, 4  ;;  %v5323_v1 = vrot.slane %v5321_v55, 5 }
 0x1b0   : > { %v5369_v37 = vshll.u32 %v7895_v29, 16 }
 0x1b1   : > { %7932 = vmatmul.mubr.msk.bf16.gmra.mrb[4].mxu0 %vm362_vm1, %v7913_v61  ;;  %v7916_v61 = vcombine.low %v5218_v51, %v5228_v52  ;;  %v5265_v3 = vrot.slane %v5263_v59, 5  ;;  %v5269_v5 = vrot.slane %v5267_v60, 4  ;;  %v5295_v51 = vrot.slane %v5294_v38, 4  ;;  %v8811_v60 = vld [vmem:[%s9028_s25 + $0x6c] sm:$0xff]  }
 0x1b2   : > { %5654 = vmatprep.mubr.bf16.mxu0 %v8915_v4  ;;  %v5299_v52 = vrot.slane %v5297_v39, 5  ;;  %v5339_v59 = vshrl.u32 %v7891_v49, 16  ;;  %v5374_v38 = vshrl.u32 %v7896_v30, 16  ;;  %v5377_v39 = vshll.u32 %v7896_v30, 16 }
 0x1b3   : > { %v5270_v13 = vor.u32 %v5269_v5, %v5265_v3  ;;  %v5337_v5 = vrot.slane %v5335_v58, 5  ;;  %v5371_v49 = vrot.slane %v5369_v37, 5  ;;  %v5411_v58 = vshrl.u32 %v7900_v45, 16 }
 0x1b4   : > { %v5300_v62 = vsel %vm9044_vm4, %v5295_v51, %v5299_v52  ;;  %v5341_v6 = vrot.slane %v5339_v59, 4  ;;  %v5379_v51 = vrot.slane %v5377_v39, 5  ;;  %v5385_v52 = vrot.slane %v5383_v40, 5  ;;  %v8814_v59 = vld [vmem:[%s9028_s25 + $0x90] sm:$0xff]   ;;  %v8816_v39 = vld [vmem:[%s9028_s25 + $0xa8] sm:$0xff]  }
 0x1b5   : > { %v5271_v23 = vrot.slane %v5270_v13, 4 }
 0x1b6   : > { %7598 = vmatmul.mubr.msk.bf16.gmra.mrb[12].mxu1 %vm362_vm1, %v8806_v11  ;;  %v5252_v11 = vsel %vm9044_vm4, %v5247_v63, %v5251_v0  ;;  %v5309_v63 = vrot.slane %v5308_v53, 4  ;;  %v5319_v0 = vrot.slane %v5318_v54, 4  ;;  %v5342_v14 = vor.u32 %v5341_v6, %v5337_v5  ;;  %v7898_v54 = vld [vmem:[%s9028_s25 + $0xa4] sm:$0x1]  ;;  %v7901_v6 = vld [vmem:[%s9028_s25 + $0xb0] sm:$0x1] }
 0x1b7   : > { %2558 = vmatprep.mubr.bf16.mxu1 %v8915_v4  ;;  %v7917_v20 = vcombine.low %v5242_v9, %v5252_v11  ;;  %v5276_v36 = vsel %vm9044_vm4, %v5271_v23, %v5275_v25  ;;  %v7893_v9 = vld [vmem:[%s9028_s25 + $0x90] sm:$0xf]  ;;  %v5347_v25 = vrot.slane %v5345_v15, 5  ;;  %v5389_v53 = vrot.slane %v5387_v43, 4 }
 0x1b8   : > { %v5314_v11 = vsel %vm9044_vm4, %v5309_v63, %v5313_v44  ;;  %v5350_v17 = vshrl.u32 %v7893_v9, 16  ;;  %v5353_v47 = vshll.u32 %v7893_v9, 16  ;;  %v5343_v23 = vrot.slane %v5342_v14, 4  ;;  %v7899_v44 = vld [vmem:[%s9028_s25 + $0xa8] sm:$0xf] }
 0x1b9   : > { %7933 = vmatmul.mubr.msk.bf16.gmra.mrb[8].mxu0 %vm362_vm1, %v7914_v22  ;;  %v5261_v22 = vrot.slane %v5260_v12, 4  ;;  %v5324_v12 = vsel %vm9044_vm4, %v5319_v0, %v5323_v1  ;;  %v5398_v55 = vshrl.u32 %v7899_v44, 16  ;;  %v5390_v63 = vor.u32 %v5389_v53, %v5385_v52  ;;  %v7903_v9 = vld [vmem:[%s9028_s25 + $0xb8] sm:$0xf] }
 0x1ba   : > { %5664 = vmatprep.mubr.bf16.mxu0 %v8915_v4  ;;  %v5352_v26 = vrot.slane %v5350_v17, 4  ;;  %v5355_v21 = vrot.slane %v5353_v47, 5  ;;  %v5393_v0 = vshll.u32 %v7898_v54, 16  ;;  %v5417_v15 = vshll.u32 %v7901_v6, 16 }
 0x1bb   : > { %v5400_v1 = vrot.slane %v5398_v55, 4  ;;  %v5425_v17 = vshll.u32 %v7902_v8, 16  ;;  %v5431_v47 = vshll.u32 %v7903_v9, 16  ;;  %v7907_v55 = vld [vmem:[%s9028_s25 + $0xc8] sm:$0x1] }
 0x1be   : > { %7599 = vmatmul.mubr.msk.bf16.gmra.mrb[16].mxu1 %vm362_vm1, %v8807_v35  ;;  %v5266_v35 = vsel %vm9044_vm4, %v5261_v22, %v5265_v3  ;;  %v5331_v3 = vrot.slane %v5329_v57, 5  ;;  %v5407_v57 = vshll.u32 %v7900_v45, 16 }
 0x1bf   : > { %2568 = vmatprep.mubr.bf16.mxu1 %v8915_v4 }
 0x1c1   : > { %7934 = vmatmul.mubr.msk.bf16.gmra.mrb[12].mxu0 %vm362_vm1, %v7915_v48  ;;  %v7918_v48 = vcombine.low %v5266_v35, %v5276_v36  ;;  %v5356_v35 = vor.u32 %v5355_v21, %v5352_v26  ;;  %v5419_v26 = vrot.slane %v5417_v15, 5  ;;  %v8818_v15 = vld [vmem:[%s9028_s25 + $0xc0] sm:$0xff]  }
 0x1c2   : > { %5674 = vmatprep.mubr.bf16.mxu0 %v8915_v4 }
 0x1c6   : > { %7600 = vmatmul.mubr.msk.bf16.gmra.mrb[20].mxu1 %vm362_vm1, %v8808_v56  ;;  %v5326_v56 = vshrl.u32 %v7890_v24, 16 }
 0x1c7   : > { %2578 = vmatprep.mubr.bf16.mxu1 %v8915_v4 }
 0x1c8   : > { %v5328_v2 = vrot.slane %v5326_v56, 4  ;;  %v5401_v56 = vshll.u32 %v7899_v44, 16 }
 0x1c9   : > { %7935 = vmatmul.mubr.msk.bf16.gmra.mrb[16].mxu0 %vm362_vm1, %v7916_v61  ;;  %v5290_v61 = vsel %vm9044_vm4, %v5285_v50, %v5289_v27  ;;  %v5376_v50 = vrot.slane %v5374_v38, 4  ;;  %v5441_v38 = vshll.u32 %v7904_v31, 16  ;;  %v7947_v31 = vld [vmem:[%s9028_s25 + $0x18] sm:$0xe] }
 0x1ca   : > { %5684 = vmatprep.mubr.bf16.mxu0 %v8915_v4  ;;  %v7919_v7 = vcombine.low %v5290_v61, %v5300_v62  ;;  %v5332_v13 = vor.u32 %v5331_v3, %v5328_v2  ;;  %v5403_v2 = vrot.slane %v5401_v56, 5  ;;  %v5409_v3 = vrot.slane %v5407_v57, 5  ;;  %v7908_v56 = vld [vmem:[%s9028_s25 + $0xcc] sm:$0xf]  ;;  %v7909_v57 = vld [vmem:[%s9028_s25 + $0xd0] sm:$0xf] }
 0x1cb   : > { %v5380_v62 = vor.u32 %v5379_v51, %v5376_v50  ;;  %v5443_v50 = vrot.slane %v5441_v38, 5 }
 0x1cc   : > { %v5333_v22 = vrot.slane %v5332_v13, 4  ;;  %v5404_v13 = vor.u32 %v5403_v2, %v5400_v1  ;;  %v5470_v1 = vshrl.u32 %v7908_v56, 16  ;;  %v5473_v2 = vshll.u32 %v7908_v56, 16 }
 0x1ce   : > { %7601 = vmatmul.mubr.msk.bf16.gmra.mrb[24].mxu1 %vm362_vm1, %v8809_v10  ;;  %v7894_v10 = vld [vmem:[%s9028_s25 + $0x94] sm:$0xf]  ;;  %v5338_v32 = vsel %vm9044_vm4, %v5333_v22, %v5337_v5  ;;  %v5413_v5 = vrot.slane %v5411_v58, 4 }
 0x1cf   : > { %2588 = vmatprep.mubr.bf16.mxu1 %v8915_v4  ;;  %v5359_v18 = vshll.u32 %v7894_v10, 16  ;;  %v5363_v19 = vshrl.u32 %v7894_v10, 16  ;;  %v5381_v10 = vrot.slane %v5380_v62, 4 }
 0x1d0   : > { %v5414_v14 = vor.u32 %v5413_v5, %v5409_v3  ;;  %v5483_v5 = vshrl.u32 %v7909_v57, 16 }
 0x1d1   : > { %7936 = vmatmul.mubr.msk.bf16.gmra.mrb[20].mxu0 %vm362_vm1, %v7917_v20  ;;  %v7920_v20 = vcombine.low %v5314_v11, %v5324_v12  ;;  %v5361_v27 = vrot.slane %v5359_v18, 5  ;;  %v5365_v28 = vrot.slane %v5363_v19, 4  ;;  %v5391_v11 = vrot.slane %v5390_v63, 4  ;;  %v8815_v19 = vld [vmem:[%s9028_s25 + $0x9c] sm:$0xff]  }
 0x1d2   : > { %5694 = vmatprep.mubr.bf16.mxu0 %v8915_v4  ;;  %v5395_v12 = vrot.slane %v5393_v0, 5  ;;  %v5435_v18 = vshrl.u32 %v7903_v9, 16  ;;  %v5465_v63 = vshll.u32 %v7907_v55, 16  ;;  %v8820_v0 = vld [vmem:[%s10600_s3] sm:$0xff]   ;;  %v7955_v55 = vld [vmem:[%s9028_s25 + $0x38] sm:$0x1] }
 0x1d3   : > { %v5366_v36 = vor.u32 %v5365_v28, %v5361_v27  ;;  %v5433_v28 = vrot.slane %v5431_v47, 5 }
 0x1d4   : > { %v5396_v22 = vsel %vm9044_vm4, %v5391_v11, %v5395_v12  ;;  %v5437_v29 = vrot.slane %v5435_v18, 4  ;;  %v5467_v9 = vrot.slane %v5465_v63, 5  ;;  %v5475_v11 = vrot.slane %v5473_v2, 5  ;;  %v7956_v63 = vld [vmem:[%s9028_s25 + $0x3c] sm:$0xe] }
 0x1d5   : > { %v5367_v24 = vrot.slane %v5366_v36, 4  ;;  %v8825_v2 = vld [vmem:[%s10600_s3 + $0x58] sm:$0xff]  }
 0x1d6   : > { %7602 = vmatmul.mubr.msk.bf16.gmra.mrb[28].mxu1 %vm362_vm1, %v8810_v34  ;;  %v5348_v34 = vsel %vm9044_vm4, %v5343_v23, %v5347_v25  ;;  %v5405_v23 = vrot.slane %v5404_v13, 4  ;;  %v5415_v25 = vrot.slane %v5414_v14, 4  ;;  %v5438_v37 = vor.u32 %v5437_v29, %v5433_v28  ;;  %v7910_v14 = vld [vmem:[%s9028_s25 + $0xd4] sm:$0x1] }
 0x1d7   : > { %2598 = vmatprep.mubr.bf16.mxu1 %v8915_v4  ;;  %v7921_v46 = vcombine.low %v5338_v32, %v5348_v34  ;;  %v5372_v61 = vsel %vm9044_vm4, %v5367_v24, %v5371_v49  ;;  %v7905_v32 = vld [vmem:[%s9028_s25 + $0xc0] sm:$0xf]  ;;  %v5485_v13 = vrot.slane %v5483_v5, 4 }
 0x1d8   : > { %v5410_v34 = vsel %vm9044_vm4, %v5405_v23, %v5409_v3  ;;  %v5446_v40 = vshrl.u32 %v7905_v32, 16  ;;  %v5449_v43 = vshll.u32 %v7905_v32, 16  ;;  %v5439_v49 = vrot.slane %v5438_v37, 4  ;;  %v7949_v32 = vld [vmem:[%s9028_s25 + $0x20] sm:$0x1] }
 0x1d9   : > { %7937 = vmatmul.mubr.msk.bf16.gmra.mrb[24].mxu0 %vm362_vm1, %v7918_v48  ;;  %v5357_v48 = vrot.slane %v5356_v35, 4  ;;  %v5420_v35 = vsel %vm9044_vm4, %v5415_v25, %v5419_v26  ;;  %v5479_v3 = vshll.u32 %v7909_v57, 16  ;;  %v7951_v37 = vld [vmem:[%s9028_s25 + $0x28] sm:$0xf] }
 0x1da   : > { %5704 = vmatprep.mubr.bf16.mxu0 %v8915_v4  ;;  %v5448_v51 = vrot.slane %v5446_v40, 4  ;;  %v6092_v40 = vrot.slane %v7951_v37, 5 }
 0x1db   : > { %v5481_v12 = vrot.slane %v5479_v3, 5  ;;  %v8826_v3 = vld [vmem:[%s10600_s3 + $0x18] sm:$0xff]  }
 0x1dd   : > { %v5486_v18 = vor.u32 %v5485_v13, %v5481_v12  ;;  %v7959_v13 = vld [vmem:[%s9028_s25 + $0x48] sm:$0xe] }
 0x1de   : > { %7603 = vmatmul.mubr.msk.bf16.gmra.mrb[32].mxu1 %vm362_vm1, %v8811_v60  ;;  %v5362_v60 = vsel %vm9044_vm4, %v5357_v48, %v5361_v27  ;;  %v5427_v27 = vrot.slane %v5425_v17, 5  ;;  %v7924_v48 = vcombine.low %v5410_v34, %v5420_v35  ;;  %v7995_v34 = vrot.slane %v7947_v31, 9  ;;  %v7966_v31 = vld [vmem:[%s9028_s25 + $0x64] sm:$0xf] }
 0x1df   : > { %2608 = vmatprep.mubr.bf16.mxu1 %v8915_v4  ;;  %v5487_v25 = vrot.slane %v5486_v18, 4  ;;  %v7963_v18 = vld [vmem:[%s9028_s25 + $0x58] sm:$0xf] }
 0x1e1   : > { %7938 = vmatmul.mubr.msk.bf16.gmra.mrb[28].mxu0 %vm362_vm1, %v7919_v7  ;;  %v7922_v7 = vcombine.low %v5362_v60, %v5372_v61  ;;  %v5444_v60 = vsel %vm9044_vm4, %v5439_v49, %v5443_v50  ;;  %v7954_v50 = vld [vmem:[%s9028_s25 + $0x34] sm:$0xf] }
 0x1e2   : > { %5714 = vmatprep.mubr.bf16.mxu0 %v8915_v4 }
 0x1e6   : > { %7604 = vmatmul.mubr.msk.bf16.gmra.mrb[36].mxu1 %vm362_vm1, %v8812_v16  ;;  %v5422_v16 = vshrl.u32 %v7902_v8, 16 }
 0x1e7   : > { %2618 = vmatprep.mubr.bf16.mxu1 %v8915_v4 }
 0x1e8   : > { %v5424_v21 = vrot.slane %v5422_v16, 4 }
 0x1e9   : > { %7939 = vmatmul.mubr.msk.bf16.gmra.mrb[32].mxu0 %vm362_vm1, %v7920_v20  ;;  %v5386_v20 = vsel %vm9044_vm4, %v5381_v10, %v5385_v52  ;;  %v5451_v52 = vrot.slane %v5449_v43, 5  ;;  %v5472_v10 = vrot.slane %v5470_v1, 4  ;;  %v7952_v43 = vld [vmem:[%s9028_s25 + $0x2c] sm:$0x1]  ;;  %v7958_v1 = vld [vmem:[%s9028_s25 + $0x44] sm:$0x1] }
 0x1ea   : > { %5724 = vmatprep.mubr.bf16.mxu0 %v8915_v4  ;;  %v7923_v30 = vcombine.low %v5386_v20, %v5396_v22  ;;  %v5428_v36 = vor.u32 %v5427_v27, %v5424_v21  ;;  %v8821_v20 = vld [vmem:[%s10600_s3 + $0x48] sm:$0xff]   ;;  %v7948_v21 = vld [vmem:[%s9028_s25 + $0x1c] sm:$0xf]  ;;  %v6095_v49 = vrot.slane %v7952_v43, 5 }
 0x1eb   : > { %v5452_v61 = vor.u32 %v5451_v52, %v5448_v51  ;;  %v5476_v47 = vor.u32 %v5475_v11, %v5472_v10  ;;  %v8822_v27 = vld [vmem:[%s10600_s3 + $0x8] sm:$0xff]  }
 0x1ec   : > { %v5429_v24 = vrot.slane %v5428_v36, 4  ;;  %v6088_v36 = vrot.slane %v7949_v32, 5 }
 0x1ed   : > { %v5477_v23 = vrot.slane %v5476_v47, 4 }
 0x1ee   : > { %7605 = vmatmul.mubr.msk.bf16.gmra.mrb[40].mxu1 %vm362_vm1, %v8813_v33  ;;  %v7906_v33 = vld [vmem:[%s9028_s25 + $0xc4] sm:$0xf]  ;;  %v5434_v58 = vsel %vm9044_vm4, %v5429_v24, %v5433_v28  ;;  %v6094_v24 = vrot.slane %v6092_v40, 4 }
 0x1ef   : > { %2628 = vmatprep.mubr.bf16.mxu1 %v8915_v4  ;;  %v5455_v44 = vshll.u32 %v7906_v33, 16  ;;  %v5459_v45 = vshrl.u32 %v7906_v33, 16  ;;  %v7925_v6 = vcombine.low %v5434_v58, %v5444_v60  ;;  %v5482_v28 = vsel %vm9044_vm4, %v5477_v23, %v5481_v12  ;;  %v7957_v60 = vld [vmem:[%s9028_s25 + $0x40] sm:$0xf] }
 0x1f0   : > { %v6096_v52 = vsel %vm9274_vm7, %v6094_v24, %v6095_v49  ;;  %v6120_v23 = vrot.slane %v7963_v18, 5  ;;  %v8829_v24 = vld [vmem:[%s10600_s3 + $0x68] sm:$0xff]   ;;  %v8833_v18 = vld [vmem:[%s10600_s3 + $0x78] sm:$0xff]  }
 0x1f1   : > { %7940 = vmatmul.mubr.msk.bf16.gmra.mrb[36].mxu0 %vm362_vm1, %v7921_v46  ;;  %v8819_v46 = vld [vmem:[%s10600_s3 + $0x40] sm:$0xff]   ;;  %v5457_v53 = vrot.slane %v5455_v44, 5  ;;  %v5461_v54 = vrot.slane %v5459_v45, 4  ;;  %v8823_v44 = vld [vmem:[%s10600_s3 + $0x50] sm:$0xff]   ;;  %v8830_v49 = vld [vmem:[%s10600_s3 + $0x28] sm:$0xff]  }
 0x1f2   : > { %5734 = vmatprep.mubr.bf16.mxu0 %v8915_v4  ;;  %8070 = vmatprep.subr.bf16.mxu1 %v8819_v46  ;;  %v8824_v45 = vld [vmem:[%s10600_s3 + $0x10] sm:$0xff]  }
 0x1f3   : > { %v5462_v62 = vor.u32 %v5461_v54, %v5457_v53  ;;  %8071 = vmatpush3.bf16.msra.mxu1 %v8820_v0  ;;  %v7953_v54 = vld [vmem:[%s9028_s25 + $0x30] sm:$0xe]  ;;  %v6106_v0 = vrot.slane %v7957_v60, 5 }
 0x1f4   : > { %8072 = vmatprep.subr.bf16.mxu1 %v8821_v20  ;;  %v7997_v57 = vrot.slane %v7953_v54, 9  ;;  %v7972_v54 = vld [vmem:[%s9028_s25 + $0x7c] sm:$0xf] }
 0x1f5   : > { %v5463_v8 = vrot.slane %v5462_v62, 4 }
 0x1f6   : > { %7606 = vmatmul.mubr.msk.bf16.gmra.mrb[44].mxu1 %vm362_vm1, %v8814_v59  ;;  %v8817_v59 = vld [vmem:[%s9028_s25 + $0xb4] sm:$0xff]  }
 0x1f7   : > { %2638 = vmatprep.mubr.bf16.mxu1 %v8915_v4  ;;  %v5468_v17 = vsel %vm9044_vm4, %v5463_v8, %v5467_v9  ;;  %8073 = vmatpush3.bf16.msra.mxu1 %v8822_v27  ;;  %v6109_v8 = vrot.slane %v7958_v1, 5  ;;  %v7960_v9 = vld [vmem:[%s9028_s25 + $0x4c] sm:$0xf] }
 0x1f8   : > { %8074 = vmatprep.subr.bf16.mxu1 %v8823_v44  ;;  %v6113_v12 = vrot.slane %v7960_v9, 5 }
 0x1f9   : > { %7941 = vmatmul.mubr.msk.bf16.gmra.mrb[40].mxu0 %vm362_vm1, %v7922_v7  ;;  %v5453_v7 = vrot.slane %v5452_v61, 4 }
 0x1fa   : > { %5744 = vmatprep.mubr.bf16.mxu0 %v8915_v4 }
 0x1fb   : > { %v5458_v16 = vsel %vm9044_vm4, %v5453_v7, %v5457_v53  ;;  %8075 = vmatpush3.bf16.msra.mxu1 %v8824_v45  ;;  %v6099_v53 = vrot.slane %v7954_v50, 5  ;;  %v6108_v7 = vrot.slane %v6106_v0, 4  ;;  %v7968_v45 = vld [vmem:[%s9028_s25 + $0x6c] sm:$0xe] }
 0x1fc   : > { %v7926_v22 = vcombine.low %v5458_v16, %v5468_v17  ;;  %8076 = vmatprep.subr.bf16.mxu1 %v8825_v2  ;;  %v7999_v16 = vrot.slane %v7959_v13, 9  ;;  %v6115_v17 = vrot.slane %v6113_v12, 4  ;;  %v7978_v13 = vld [vmem:[%s9028_s25 + $0x94] sm:$0xf] }
 0x1fd   : > { %v6101_v58 = vrot.slane %v6099_v53, 4  ;;  %v6100_v61 = vsel %vm9274_vm7, %v7997_v57, %v6099_v53  ;;  %v6110_v11 = vsel %vm9274_vm7, %v6108_v7, %v6109_v8  ;;  %v6141_v57 = vrot.slane %v7972_v54, 5  ;;  %v8831_v7 = vld [vmem:[%s10600_s3 + $0x70] sm:$0xff]   ;;  %v7987_v54 = vld [vmem:[%s9028_s25 + $0xb8] sm:$0xf] }
 0x1fe   : > { %7607 = vmatmul.mubr.msk.bf16.gmra.mrb[48].mxu1 %vm362_vm1, %v8815_v19  ;;  %v5489_v19 = vshll.u32 %v7910_v14, 16  ;;  %v7961_v14 = vld [vmem:[%s9028_s25 + $0x50] sm:$0x1] }
 0x1ff   : > { %2648 = vmatprep.mubr.bf16.mxu1 %v8915_v4  ;;  %8077 = vmatpush3.bf16.msra.mxu1 %v8826_v3  ;;  %v6116_v47 = vrot.slane %v7961_v14, 5  ;;  %v7974_v3 = vld [vmem:[%s9028_s25 + $0x84] sm:$0xe]  ;;  %v8832_v8 = vld [vmem:[%s10600_s3 + $0x30] sm:$0xff]  }
 0x200   : > { %v5491_v26 = vrot.slane %v5489_v19, 5  ;;  %v6114_v19 = vsel %vm9274_vm7, %v7999_v16, %v6113_v12  ;;  %v7977_v16 = vld [vmem:[%s9028_s25 + $0x90] sm:$0xe] }
 0x201   : > { %7942 = vmatmul.mubr.msk.bf16.gmra.mrb[44].mxu0 %vm362_vm1, %v7923_v30  ;;  %v6085_v30 = vrot.slane %v7948_v21, 5  ;;  %v6117_v20 = vsel %vm9274_vm7, %v6115_v17, %v6116_v47  ;;  %v8828_v21 = vld [vmem:[%s10600_s3 + $0x20] sm:$0xff]   ;;  %v6155_v17 = vrot.slane %v7978_v13, 5  ;;  %v7979_v47 = vld [vmem:[%s9028_s25 + $0x98] sm:$0x1] }
 0x202   : > { %5754 = vmatprep.mubr.bf16.mxu0 %v8915_v4  ;;  %v5492_v29 = vsel %vm9044_vm4, %v5487_v25, %v5491_v26  ;;  %v7964_v25 = vld [vmem:[%s9028_s25 + $0x5c] sm:$0x1]  ;;  %v8827_v26 = vld [vmem:[%s10600_s3 + $0x60] sm:$0xff]   ;;  %v8016_v27 = vcombine.low %v6114_v19, %v6117_v20 }
 0x203   : > { %v7927_v33 = vcombine.low %v5482_v28, %v5492_v29  ;;  %v6087_v35 = vrot.slane %v6085_v30, 4  ;;  %v6086_v38 = vsel %vm9274_vm7, %v7995_v34, %v6085_v30  ;;  %8078 = vmatprep.subr.bf16.mxu1 %v8827_v26  ;;  %v6122_v29 = vrot.slane %v6120_v23, 4  ;;  %v8834_v19 = vld [vmem:[%s10600_s3 + $0x38] sm:$0xff]   ;;  %v7981_v26 = vld [vmem:[%s9028_s25 + $0xa0] sm:$0xf] }
 0x204   : > { %v6123_v30 = vrot.slane %v7964_v25, 5  ;;  %8079 = vmatpush3.bf16.msra.mxu1 %v8828_v21  ;;  %v6127_v34 = vrot.slane %v7966_v31, 5  ;;  %v6158_v25 = vrot.slane %v7979_v47, 5  ;;  %v6162_v31 = vrot.slane %v7981_v26, 5  ;;  %v7989_v13 = vld [vmem:[%s9028_s25 + $0xc0] sm:$0xe] }
 0x205   : > { %v6089_v41 = vsel %vm9274_vm7, %v6087_v35, %v6088_v36  ;;  %v7965_v35 = vld [vmem:[%s9028_s25 + $0x60] sm:$0xe]  ;;  %v7967_v36 = vld [vmem:[%s9028_s25 + $0x68] sm:$0x1]  ;;  %8080 = vmatprep.subr.bf16.mxu1 %v8829_v24  ;;  %v7983_v24 = vld [vmem:[%s9028_s25 + $0xa8] sm:$0xe] }
 0x206   : > { %7608 = vmatmul.mubr.msk.bf16.gmra.mrb[52].mxu1 %vm362_vm1, %v8816_v39  ;;  %v7950_v39 = vld [vmem:[%s9028_s25 + $0x24] sm:$0xe]  ;;  %v8012_v46 = vcombine.low %v6086_v38, %v6089_v41  ;;  %v8001_v38 = vrot.slane %v7965_v35, 9  ;;  %v6129_v41 = vrot.slane %v6127_v34, 4 }
 0x207   : > { %2658 = vmatprep.mubr.bf16.mxu1 %v8915_v4 }
 0x208   : > { %v6128_v43 = vsel %vm9274_vm7, %v8001_v38, %v6127_v34  ;;  %8081 = vmatpush3.bf16.msra.mxu1 %v8830_v49  ;;  %v7982_v34 = vld [vmem:[%s9028_s25 + $0xa4] sm:$0x1]  ;;  %v7985_v49 = vld [vmem:[%s9028_s25 + $0xb0] sm:$0x1] }
 0x209   : > { %7943 = vmatmul.mubr.msk.bf16.gmra.mrb[48].mxu0 %vm362_vm1, %v7924_v48  ;;  %v7996_v48 = vrot.slane %v7950_v39, 9  ;;  %v6130_v39 = vrot.slane %v7967_v36, 5  ;;  %8082 = vmatprep.subr.bf16.mxu1 %v8831_v7  ;;  %v6165_v38 = vrot.slane %v7982_v34, 5 }
 0x20a   : > { %5764 = vmatprep.mubr.bf16.mxu0 %v8915_v4 }
 0x20b   : > { %v6093_v51 = vsel %vm9274_vm7, %v7996_v48, %v6092_v40  ;;  %v7969_v40 = vld [vmem:[%s9028_s25 + $0x70] sm:$0xf]  ;;  %v6131_v44 = vsel %vm9274_vm7, %v6129_v41, %v6130_v39  ;;  %v7970_v48 = vld [vmem:[%s9028_s25 + $0x74] sm:$0x1]  ;;  %v7984_v41 = vld [vmem:[%s9028_s25 + $0xac] sm:$0xf] }
 0x20c   : > { %v8013_v56 = vcombine.low %v6093_v51, %v6096_v52  ;;  %v8018_v50 = vcombine.low %v6128_v43, %v6131_v44  ;;  %v8002_v51 = vrot.slane %v7968_v45, 9  ;;  %v6137_v53 = vrot.slane %v7970_v48, 5  ;;  %8083 = vmatpush3.bf16.msra.mxu1 %v8832_v8 }
 0x20d   : > { %8084 = vmatprep.subr.bf16.mxu1 %v8833_v18  ;;  %v7993_v18 = vld [vmem:[%s9028_s25 + $0xd0] sm:$0xf] }
 0x20e   : > { %7609 = vmatmul.mubr.msk.bf16.gmra.mrb[56].mxu1 %vm362_vm1, %v8817_v59  ;;  %v6102_v59 = vrot.slane %v7955_v55, 5  ;;  %v6190_v26 = vrot.slane %v7993_v18, 5 }
 0x20f   : > { %2668 = vmatprep.mubr.bf16.mxu1 %v8915_v4 }
 0x210   : > { %v6103_v62 = vsel %vm9274_vm7, %v6101_v58, %v6102_v59  ;;  %v7971_v58 = vld [vmem:[%s9028_s25 + $0x78] sm:$0xe]  ;;  %v7973_v59 = vld [vmem:[%s9028_s25 + $0x80] sm:$0x1]  ;;  %8085 = vmatpush3.bf16.msra.mxu1 %v8834_v19 }
 0x211   : > { %7944 = vmatmul.mubr.msk.bf16.gmra.mrb[52].mxu0 %vm362_vm1, %v7925_v6  ;;  %v8014_v5 = vcombine.low %v6100_v61, %v6103_v62  ;;  %v7998_v6 = vrot.slane %v7956_v63, 9  ;;  %v8003_v61 = vrot.slane %v7971_v58, 9  ;;  %v6143_v62 = vrot.slane %v6141_v57, 4 }
 0x212   : > { %5774 = vmatprep.mubr.bf16.mxu0 %v8915_v4  ;;  %v6144_v63 = vrot.slane %v7973_v59, 5 }
 0x213   : > { %v6107_v10 = vsel %vm9274_vm7, %v7998_v6, %v6106_v0  ;;  %v7975_v0 = vld [vmem:[%s9028_s25 + $0x88] sm:$0xf]  ;;  %v6142_v1 = vsel %vm9274_vm7, %v8003_v61, %v6141_v57  ;;  %v7976_v6 = vld [vmem:[%s9028_s25 + $0x8c] sm:$0x1] }
 0x214   : > { %v6145_v2 = vsel %vm9274_vm7, %v6143_v62, %v6144_v63  ;;  %v6151_v12 = vrot.slane %v7976_v6, 5  ;;  %v7986_v62 = vld [vmem:[%s9028_s25 + $0xb4] sm:$0xe]  ;;  %v7988_v63 = vld [vmem:[%s9028_s25 + $0xbc] sm:$0x1] }
 0x215   : > { %v8020_v9 = vcombine.low %v6142_v1, %v6145_v2  ;;  %v8008_v1 = vrot.slane %v7986_v62, 9 }
 0x216   : > { %7610 = vmatmul.mubr.msk.bf16.gmra.mrb[60].mxu1 %vm362_vm1, %v8818_v15  ;;  %v8015_v15 = vcombine.low %v6107_v10, %v6110_v11  ;;  %v8004_v10 = vrot.slane %v7974_v3, 9  ;;  %v6179_v3 = vrot.slane %v7988_v63, 5 }
 0x219   : > { %7945 = vmatmul.mubr.msk.bf16.gmra.mrb[56].mxu0 %vm362_vm1, %v7926_v22  ;;  %v7962_v22 = vld [vmem:[%s9028_s25 + $0x54] sm:$0xe] }
 0x21a   : > { %5784 = vmatprep.mubr.bf16.mxu0 %v8915_v4  ;;  %v8000_v28 = vrot.slane %v7962_v22, 9  ;;  %v8005_v22 = vrot.slane %v7977_v16, 9  ;;  %v8009_v16 = vrot.slane %v7989_v13, 9 }
 0x21c   : > { %v6121_v32 = vsel %vm9274_vm7, %v8000_v28, %v6120_v23  ;;  %v6157_v23 = vrot.slane %v6155_v17, 4 }
 0x221   : > { %7946 = vmatmul.mubr.msk.bf16.gmra.mrb[60].mxu0 %vm362_vm1, %v7927_v33  ;;  %v6124_v33 = vsel %vm9274_vm7, %v6122_v29, %v6123_v30  ;;  %v6156_v29 = vsel %vm9274_vm7, %v8005_v22, %v6155_v17  ;;  %v6159_v30 = vsel %vm9274_vm7, %v6157_v23, %v6158_v25 }
 0x222   : > { %6336 = vmatprep.mubr.bf16.mxu0 %v8915_v4  ;;  %v8017_v37 = vcombine.low %v6121_v32, %v6124_v33  ;;  %v7980_v33 = vld [vmem:[%s9028_s25 + $0x9c] sm:$0xe]  ;;  %v8022_v35 = vcombine.low %v6156_v29, %v6159_v30  ;;  %v7992_v30 = vld [vmem:[%s9028_s25 + $0xcc] sm:$0xe] }
 0x223   : > { %v8006_v36 = vrot.slane %v7980_v33, 9  ;;  %v8010_v34 = vrot.slane %v7992_v30, 9 }
 0x225   : > { %v6163_v44 = vsel %vm9274_vm7, %v8006_v36, %v6162_v31 }
 0x229   : > { %8031 = vmatmul.mubr.msk.bf16.vlgmr.msra.gmra.mrb[0].mxu0 %vm362_vm1, %v8012_v46  ;;  %v6134_v46 = vrot.slane %v7969_v40, 5 }
 0x22a   : > { %6346 = vmatprep.mubr.bf16.mxu0 %v8915_v4 }
 0x22b   : > { %v6136_v52 = vrot.slane %v6134_v46, 4  ;;  %v6135_v55 = vsel %vm9274_vm7, %v8002_v51, %v6134_v46  ;;  %v6169_v46 = vrot.slane %v7984_v41, 5  ;;  %v8007_v51 = vrot.slane %v7983_v24, 9 }
 0x22d   : > { %v6170_v58 = vsel %vm9274_vm7, %v8007_v51, %v6169_v46 }
 0x231   : > { %8032 = vmatmul.mubr.msk.bf16.gmra.mrb[4].mxu0 %vm362_vm1, %v8013_v56  ;;  %v6138_v56 = vsel %vm9274_vm7, %v6136_v52, %v6137_v53  ;;  %v6171_v52 = vrot.slane %v6169_v46, 4  ;;  %v6172_v53 = vrot.slane %v7985_v49, 5 }
 0x232   : > { %6356 = vmatprep.mubr.bf16.mxu0 %v8915_v4  ;;  %v8019_v60 = vcombine.low %v6135_v55, %v6138_v56 }
 0x233   : > { %v6173_v59 = vsel %vm9274_vm7, %v6171_v52, %v6172_v53 }
 0x239   : > { %8033 = vmatmul.mubr.msk.bf16.gmra.mrb[8].mxu0 %vm362_vm1, %v8014_v5  ;;  %v6148_v5 = vrot.slane %v7975_v0, 5  ;;  %v8024_v0 = vcombine.low %v6170_v58, %v6173_v59 }
 0x23a   : > { %6366 = vmatprep.mubr.bf16.mxu0 %v8915_v4 }
 0x23b   : > { %v6150_v11 = vrot.slane %v6148_v5, 4  ;;  %v6149_v14 = vsel %vm9274_vm7, %v8004_v10, %v6148_v5  ;;  %v7990_v5 = vld [vmem:[%s9028_s25 + $0xc4] sm:$0xf] }
 0x241   : > { %8034 = vmatmul.mubr.msk.bf16.gmra.mrb[12].mxu0 %vm362_vm1, %v8015_v15  ;;  %v6152_v15 = vsel %vm9274_vm7, %v6150_v11, %v6151_v12  ;;  %v6183_v11 = vrot.slane %v7990_v5, 5 }
 0x242   : > { %6376 = vmatprep.mubr.bf16.mxu0 %v8915_v4  ;;  %v8021_v20 = vcombine.low %v6149_v14, %v6152_v15  ;;  %v7991_v14 = vld [vmem:[%s9028_s25 + $0xc8] sm:$0x1] }
 0x243   : > { %v6185_v17 = vrot.slane %v6183_v11, 4  ;;  %v6186_v47 = vrot.slane %v7991_v14, 5  ;;  %v6184_v23 = vsel %vm9274_vm7, %v8009_v16, %v6183_v11 }
 0x245   : > { %v6187_v25 = vsel %vm9274_vm7, %v6185_v17, %v6186_v47 }
 0x246   : > { %v8026_v33 = vcombine.low %v6184_v23, %v6187_v25 }
 0x249   : > { %8035 = vmatmul.mubr.msk.bf16.gmra.mrb[16].mxu0 %vm362_vm1, %v8016_v27 }
 0x24a   : > { %6386 = vmatprep.mubr.bf16.mxu0 %v8915_v4 }
 0x251   : > { %8036 = vmatmul.mubr.msk.bf16.gmra.mrb[20].mxu0 %vm362_vm1, %v8017_v37  ;;  %v6164_v37 = vrot.slane %v6162_v31, 4  ;;  %v7994_v31 = vld [vmem:[%s9028_s25 + $0xd4] sm:$0x1]  ;;  %s8841_s25 = scalar_lea.vmem %s8840_s24, 8192 }
 0x252   : > { %6396 = vmatprep.mubr.bf16.mxu0 %v8915_v4  ;;  %v6193_v36 = vrot.slane %v7994_v31, 5  ;;  %p8843_p2 = scmp.lt.s32.totalorder %s8841_s25, %s8835_s16 }
 0x253   : > { %v6166_v45 = vsel %vm9274_vm7, %v6164_v37, %v6165_v38 }
 0x254   : > { %p8844_p3 = por %p8843_p2, %p8842_p1 }
 0x256   : > { %p8845_p5 = pnand %p8844_p3, %p8838_p0 }
 0x259   : > { %8037 = vmatmul.mubr.msk.bf16.gmra.mrb[24].mxu0 %vm362_vm1, %v8018_v50  ;;  %v8023_v50 = vcombine.low %v6163_v44, %v6166_v45  ;;  %v6191_v44 = vsel %vm9274_vm7, %v8010_v34, %v6190_v26 }
 0x25a   : > { %6406 = vmatprep.mubr.bf16.mxu0 %v8915_v4 }
 0x261   : > { %8038 = vmatmul.mubr.msk.bf16.gmra.mrb[28].mxu0 %vm362_vm1, %v8019_v60  ;;  %v6176_v60 = vrot.slane %v7987_v54, 5 }
 0x262   : > { %6416 = vmatprep.mubr.bf16.mxu0 %v8915_v4 }
 0x263   : > { %v6178_v2 = vrot.slane %v6176_v60, 4 }
 0x265   : > { %v6180_v10 = vsel %vm9274_vm7, %v6178_v2, %v6179_v3 }
 0x269   : > { %8039 = vmatmul.mubr.msk.bf16.gmra.mrb[32].mxu0 %vm362_vm1, %v8020_v9  ;;  %v6177_v9 = vsel %vm9274_vm7, %v8008_v1, %v6176_v60 }
 0x26a   : > { %6426 = vmatprep.mubr.bf16.mxu0 %v8915_v4  ;;  %v8025_v15 = vcombine.low %v6177_v9, %v6180_v10 }
 0x271   : > { %v10152_v21 = vpop.f32.mrb[0].mxu1  ;;  %8040 = vmatmul.mubr.msk.bf16.gmra.mrb[36].mxu0 %vm362_vm1, %v8021_v20 }
 0x272   : > { %v10155_v27 = vpop.f32.mrb[1].mxu1  ;;  %6436 = vmatprep.mubr.bf16.mxu0 %v8915_v4 }
 0x273   : > { %v10157_v28 = vpop.f32.mrb[2].mxu1 }
 0x274   : > { %v10164_v32 = vpop.f32.mrb[3].mxu1 }
 0x279   : > { %v10169_v39 = vpop.f32.mrb[4].mxu1  ;;  %8041 = vmatmul.mubr.msk.bf16.gmra.mrb[40].mxu0 %vm362_vm1, %v8022_v35  ;;  %v6192_v35 = vrot.slane %v6190_v26, 4 }
 0x27a   : > { %v10172_v40 = vpop.f32.mrb[5].mxu1  ;;  %6446 = vmatprep.mubr.bf16.mxu0 %v8915_v4 }
 0x27b   : > { %v10174_v43 = vpop.f32.mrb[6].mxu1  ;;  %v6194_v45 = vsel %vm9274_vm7, %v6192_v35, %v6193_v36 }
 0x27c   : > { %v10181_v48 = vpop.f32.mrb[7].mxu1  ;;  %v8027_v24 = vcombine.low %v6191_v44, %v6194_v45 }
 0x281   : > { %v10186_v55 = vpop.f32.mrb[8].mxu1  ;;  %8042 = vmatmul.mubr.msk.bf16.gmra.mrb[44].mxu0 %vm362_vm1, %v8023_v50 }
 0x282   : > { %v10189_v56 = vpop.f32.mrb[9].mxu1  ;;  %6456 = vmatprep.mubr.bf16.mxu0 %v8915_v4 }
 0x283   : > { %v10191_v57 = vpop.f32.mrb[10].mxu1 }
 0x284   : > { %v10198_v61 = vpop.f32.mrb[11].mxu1 }
 0x289   : > { %v10203_v6 = vpop.f32.mrb[12].mxu1  ;;  %8043 = vmatmul.mubr.msk.bf16.gmra.mrb[48].mxu0 %vm362_vm1, %v8024_v0 }
 0x28a   : > { %v10206_v7 = vpop.f32.mrb[13].mxu1  ;;  %6466 = vmatprep.mubr.bf16.mxu0 %v8915_v4 }
 0x28b   : > { %v10208_v8 = vpop.f32.mrb[14].mxu1 }
 0x28c   : > { %v10215_v12 = vpop.f32.mrb[15].mxu1 }
 0x291   : > { %v10220_v19 = vpop.f32.mrb[16].mxu1  ;;  %8044 = vmatmul.mubr.msk.bf16.gmra.mrb[52].mxu0 %vm362_vm1, %v8025_v15 }
 0x292   : > { %v10223_v20 = vpop.f32.mrb[17].mxu1  ;;  %6476 = vmatprep.mubr.bf16.mxu0 %v8915_v4 }
 0x293   : > { %v10225_v22 = vpop.f32.mrb[18].mxu1 }
 0x294   : > { %v10232_v29 = vpop.f32.mrb[19].mxu1 }
 0x299   : > { %v10236_v37 = vpop.f32.mrb[20].mxu1  ;;  %8045 = vmatmul.mubr.msk.bf16.gmra.mrb[56].mxu0 %vm362_vm1, %v8026_v33 }
 0x29a   : > { %v10239_v38 = vpop.f32.mrb[21].mxu1  ;;  %6486 = vmatprep.mubr.bf16.mxu0 %v8915_v4 }
 0x29b   : > { %v10241_v41 = vpop.f32.mrb[22].mxu1 }
 0x29c   : > { %v10248_v46 = vpop.f32.mrb[23].mxu1 }
 0x2a1   : > { %v10250_v49 = vpop.f32.mrb[24].mxu1  ;;  %8046 = vmatmul.mubr.msk.bf16.gmra.mrb[60].mxu0 %vm362_vm1, %v8027_v24 }
 0x2a2   : > { %v10253_v50 = vpop.f32.mrb[25].mxu1 }
 0x2a3   : > { %v10255_v51 = vpop.f32.mrb[26].mxu1 }
 0x2a4   : > { %v10257_v52 = vpop.f32.mrb[27].mxu1 }
 0x2a9   : > { %v10259_v4 = vpop.f32.mrb[28].mxu1 }
 0x2aa   : > { %v10261_v53 = vpop.f32.mrb[29].mxu1 }
 0x2ab   : > { %v10263_v54 = vpop.f32.mrb[30].mxu1 }
 0x2ac   : > { %v10265_v42 = vpop.f32.mrb[31].mxu1 }
 0x2b1   : > { %v10267_v58 = vpop.f32.mrb[32].mxu1 }
 0x2b2   : > { %v10269_v59 = vpop.f32.mrb[33].mxu1 }
 0x2b3   : > { %v10271_v60 = vpop.f32.mrb[34].mxu1 }
 0x2b4   : > { %v10273_v62 = vpop.f32.mrb[35].mxu1 }
 0x2b9   : > { %v10275_v63 = vpop.f32.mrb[36].mxu1 }
 0x2ba   : > { %v10277_v0 = vpop.f32.mrb[37].mxu1 }
 0x2bb   : > { %v10279_v1 = vpop.f32.mrb[38].mxu1 }
 0x2bc   : > { %v10281_v2 = vpop.f32.mrb[39].mxu1 }
 0x2c1   : > { %v10283_v3 = vpop.f32.mrb[40].mxu1 }
 0x2c2   : > { %v10285_v5 = vpop.f32.mrb[41].mxu1 }
 0x2c3   : > { %v10287_v9 = vpop.f32.mrb[42].mxu1 }
 0x2c4   : > { %v10289_v10 = vpop.f32.mrb[43].mxu1 }
 0x2c9   : > { %v10291_v11 = vpop.f32.mrb[44].mxu1 }
 0x2ca   : > { %v10293_v13 = vpop.f32.mrb[45].mxu1 }
 0x2cb   : > { %v10295_v14 = vpop.f32.mrb[46].mxu1 }
 0x2cc   : > { %10609 = vst [vmem:[#allocation7_spill] sm:$0xff] %v10295_v14  ;;  %v10297_v15 = vpop.f32.mrb[47].mxu1 }
 0x2cd   : > { %10610 = vst [vmem:[#allocation8_spill] sm:$0xff] %v10297_v15 }
 0x2d1   : > { %v10299_v16 = vpop.f32.mrb[48].mxu1 }
 0x2d2   : > { %10611 = vst [vmem:[#allocation9_spill] sm:$0xff] %v10299_v16  ;;  %v10301_v17 = vpop.f32.mrb[49].mxu1 }
 0x2d3   : > { %10612 = vst [vmem:[#allocation10_spill] sm:$0xff] %v10301_v17  ;;  %v10303_v47 = vpop.f32.mrb[50].mxu1 }
 0x2d4   : > { %10613 = vst [vmem:[#allocation11_spill] sm:$0xff] %v10303_v47  ;;  %v10305_v18 = vpop.f32.mrb[51].mxu1 }
 0x2d5   : > { %10614 = vst [vmem:[#allocation12_spill] sm:$0xff] %v10305_v18 }
 0x2d9   : > { %v10307_v23 = vpop.f32.mrb[52].mxu1 }
 0x2da   : > { %10615 = vst [vmem:[#allocation13_spill] sm:$0xff] %v10307_v23  ;;  %v10309_v25 = vpop.f32.mrb[53].mxu1 }
 0x2db   : > { %10616 = vst [vmem:[#allocation14_spill] sm:$0xff] %v10309_v25  ;;  %v10311_v26 = vpop.f32.mrb[54].mxu1  ;;  %v6755_v25 = vlaneseq }
 0x2dc   : > { %10617 = vst [vmem:[#allocation15_spill] sm:$0xff] %v10311_v26  ;;  %v10313_v30 = vpop.f32.mrb[55].mxu1 }
 0x2dd   : > { %10618 = vst [vmem:[#allocation16_spill] sm:$0xff] %v10313_v30  ;;  %v6756_v26 = vshrl.u32 %v6755_v25, 7 }
 0x2df   : > { %v6757_v23 = vsub.s32 0, %v6756_v26 }
 0x2e1   : > { %v10315_v31 = vpop.f32.mrb[56].mxu1 }
 0x2e2   : > { %10619 = vst [vmem:[#allocation17_spill] sm:$0xff] %v10315_v31  ;;  %v10317_v33 = vpop.f32.mrb[57].mxu1  ;;  %v6753_v31 = vld [vmem:[%s10599_s2] sm:$0x3] }
 0x2e3   : > { %10620 = vst [vmem:[#allocation18_spill] sm:$0xff] %v10317_v33  ;;  %v10319_v34 = vpop.f32.mrb[58].mxu1  ;;  %v6761_v33 = vsub.s32 1, %v6756_v26  ;;  %v10334_v30 = vrot.slane %v6753_v31, %v6757_v23 }
 0x2e4   : > { %10621 = vst [vmem:[#allocation19_spill] sm:$0xff] %v10319_v34  ;;  %v10321_v35 = vpop.f32.mrb[59].mxu1 }
 0x2e5   : > { %10622 = vst [vmem:[#allocation20_spill] sm:$0xff] %v10321_v35  ;;  %v10336_v35 = vrot.slane %v6753_v31, %v6761_v33 }
 0x2e9   : > { %v10323_v36 = vpop.f32.mrb[60].mxu1 }
 0x2ea   : > { %10623 = vst [vmem:[#allocation21_spill] sm:$0xff] %v10323_v36  ;;  %v10325_v44 = vpop.f32.mrb[61].mxu1 }
 0x2eb   : > { %10624 = vst [vmem:[#allocation22_spill] sm:$0xff] %v10325_v44  ;;  %v10327_v45 = vpop.f32.mrb[62].mxu1 }
 0x2ec   : > { %10625 = vst [vmem:[#allocation23_spill] sm:$0xff] %v10327_v45  ;;  %v10329_v24 = vpop.f32.mrb[63].mxu1 }
 0x2ed   : > { %10626 = vst [vmem:[#allocation24_spill] sm:$0xff] %v10329_v24 }
 0x2fc   : > { %v6338_v34 = vpop.f32.mrb[0].mxu0 }
 0x2fd   : > { %v8182_v36 = vadd.f32 %v6338_v34, %v10152_v21  ;;  %v6340_v44 = vpop.f32.mrb[1].mxu0 }
 0x2fe   : > { %v8183_v45 = vadd.f32 %v6340_v44, %v10155_v27  ;;  %v6342_v18 = vpop.f32.mrb[2].mxu0 }
 0x2ff   : > { %v6765_v24 = vadd.f32 %v8182_v36, %v10334_v30  ;;  %v8184_v25 = vadd.f32 %v6342_v18, %v10157_v28  ;;  %v6344_v47 = vpop.f32.mrb[3].mxu0 }
 0x300   : > { %v6766_v17 = vadd.f32 %v8183_v45, %v10336_v35  ;;  %v8185_v26 = vadd.f32 %v6344_v47, %v10164_v32 }
 0x301   : > { %v6767_v23 = vadd.f32 %v8184_v25, %v10334_v30  ;;  %v6829_v33 = vmax.f32 %v6765_v24, 0.0 }
 0x302   : > { %v6768_v31 = vadd.f32 %v8185_v26, %v10336_v35  ;;  %v6830_v21 = vmax.f32 %v6766_v17, 0.0 }
 0x303   : > { %v6831_v16 = vmax.f32 %v6767_v23, 0.0 }
 0x304   : > { %v6832_v34 = vmax.f32 %v6768_v31, 0.0  ;;  %v6348_v15 = vpop.f32.mrb[4].mxu0 }
 0x305   : > { %v6893_v27 = vpack.c.bf16 %v6831_v16, %v6829_v33  ;;  %v8186_v44 = vadd.f32 %v6348_v15, %v10169_v39  ;;  %v6350_v36 = vpop.f32.mrb[5].mxu0 }
 0x306   : > { %v8187_v28 = vadd.f32 %v6350_v36, %v10172_v40  ;;  %v6352_v18 = vpop.f32.mrb[6].mxu0  ;;  %v6894_v14 = vpack.c.bf16 %v6832_v34, %v6830_v21 }
 0x307   : > { %v6769_v45 = vadd.f32 %v8186_v44, %v10334_v30  ;;  %v8188_v32 = vadd.f32 %v6352_v18, %v10174_v43  ;;  %v6354_v47 = vpop.f32.mrb[7].mxu0 }
 0x308   : > { %v6770_v25 = vadd.f32 %v8187_v28, %v10336_v35  ;;  %v8189_v24 = vadd.f32 %v6354_v47, %v10181_v48  ;;  %7156 = vmatprep.mubr.bf16.mxu1 %v6894_v14 }
 0x309   : > { %v6771_v17 = vadd.f32 %v8188_v32, %v10334_v30  ;;  %7157 = vmatmul.mubr.bf16.vlgmr.msra.gmra.mrb[64].mxu1 %v6893_v27  ;;  %v6833_v15 = vmax.f32 %v6769_v45, 0.0 }
 0x30a   : > { %v6772_v39 = vadd.f32 %v8189_v24, %v10336_v35  ;;  %v6834_v40 = vmax.f32 %v6770_v25, 0.0 }
 0x30b   : > { %v6835_v16 = vmax.f32 %v6771_v17, 0.0 }
 0x30c   : > { %v6836_v26 = vmax.f32 %v6772_v39, 0.0  ;;  %v6358_v23 = vpop.f32.mrb[8].mxu0 }
 0x30d   : > { %v8190_v31 = vadd.f32 %v6358_v23, %v10186_v55  ;;  %v6360_v33 = vpop.f32.mrb[9].mxu0  ;;  %v6895_v43 = vpack.c.bf16 %v6835_v16, %v6833_v15 }
 0x30e   : > { %v8191_v21 = vadd.f32 %v6360_v33, %v10189_v56  ;;  %v6362_v34 = vpop.f32.mrb[10].mxu0  ;;  %v6896_v44 = vpack.c.bf16 %v6836_v26, %v6834_v40 }
 0x30f   : > { %v6773_v48 = vadd.f32 %v8190_v31, %v10334_v30  ;;  %v8192_v14 = vadd.f32 %v6362_v34, %v10191_v57  ;;  %v6364_v27 = vpop.f32.mrb[11].mxu0 }
 0x310   : > { %v6774_v36 = vadd.f32 %v8191_v21, %v10336_v35  ;;  %v8193_v28 = vadd.f32 %v6364_v27, %v10198_v61  ;;  %7164 = vmatprep.mubr.bf16.mxu1 %v6896_v44 }
 0x311   : > { %v6775_v18 = vadd.f32 %v8192_v14, %v10334_v30  ;;  %7165 = vmatmul.mubr.bf16.gmra.mrb[68].mxu1 %v6895_v43  ;;  %v6837_v45 = vmax.f32 %v6773_v48, 0.0 }
 0x312   : > { %v6776_v55 = vadd.f32 %v8193_v28, %v10336_v35  ;;  %v6838_v56 = vmax.f32 %v6774_v36, 0.0 }
 0x313   : > { %v6839_v32 = vmax.f32 %v6775_v18, 0.0 }
 0x314   : > { %v6840_v47 = vmax.f32 %v6776_v55, 0.0  ;;  %v6368_v25 = vpop.f32.mrb[12].mxu0 }
 0x315   : > { %v8194_v24 = vadd.f32 %v6368_v25, %v10203_v6  ;;  %v6370_v17 = vpop.f32.mrb[13].mxu0  ;;  %v6897_v57 = vpack.c.bf16 %v6839_v32, %v6837_v45 }
 0x316   : > { %v8195_v39 = vadd.f32 %v6370_v17, %v10206_v7  ;;  %v6372_v15 = vpop.f32.mrb[14].mxu0  ;;  %v6898_v16 = vpack.c.bf16 %v6840_v47, %v6838_v56 }
 0x317   : > { %v6777_v61 = vadd.f32 %v8194_v24, %v10334_v30  ;;  %v8196_v40 = vadd.f32 %v6372_v15, %v10208_v8  ;;  %v6374_v26 = vpop.f32.mrb[15].mxu0 }
 0x318   : > { %v6778_v23 = vadd.f32 %v8195_v39, %v10336_v35  ;;  %v8197_v31 = vadd.f32 %v6374_v26, %v10215_v12  ;;  %7172 = vmatprep.mubr.bf16.mxu1 %v6898_v16 }
 0x319   : > { %v6779_v33 = vadd.f32 %v8196_v40, %v10334_v30  ;;  %7173 = vmatmul.mubr.bf16.gmra.mrb[72].mxu1 %v6897_v57  ;;  %v6841_v43 = vmax.f32 %v6777_v61, 0.0 }
 0x31a   : > { %v6780_v6 = vadd.f32 %v8197_v31, %v10336_v35  ;;  %v6842_v7 = vmax.f32 %v6778_v23, 0.0 }
 0x31b   : > { %v6843_v21 = vmax.f32 %v6779_v33, 0.0 }
 0x31c   : > { %v6844_v34 = vmax.f32 %v6780_v6, 0.0  ;;  %v6378_v44 = vpop.f32.mrb[16].mxu0 }
 0x31d   : > { %v8198_v48 = vadd.f32 %v6378_v44, %v10220_v19  ;;  %v6380_v14 = vpop.f32.mrb[17].mxu0  ;;  %v6899_v8 = vpack.c.bf16 %v6843_v21, %v6841_v43 }
 0x31e   : > { %v8199_v27 = vadd.f32 %v6380_v14, %v10223_v20  ;;  %v6382_v36 = vpop.f32.mrb[18].mxu0  ;;  %v6900_v28 = vpack.c.bf16 %v6844_v34, %v6842_v7 }
 0x31f   : > { %v6781_v12 = vadd.f32 %v8198_v48, %v10334_v30  ;;  %v8200_v18 = vadd.f32 %v6382_v36, %v10225_v22  ;;  %v6384_v55 = vpop.f32.mrb[19].mxu0 }
 0x320   : > { %v6782_v45 = vadd.f32 %v8199_v27, %v10336_v35  ;;  %v8201_v32 = vadd.f32 %v6384_v55, %v10232_v29  ;;  %7180 = vmatprep.mubr.bf16.mxu1 %v6900_v28 }
 0x321   : > { %v6783_v56 = vadd.f32 %v8200_v18, %v10334_v30  ;;  %7181 = vmatmul.mubr.bf16.gmra.mrb[76].mxu1 %v6899_v8  ;;  %v6845_v47 = vmax.f32 %v6781_v12, 0.0 }
 0x322   : > { %v6784_v19 = vadd.f32 %v8201_v32, %v10336_v35  ;;  %v6846_v20 = vmax.f32 %v6782_v45, 0.0 }
 0x323   : > { %v6847_v25 = vmax.f32 %v6783_v56, 0.0 }
 0x324   : > { %v6848_v24 = vmax.f32 %v6784_v19, 0.0  ;;  %v6388_v17 = vpop.f32.mrb[20].mxu0 }
 0x325   : > { %v8202_v57 = vadd.f32 %v6388_v17, %v10236_v37  ;;  %v6390_v39 = vpop.f32.mrb[21].mxu0  ;;  %v6901_v22 = vpack.c.bf16 %v6847_v25, %v6845_v47 }
 0x326   : > { %v8203_v15 = vadd.f32 %v6390_v39, %v10239_v38  ;;  %v6392_v16 = vpop.f32.mrb[22].mxu0  ;;  %v6902_v61 = vpack.c.bf16 %v6848_v24, %v6846_v20 }
 0x327   : > { %v6785_v29 = vadd.f32 %v8202_v57, %v10334_v30  ;;  %v8204_v40 = vadd.f32 %v6392_v16, %v10241_v41  ;;  %v6394_v26 = vpop.f32.mrb[23].mxu0 }
 0x328   : > { %v6786_v23 = vadd.f32 %v8203_v15, %v10336_v35  ;;  %v8205_v31 = vadd.f32 %v6394_v26, %v10248_v46  ;;  %7188 = vmatprep.mubr.bf16.mxu1 %v6902_v61 }
 0x329   : > { %v6787_v33 = vadd.f32 %v8204_v40, %v10334_v30  ;;  %7189 = vmatmul.mubr.bf16.gmra.mrb[80].mxu1 %v6901_v22  ;;  %v6849_v6 = vmax.f32 %v6785_v29, 0.0 }
 0x32a   : > { %v6788_v37 = vadd.f32 %v8205_v31, %v10336_v35  ;;  %v6850_v38 = vmax.f32 %v6786_v23, 0.0 }
 0x32b   : > { %v6851_v43 = vmax.f32 %v6787_v33, 0.0 }
 0x32c   : > { %v6852_v21 = vmax.f32 %v6788_v37, 0.0  ;;  %v6398_v7 = vpop.f32.mrb[24].mxu0 }
 0x32d   : > { %v8206_v34 = vadd.f32 %v6398_v7, %v10250_v49  ;;  %v6400_v44 = vpop.f32.mrb[25].mxu0  ;;  %v6903_v41 = vpack.c.bf16 %v6851_v43, %v6849_v6 }
 0x32e   : > { %v8207_v48 = vadd.f32 %v6400_v44, %v10253_v50  ;;  %v6402_v14 = vpop.f32.mrb[26].mxu0  ;;  %v6904_v8 = vpack.c.bf16 %v6852_v21, %v6850_v38 }
 0x32f   : > { %v6789_v46 = vadd.f32 %v8206_v34, %v10334_v30  ;;  %v8208_v27 = vadd.f32 %v6402_v14, %v10255_v51  ;;  %v6404_v36 = vpop.f32.mrb[27].mxu0 }
 0x330   : > { %v6790_v28 = vadd.f32 %v8207_v48, %v10336_v35  ;;  %v8209_v12 = vadd.f32 %v6404_v36, %v10257_v52  ;;  %7196 = vmatprep.mubr.bf16.mxu1 %v6904_v8 }
 0x331   : > { %v6791_v18 = vadd.f32 %v8208_v27, %v10334_v30  ;;  %7197 = vmatmul.mubr.bf16.gmra.mrb[84].mxu1 %v6903_v41  ;;  %v6853_v55 = vmax.f32 %v6789_v46, 0.0 }
 0x332   : > { %v6792_v49 = vadd.f32 %v8209_v12, %v10336_v35  ;;  %v6854_v50 = vmax.f32 %v6790_v28, 0.0 }
 0x333   : > { %v6855_v45 = vmax.f32 %v6791_v18, 0.0 }
 0x334   : > { %v6856_v32 = vmax.f32 %v6792_v49, 0.0  ;;  %v6408_v56 = vpop.f32.mrb[28].mxu0 }
 0x335   : > { %v8210_v19 = vadd.f32 %v6408_v56, %v10259_v4  ;;  %v6410_v47 = vpop.f32.mrb[29].mxu0  ;;  %v6905_v51 = vpack.c.bf16 %v6855_v45, %v6853_v55 }
 0x336   : > { %v8211_v25 = vadd.f32 %v6410_v47, %v10261_v53  ;;  %v6412_v20 = vpop.f32.mrb[30].mxu0  ;;  %v6906_v24 = vpack.c.bf16 %v6856_v32, %v6854_v50 }
 0x337   : > { %v6793_v52 = vadd.f32 %v8210_v19, %v10334_v30  ;;  %v8212_v17 = vadd.f32 %v6412_v20, %v10263_v54  ;;  %v6414_v57 = vpop.f32.mrb[31].mxu0 }
 0x338   : > { %v6794_v39 = vadd.f32 %v8211_v25, %v10336_v35  ;;  %v8213_v22 = vadd.f32 %v6414_v57, %v10265_v42  ;;  %7204 = vmatprep.mubr.bf16.mxu1 %v6906_v24 }
 0x339   : > { %v6795_v15 = vadd.f32 %v8212_v17, %v10334_v30  ;;  %7205 = vmatmul.mubr.bf16.gmra.mrb[88].mxu1 %v6905_v51  ;;  %v6857_v16 = vmax.f32 %v6793_v52, 0.0 }
 0x33a   : > { %v6796_v4 = vadd.f32 %v8213_v22, %v10336_v35  ;;  %v6858_v53 = vmax.f32 %v6794_v39, 0.0 }
 0x33b   : > { %v6859_v61 = vmax.f32 %v6795_v15, 0.0 }
 0x33c   : > { %v6860_v29 = vmax.f32 %v6796_v4, 0.0  ;;  %v6418_v40 = vpop.f32.mrb[32].mxu0 }
 0x33d   : > { %v8214_v26 = vadd.f32 %v6418_v40, %v10267_v58  ;;  %v6420_v23 = vpop.f32.mrb[33].mxu0  ;;  %v6907_v54 = vpack.c.bf16 %v6859_v61, %v6857_v16 }
 0x33e   : > { %v8215_v31 = vadd.f32 %v6420_v23, %v10269_v59  ;;  %v6422_v33 = vpop.f32.mrb[34].mxu0  ;;  %v6908_v37 = vpack.c.bf16 %v6860_v29, %v6858_v53  ;;  %v10627_v23 = vld [vmem:[#allocation7_spill] sm:$0xff] }
 0x33f   : > { %v6797_v42 = vadd.f32 %v8214_v26, %v10334_v30  ;;  %v8216_v6 = vadd.f32 %v6422_v33, %v10271_v60  ;;  %v6424_v43 = vpop.f32.mrb[35].mxu0 }
 0x340   : > { %v6798_v38 = vadd.f32 %v8215_v31, %v10336_v35  ;;  %v8217_v21 = vadd.f32 %v6424_v43, %v10273_v62  ;;  %7212 = vmatprep.mubr.bf16.mxu1 %v6908_v37  ;;  %v10628_v37 = vld [vmem:[#allocation8_spill] sm:$0xff] }
 0x341   : > { %v6799_v7 = vadd.f32 %v8216_v6, %v10334_v30  ;;  %7213 = vmatmul.mubr.bf16.gmra.mrb[92].mxu1 %v6907_v54  ;;  %v6861_v34 = vmax.f32 %v6797_v42, 0.0 }
 0x342   : > { %v6800_v58 = vadd.f32 %v8217_v21, %v10336_v35  ;;  %v6862_v59 = vmax.f32 %v6798_v38, 0.0 }
 0x343   : > { %v6863_v44 = vmax.f32 %v6799_v7, 0.0 }
 0x344   : > { %v6864_v41 = vmax.f32 %v6800_v58, 0.0  ;;  %v6428_v48 = vpop.f32.mrb[36].mxu0  ;;  %v10629_v58 = vld [vmem:[#allocation9_spill] sm:$0xff] }
 0x345   : > { %v8218_v14 = vadd.f32 %v6428_v48, %v10275_v63  ;;  %v6430_v8 = vpop.f32.mrb[37].mxu0  ;;  %v6909_v60 = vpack.c.bf16 %v6863_v44, %v6861_v34 }
 0x346   : > { %v8219_v46 = vadd.f32 %v6430_v8, %v10277_v0  ;;  %v6432_v27 = vpop.f32.mrb[38].mxu0  ;;  %v6910_v36 = vpack.c.bf16 %v6864_v41, %v6862_v59  ;;  %v10630_v41 = vld [vmem:[#allocation10_spill] sm:$0xff] }
 0x347   : > { %v6801_v62 = vadd.f32 %v8218_v14, %v10334_v30  ;;  %v8220_v28 = vadd.f32 %v6432_v27, %v10279_v1  ;;  %v6434_v12 = vpop.f32.mrb[39].mxu0 }
 0x348   : > { %v6802_v18 = vadd.f32 %v8219_v46, %v10336_v35  ;;  %v8221_v49 = vadd.f32 %v6434_v12, %v10281_v2  ;;  %7220 = vmatprep.mubr.bf16.mxu1 %v6910_v36  ;;  %v10631_v46 = vld [vmem:[#allocation11_spill] sm:$0xff] }
 0x349   : > { %v6803_v55 = vadd.f32 %v8220_v28, %v10334_v30  ;;  %7221 = vmatmul.mubr.bf16.gmra.mrb[96].mxu1 %v6909_v60  ;;  %v6865_v45 = vmax.f32 %v6801_v62, 0.0  ;;  %v10632_v28 = vld [vmem:[#allocation12_spill] sm:$0xff] }
 0x34a   : > { %v6804_v63 = vadd.f32 %v8221_v49, %v10336_v35  ;;  %v6866_v0 = vmax.f32 %v6802_v18, 0.0 }
 0x34b   : > { %v6867_v50 = vmax.f32 %v6803_v55, 0.0 }
 0x34c   : > { %v6868_v32 = vmax.f32 %v6804_v63, 0.0  ;;  %v6438_v56 = vpop.f32.mrb[40].mxu0 }
 0x34d   : > { %v8222_v19 = vadd.f32 %v6438_v56, %v10283_v3  ;;  %v6440_v47 = vpop.f32.mrb[41].mxu0  ;;  %v6911_v1 = vpack.c.bf16 %v6867_v50, %v6865_v45 }
 0x34e   : > { %v8223_v51 = vadd.f32 %v6440_v47, %v10285_v5  ;;  %v6442_v25 = vpop.f32.mrb[42].mxu0  ;;  %v6912_v20 = vpack.c.bf16 %v6868_v32, %v6866_v0  ;;  %v10633_v32 = vld [vmem:[#allocation13_spill] sm:$0xff] }
 0x34f   : > { %v6805_v2 = vadd.f32 %v8222_v19, %v10334_v30  ;;  %v8224_v24 = vadd.f32 %v6442_v25, %v10287_v9  ;;  %v6444_v52 = vpop.f32.mrb[43].mxu0 }
 0x350   : > { %v6806_v17 = vadd.f32 %v8223_v51, %v10336_v35  ;;  %v8225_v57 = vadd.f32 %v6444_v52, %v10289_v10  ;;  %7228 = vmatprep.mubr.bf16.mxu1 %v6912_v20 }
 0x351   : > { %v6807_v39 = vadd.f32 %v8224_v24, %v10334_v30  ;;  %7229 = vmatmul.mubr.bf16.gmra.mrb[100].mxu1 %v6911_v1  ;;  %v6869_v22 = vmax.f32 %v6805_v2, 0.0  ;;  %v10634_v1 = vld [vmem:[#allocation14_spill] sm:$0xff]  ;;  %v10635_v24 = vld [vmem:[#allocation15_spill] sm:$0xff] }
 0x352   : > { %v6808_v3 = vadd.f32 %v8225_v57, %v10336_v35  ;;  %v6870_v5 = vmax.f32 %v6806_v17, 0.0 }
 0x353   : > { %v6871_v15 = vmax.f32 %v6807_v39, 0.0  ;;  %v10636_v39 = vld [vmem:[#allocation16_spill] sm:$0xff] }
 0x354   : > { %v6872_v4 = vmax.f32 %v6808_v3, 0.0  ;;  %v6448_v16 = vpop.f32.mrb[44].mxu0 }
 0x355   : > { %v8226_v61 = vadd.f32 %v6448_v16, %v10291_v11  ;;  %v6450_v53 = vpop.f32.mrb[45].mxu0  ;;  %v6913_v9 = vpack.c.bf16 %v6871_v15, %v6869_v22 }
 0x356   : > { %v8227_v29 = vadd.f32 %v6450_v53, %v10293_v13  ;;  %v6452_v40 = vpop.f32.mrb[46].mxu0  ;;  %v6914_v26 = vpack.c.bf16 %v6872_v4, %v6870_v5 }
 0x357   : > { %v6809_v10 = vadd.f32 %v8226_v61, %v10334_v30  ;;  %v8228_v54 = vadd.f32 %v6452_v40, %v10627_v23  ;;  %v6454_v31 = vpop.f32.mrb[47].mxu0 }
 0x358   : > { %v6810_v33 = vadd.f32 %v8227_v29, %v10336_v35  ;;  %v8229_v42 = vadd.f32 %v6454_v31, %v10628_v37  ;;  %7236 = vmatprep.mubr.bf16.mxu1 %v6914_v26  ;;  %v10639_v37 = vld [vmem:[#allocation19_spill] sm:$0xff] }
 0x359   : > { %v6811_v6 = vadd.f32 %v8228_v54, %v10334_v30  ;;  %7237 = vmatmul.mubr.bf16.gmra.mrb[104].mxu1 %v6913_v9  ;;  %v6873_v43 = vmax.f32 %v6809_v10, 0.0  ;;  %v10637_v9 = vld [vmem:[#allocation17_spill] sm:$0xff]  ;;  %v10638_v10 = vld [vmem:[#allocation18_spill] sm:$0xff] }
 0x35a   : > { %v6812_v11 = vadd.f32 %v8229_v42, %v10336_v35  ;;  %v6874_v13 = vmax.f32 %v6810_v33, 0.0 }
 0x35b   : > { %v6875_v38 = vmax.f32 %v6811_v6, 0.0 }
 0x35c   : > { %v6876_v21 = vmax.f32 %v6812_v11, 0.0  ;;  %v6458_v7 = vpop.f32.mrb[48].mxu0 }
 0x35d   : > { %v8230_v34 = vadd.f32 %v6458_v7, %v10629_v58  ;;  %v6460_v44 = vpop.f32.mrb[49].mxu0  ;;  %v6915_v59 = vpack.c.bf16 %v6875_v38, %v6873_v43  ;;  %v10640_v43 = vld [vmem:[#allocation20_spill] sm:$0xff] }
 0x35e   : > { %v8231_v48 = vadd.f32 %v6460_v44, %v10630_v41  ;;  %v6462_v14 = vpop.f32.mrb[50].mxu0  ;;  %v6916_v8 = vpack.c.bf16 %v6876_v21, %v6874_v13  ;;  %v10641_v41 = vld [vmem:[#allocation21_spill] sm:$0xff] }
 0x35f   : > { %v6813_v60 = vadd.f32 %v8230_v34, %v10334_v30  ;;  %v8232_v27 = vadd.f32 %v6462_v14, %v10631_v46  ;;  %v6464_v36 = vpop.f32.mrb[51].mxu0 }
 0x360   : > { %v6814_v62 = vadd.f32 %v8231_v48, %v10336_v35  ;;  %v8233_v12 = vadd.f32 %v6464_v36, %v10632_v28  ;;  %7244 = vmatprep.mubr.bf16.mxu1 %v6916_v8  ;;  %v10643_v28 = vld [vmem:[#allocation23_spill] sm:$0xff] }
 0x361   : > { %v6815_v18 = vadd.f32 %v8232_v27, %v10334_v30  ;;  %7245 = vmatmul.mubr.bf16.gmra.mrb[108].mxu1 %v6915_v59  ;;  %v6877_v55 = vmax.f32 %v6813_v60, 0.0  ;;  %v10642_v60 = vld [vmem:[#allocation22_spill] sm:$0xff] }
 0x362   : > { %v6816_v49 = vadd.f32 %v8233_v12, %v10336_v35  ;;  %v6878_v45 = vmax.f32 %v6814_v62, 0.0 }
 0x363   : > { %v6879_v63 = vmax.f32 %v6815_v18, 0.0 }
 0x364   : > { %v6880_v50 = vmax.f32 %v6816_v49, 0.0  ;;  %v6468_v0 = vpop.f32.mrb[52].mxu0 }
 0x365   : > { %v8234_v56 = vadd.f32 %v6468_v0, %v10633_v32  ;;  %v6470_v19 = vpop.f32.mrb[53].mxu0  ;;  %v6917_v47 = vpack.c.bf16 %v6879_v63, %v6877_v55  ;;  %v10644_v55 = vld [vmem:[#allocation24_spill] sm:$0xff] }
 0x366   : > { %v8235_v51 = vadd.f32 %v6470_v19, %v10634_v1  ;;  %v6472_v25 = vpop.f32.mrb[54].mxu0  ;;  %v6918_v20 = vpack.c.bf16 %v6880_v50, %v6878_v45 }
 0x367   : > { %v6817_v2 = vadd.f32 %v8234_v56, %v10334_v30  ;;  %v8236_v52 = vadd.f32 %v6472_v25, %v10635_v24  ;;  %v6474_v17 = vpop.f32.mrb[55].mxu0  ;;  %v10472_v25 = vld [vmem:[%s10601_s4] ss:$0 sm:$0xff] }
 0x368   : > { %v6818_v57 = vadd.f32 %v8235_v51, %v10336_v35  ;;  %v8237_v3 = vadd.f32 %v6474_v17, %v10636_v39  ;;  %7252 = vmatprep.mubr.bf16.mxu1 %v6918_v20 }
 0x369   : > { %v6819_v22 = vadd.f32 %v8236_v52, %v10334_v30  ;;  %7253 = vmatmul.mubr.bf16.gmra.mrb[112].mxu1 %v6917_v47  ;;  %v6881_v5 = vmax.f32 %v6817_v2, 0.0 }
 0x36a   : > { %v6820_v15 = vadd.f32 %v8237_v3, %v10336_v35  ;;  %v6882_v16 = vmax.f32 %v6818_v57, 0.0 }
 0x36b   : > { %v6883_v4 = vmax.f32 %v6819_v22, 0.0 }
 0x36c   : > { %v6884_v61 = vmax.f32 %v6820_v15, 0.0  ;;  %v6478_v53 = vpop.f32.mrb[56].mxu0 }
 0x36d   : > { %v8238_v29 = vadd.f32 %v6478_v53, %v10637_v9  ;;  %v6480_v40 = vpop.f32.mrb[57].mxu0  ;;  %v6919_v26 = vpack.c.bf16 %v6883_v4, %v6881_v5 }
 0x36e   : > { %v8239_v23 = vadd.f32 %v6480_v40, %v10638_v10  ;;  %v6482_v54 = vpop.f32.mrb[58].mxu0  ;;  %v6920_v31 = vpack.c.bf16 %v6884_v61, %v6882_v16 }
 0x36f   : > { %v6821_v33 = vadd.f32 %v8238_v29, %v10334_v30  ;;  %v8240_v42 = vadd.f32 %v6482_v54, %v10639_v37  ;;  %v6484_v6 = vpop.f32.mrb[59].mxu0 }
 0x370   : > { %v6822_v11 = vadd.f32 %v8239_v23, %v10336_v35  ;;  %v8241_v38 = vadd.f32 %v6484_v6, %v10640_v43  ;;  %7260 = vmatprep.mubr.bf16.mxu1 %v6920_v31 }
 0x371   : > { %v6823_v13 = vadd.f32 %v8240_v42, %v10334_v30  ;;  %7261 = vmatmul.mubr.bf16.gmra.mrb[116].mxu1 %v6919_v26  ;;  %v6885_v7 = vmax.f32 %v6821_v33, 0.0 }
 0x372   : > { %v6824_v21 = vadd.f32 %v8241_v38, %v10336_v35  ;;  %v6886_v34 = vmax.f32 %v6822_v11, 0.0 }
 0x373   : > { %v6887_v58 = vmax.f32 %v6823_v13, 0.0 }
 0x374   : > { %v6888_v44 = vmax.f32 %v6824_v21, 0.0  ;;  %v6488_v59 = vpop.f32.mrb[60].mxu0 }
 0x375   : > { %v8242_v48 = vadd.f32 %v6488_v59, %v10641_v41  ;;  %v6490_v14 = vpop.f32.mrb[61].mxu0  ;;  %v6921_v8 = vpack.c.bf16 %v6887_v58, %v6885_v7 }
 0x376   : > { %v8243_v46 = vadd.f32 %v6490_v14, %v10642_v60  ;;  %v6492_v27 = vpop.f32.mrb[62].mxu0  ;;  %v6922_v36 = vpack.c.bf16 %v6888_v44, %v6886_v34 }
 0x377   : > { %v6825_v62 = vadd.f32 %v8242_v48, %v10334_v30  ;;  %v8244_v12 = vadd.f32 %v6492_v27, %v10643_v28  ;;  %v6494_v18 = vpop.f32.mrb[63].mxu0 }
 0x378   : > { %v6826_v49 = vadd.f32 %v8243_v46, %v10336_v35  ;;  %v8245_v63 = vadd.f32 %v6494_v18, %v10644_v55  ;;  %7268 = vmatprep.mubr.bf16.mxu1 %v6922_v36 }
 0x379   : > { %v6827_v45 = vadd.f32 %v8244_v12, %v10334_v30  ;;  %7269 = vmatmul.mubr.bf16.gmra.mrb[120].mxu1 %v6921_v8  ;;  %v6889_v0 = vmax.f32 %v6825_v62, 0.0 }
 0x37a   : > { %v6828_v50 = vadd.f32 %v8245_v63, %v10336_v35  ;;  %v6890_v56 = vmax.f32 %v6826_v49, 0.0 }
 0x37b   : > { %v6891_v32 = vmax.f32 %v6827_v45, 0.0 }
 0x37c   : > { %v6892_v19 = vmax.f32 %v6828_v50, 0.0 }
 0x37d   : > { %v6923_v47 = vpack.c.bf16 %v6891_v32, %v6889_v0 }
 0x37e   : > { %v6924_v1 = vpack.c.bf16 %v6892_v19, %v6890_v56 }
 0x380   : > { %7276 = vmatprep.mubr.bf16.mxu1 %v6924_v1 }
 0x381   : > { %7277 = vmatmul.mubr.bf16.gmra.mrb[124].mxu1 %v6923_v47 }
 0x3dc   : > { %v8086_v51 = vpop.f32.mrb[64].mxu1 }
 0x3dd   : > { %v8087_v30 = vpop.f32.mrb[65].mxu1 }
 0x3de   : > { %v8088_v20 = vadd.f32 %v8087_v30, %v8086_v51  ;;  %v8089_v35 = vpop.f32.mrb[66].mxu1 }
 0x3df   : > { %v8090_v2 = vpop.f32.mrb[67].mxu1 }
 0x3e0   : > { %v7159_v24 = vadd.f32 %v8088_v20, %v10472_v25  ;;  %v8091_v52 = vadd.f32 %v8090_v2, %v8089_v35 }
 0x3e2   : > { %7285 = vst [vmem:[%s10475_s10] sm:$0xff] %v7159_v24  ;;  %v7162_v17 = vadd.f32 %v8091_v52, %v10472_v25 }
 0x3e4   : > { %7286 = vst [vmem:[%s10475_s10 + $0x8] sm:$0xff] %v7162_v17  ;;  %v8092_v57 = vpop.f32.mrb[68].mxu1 }
 0x3e5   : > { %v8093_v39 = vpop.f32.mrb[69].mxu1 }
 0x3e6   : > { %v8094_v3 = vadd.f32 %v8093_v39, %v8092_v57  ;;  %v8095_v22 = vpop.f32.mrb[70].mxu1 }
 0x3e7   : > { %v8096_v15 = vpop.f32.mrb[71].mxu1 }
 0x3e8   : > { %v7167_v5 = vadd.f32 %v8094_v3, %v10472_v25  ;;  %v8097_v4 = vadd.f32 %v8096_v15, %v8095_v22 }
 0x3ea   : > { %7287 = vst [vmem:[%s10475_s10 + $0x10] sm:$0xff] %v7167_v5  ;;  %v7170_v16 = vadd.f32 %v8097_v4, %v10472_v25 }
 0x3ec   : > { %7288 = vst [vmem:[%s10475_s10 + $0x18] sm:$0xff] %v7170_v16  ;;  %v8098_v61 = vpop.f32.mrb[72].mxu1 }
 0x3ed   : > { %v8099_v53 = vpop.f32.mrb[73].mxu1 }
 0x3ee   : > { %v8100_v9 = vadd.f32 %v8099_v53, %v8098_v61  ;;  %v8101_v29 = vpop.f32.mrb[74].mxu1 }
 0x3ef   : > { %v8102_v40 = vpop.f32.mrb[75].mxu1 }
 0x3f0   : > { %v7175_v26 = vadd.f32 %v8100_v9, %v10472_v25  ;;  %v8103_v10 = vadd.f32 %v8102_v40, %v8101_v29 }
 0x3f2   : > { %7289 = vst [vmem:[%s10475_s10 + $0x20] sm:$0xff] %v7175_v26  ;;  %v7178_v23 = vadd.f32 %v8103_v10, %v10472_v25 }
 0x3f4   : > { %7290 = vst [vmem:[%s10475_s10 + $0x28] sm:$0xff] %v7178_v23  ;;  %v8104_v54 = vpop.f32.mrb[76].mxu1 }
 0x3f5   : > { %v8105_v31 = vpop.f32.mrb[77].mxu1 }
 0x3f6   : > { %v8106_v33 = vadd.f32 %v8105_v31, %v8104_v54  ;;  %v8107_v37 = vpop.f32.mrb[78].mxu1 }
 0x3f7   : > { %v8108_v42 = vpop.f32.mrb[79].mxu1 }
 0x3f8   : > { %v7183_v6 = vadd.f32 %v8106_v33, %v10472_v25  ;;  %v8109_v11 = vadd.f32 %v8108_v42, %v8107_v37 }
 0x3fa   : > { %7291 = vst [vmem:[%s10475_s10 + $0x30] sm:$0xff] %v7183_v6  ;;  %v7186_v43 = vadd.f32 %v8109_v11, %v10472_v25 }
 0x3fc   : > { %7292 = vst [vmem:[%s10475_s10 + $0x38] sm:$0xff] %v7186_v43  ;;  %v8110_v38 = vpop.f32.mrb[80].mxu1 }
 0x3fd   : > { %v8111_v13 = vpop.f32.mrb[81].mxu1 }
 0x3fe   : > { %v8112_v21 = vadd.f32 %v8111_v13, %v8110_v38  ;;  %v8113_v7 = vpop.f32.mrb[82].mxu1 }
 0x3ff   : > { %v8114_v58 = vpop.f32.mrb[83].mxu1 }
 0x400   : > { %v7191_v34 = vadd.f32 %v8112_v21, %v10472_v25  ;;  %v8115_v44 = vadd.f32 %v8114_v58, %v8113_v7 }
 0x402   : > { %7293 = vst [vmem:[%s10475_s10 + $0x40] sm:$0xff] %v7191_v34  ;;  %v7194_v59 = vadd.f32 %v8115_v44, %v10472_v25 }
 0x404   : > { %7294 = vst [vmem:[%s10475_s10 + $0x48] sm:$0xff] %v7194_v59  ;;  %v8116_v41 = vpop.f32.mrb[84].mxu1 }
 0x405   : > { %v8117_v48 = vpop.f32.mrb[85].mxu1 }
 0x406   : > { %v8118_v14 = vadd.f32 %v8117_v48, %v8116_v41  ;;  %v8119_v8 = vpop.f32.mrb[86].mxu1 }
 0x407   : > { %v8120_v60 = vpop.f32.mrb[87].mxu1 }
 0x408   : > { %v7199_v46 = vadd.f32 %v8118_v14, %v10472_v25  ;;  %v8121_v27 = vadd.f32 %v8120_v60, %v8119_v8 }
 0x40a   : > { %7295 = vst [vmem:[%s10475_s10 + $0x50] sm:$0xff] %v7199_v46  ;;  %v7202_v36 = vadd.f32 %v8121_v27, %v10472_v25 }
 0x40c   : > { %7296 = vst [vmem:[%s10475_s10 + $0x58] sm:$0xff] %v7202_v36  ;;  %v8122_v62 = vpop.f32.mrb[88].mxu1 }
 0x40d   : > { %v8123_v28 = vpop.f32.mrb[89].mxu1 }
 0x40e   : > { %v8124_v12 = vadd.f32 %v8123_v28, %v8122_v62  ;;  %v8125_v18 = vpop.f32.mrb[90].mxu1 }
 0x40f   : > { %v8126_v49 = vpop.f32.mrb[91].mxu1 }
 0x410   : > { %v7207_v55 = vadd.f32 %v8124_v12, %v10472_v25  ;;  %v8127_v63 = vadd.f32 %v8126_v49, %v8125_v18 }
 0x412   : > { %7297 = vst [vmem:[%s10475_s10 + $0x60] sm:$0xff] %v7207_v55  ;;  %v7210_v45 = vadd.f32 %v8127_v63, %v10472_v25 }
 0x414   : > { %7298 = vst [vmem:[%s10475_s10 + $0x68] sm:$0xff] %v7210_v45  ;;  %v8128_v50 = vpop.f32.mrb[92].mxu1 }
 0x415   : > { %v8129_v0 = vpop.f32.mrb[93].mxu1 }
 0x416   : > { %v8130_v32 = vadd.f32 %v8129_v0, %v8128_v50  ;;  %v8131_v56 = vpop.f32.mrb[94].mxu1 }
 0x417   : > { %v8132_v19 = vpop.f32.mrb[95].mxu1 }
 0x418   : > { %v7215_v47 = vadd.f32 %v8130_v32, %v10472_v25  ;;  %v8133_v1 = vadd.f32 %v8132_v19, %v8131_v56 }
 0x41a   : > { %7299 = vst [vmem:[%s10475_s10 + $0x70] sm:$0xff] %v7215_v47  ;;  %v7218_v51 = vadd.f32 %v8133_v1, %v10472_v25 }
 0x41c   : > { %7300 = vst [vmem:[%s10475_s10 + $0x78] sm:$0xff] %v7218_v51  ;;  %v8134_v30 = vpop.f32.mrb[96].mxu1 }
 0x41d   : > { %v8135_v20 = vpop.f32.mrb[97].mxu1 }
 0x41e   : > { %v8136_v35 = vadd.f32 %v8135_v20, %v8134_v30  ;;  %v8137_v2 = vpop.f32.mrb[98].mxu1 }
 0x41f   : > { %v8138_v24 = vpop.f32.mrb[99].mxu1 }
 0x420   : > { %v7223_v52 = vadd.f32 %v8136_v35, %v10472_v25  ;;  %v8139_v17 = vadd.f32 %v8138_v24, %v8137_v2 }
 0x422   : > { %7301 = vst [vmem:[%s10475_s10 + $0x80] sm:$0xff] %v7223_v52  ;;  %v7226_v57 = vadd.f32 %v8139_v17, %v10472_v25 }
 0x424   : > { %7302 = vst [vmem:[%s10475_s10 + $0x88] sm:$0xff] %v7226_v57  ;;  %v8140_v39 = vpop.f32.mrb[100].mxu1 }
 0x425   : > { %v8141_v3 = vpop.f32.mrb[101].mxu1 }
 0x426   : > { %v8142_v22 = vadd.f32 %v8141_v3, %v8140_v39  ;;  %v8143_v15 = vpop.f32.mrb[102].mxu1 }
 0x427   : > { %v8144_v5 = vpop.f32.mrb[103].mxu1 }
 0x428   : > { %v7231_v4 = vadd.f32 %v8142_v22, %v10472_v25  ;;  %v8145_v16 = vadd.f32 %v8144_v5, %v8143_v15 }
 0x42a   : > { %7303 = vst [vmem:[%s10475_s10 + $0x90] sm:$0xff] %v7231_v4  ;;  %v7234_v61 = vadd.f32 %v8145_v16, %v10472_v25 }
 0x42c   : > { %7304 = vst [vmem:[%s10475_s10 + $0x98] sm:$0xff] %v7234_v61  ;;  %v8146_v53 = vpop.f32.mrb[104].mxu1 }
 0x42d   : > { %v8147_v9 = vpop.f32.mrb[105].mxu1 }
 0x42e   : > { %v8148_v29 = vadd.f32 %v8147_v9, %v8146_v53  ;;  %v8149_v40 = vpop.f32.mrb[106].mxu1 }
 0x42f   : > { %v8150_v26 = vpop.f32.mrb[107].mxu1 }
 0x430   : > { %v7239_v10 = vadd.f32 %v8148_v29, %v10472_v25  ;;  %v8151_v23 = vadd.f32 %v8150_v26, %v8149_v40 }
 0x432   : > { %7305 = vst [vmem:[%s10475_s10 + $0xa0] sm:$0xff] %v7239_v10  ;;  %v7242_v54 = vadd.f32 %v8151_v23, %v10472_v25 }
 0x434   : > { %7306 = vst [vmem:[%s10475_s10 + $0xa8] sm:$0xff] %v7242_v54  ;;  %v8152_v31 = vpop.f32.mrb[108].mxu1 }
 0x435   : > { %v8153_v33 = vpop.f32.mrb[109].mxu1 }
 0x436   : > { %v8154_v37 = vadd.f32 %v8153_v33, %v8152_v31  ;;  %v8155_v42 = vpop.f32.mrb[110].mxu1 }
 0x437   : > { %v8156_v6 = vpop.f32.mrb[111].mxu1 }
 0x438   : > { %v7247_v11 = vadd.f32 %v8154_v37, %v10472_v25  ;;  %v8157_v43 = vadd.f32 %v8156_v6, %v8155_v42 }
 0x43a   : > { %7307 = vst [vmem:[%s10475_s10 + $0xb0] sm:$0xff] %v7247_v11  ;;  %v7250_v38 = vadd.f32 %v8157_v43, %v10472_v25 }
 0x43c   : > { %7308 = vst [vmem:[%s10475_s10 + $0xb8] sm:$0xff] %v7250_v38  ;;  %v8158_v13 = vpop.f32.mrb[112].mxu1 }
 0x43d   : > { %v8159_v21 = vpop.f32.mrb[113].mxu1 }
 0x43e   : > { %v8160_v7 = vadd.f32 %v8159_v21, %v8158_v13  ;;  %v8161_v58 = vpop.f32.mrb[114].mxu1 }
 0x43f   : > { %v8162_v34 = vpop.f32.mrb[115].mxu1 }
 0x440   : > { %v7255_v44 = vadd.f32 %v8160_v7, %v10472_v25  ;;  %v8163_v59 = vadd.f32 %v8162_v34, %v8161_v58 }
 0x442   : > { %7309 = vst [vmem:[%s10475_s10 + $0xc0] sm:$0xff] %v7255_v44  ;;  %v7258_v41 = vadd.f32 %v8163_v59, %v10472_v25 }
 0x444   : > { %7310 = vst [vmem:[%s10475_s10 + $0xc8] sm:$0xff] %v7258_v41  ;;  %v8164_v48 = vpop.f32.mrb[116].mxu1 }
 0x445   : > { %v8165_v14 = vpop.f32.mrb[117].mxu1 }
 0x446   : > { %v8166_v8 = vadd.f32 %v8165_v14, %v8164_v48  ;;  %v8167_v60 = vpop.f32.mrb[118].mxu1 }
 0x447   : > { %v8168_v46 = vpop.f32.mrb[119].mxu1 }
 0x448   : > { %v7263_v27 = vadd.f32 %v8166_v8, %v10472_v25  ;;  %v8169_v36 = vadd.f32 %v8168_v46, %v8167_v60 }
 0x44a   : > { %7311 = vst [vmem:[%s10475_s10 + $0xd0] sm:$0xff] %v7263_v27  ;;  %v7266_v62 = vadd.f32 %v8169_v36, %v10472_v25 }
 0x44c   : > { %7312 = vst [vmem:[%s10475_s10 + $0xd8] sm:$0xff] %v7266_v62  ;;  %v8170_v28 = vpop.f32.mrb[120].mxu1 }
 0x44d   : > { %v8171_v12 = vpop.f32.mrb[121].mxu1 }
 0x44e   : > { %v8172_v18 = vadd.f32 %v8171_v12, %v8170_v28  ;;  %v8173_v49 = vpop.f32.mrb[122].mxu1 }
 0x44f   : > { %v8174_v55 = vpop.f32.mrb[123].mxu1 }
 0x450   : > { %v7271_v63 = vadd.f32 %v8172_v18, %v10472_v25  ;;  %v8175_v45 = vadd.f32 %v8174_v55, %v8173_v49 }
 0x452   : > { %7313 = vst [vmem:[%s10475_s10 + $0xe0] sm:$0xff] %v7271_v63  ;;  %v7274_v50 = vadd.f32 %v8175_v45, %v10472_v25 }
 0x454   : > { %7314 = vst [vmem:[%s10475_s10 + $0xe8] sm:$0xff] %v7274_v50  ;;  %v8176_v0 = vpop.f32.mrb[124].mxu1 }
 0x455   : > { %v8177_v32 = vpop.f32.mrb[125].mxu1 }
 0x456   : > { %v8178_v56 = vadd.f32 %v8177_v32, %v8176_v0  ;;  %v8179_v19 = vpop.f32.mrb[126].mxu1 }
 0x457   : > { %v8180_v47 = vpop.f32.mrb[127].mxu1 }
 0x458   : > { %v7279_v1 = vadd.f32 %v8178_v56, %v10472_v25  ;;  %v8181_v51 = vadd.f32 %v8180_v47, %v8179_v19 }
 0x45a   : > { %7315 = vst [vmem:[%s10475_s10 + $0xf0] sm:$0xff] %v7279_v1  ;;  %v7282_v30 = vadd.f32 %v8181_v51, %v10472_v25 }
 0x45c   : > { %7316 = vst [vmem:[%s10475_s10 + $0xf8] sm:$0xff] %v7282_v30 }
 0x45d   : > { %8848 = shalt.err (!%p8845_p5)
}
 0x45e   : > { %s8849_s27 = scalar_lea.hbm %s10542_s15, 4096  ;;  %s8853_s8 = scalar_lea.hbm %s10602_s5, 8192 }
 0x45f   : > { %p8850_p6 = scmp.ne.s32.totalorder %s10542_s15, %s8849_s27  ;;  %p8854_p10 = scmp.lt.u32.totalorder %s10542_s15, %s10602_s5 }
 0x460   : > { %p8855_p11 = scmp.lt.u32.totalorder %s8853_s8, %s8849_s27  ;;  %p8857_p13 = scmp.lt.u32.totalorder %s8849_s27, %s10542_s15 }
 0x461   : > { %p8851_p7 = pnand %p8850_p6, %p8989_p4 }
 0x462   : > { %p8856_p12 = por %p8855_p11, %p8854_p10 }
 0x463   : > { %p8852_p9 = pneg %p8851_p7 }
 0x464   : > { %p8858_p0 = por %p8857_p13, %p8856_p12 }
 0x466   : > { %p8859_p1 = pnand %p8858_p0, %p8852_p9 }
 0x468   : > { %8862 = shalt.err (!%p8859_p1)
}
 0x469   : > { %s8917_s11 = smov 128   ;;  %s8918_s13 = smov 8  }
 0x46a   : > { %8695 = dma.vmem_to_hbm [thread:$0]  (%p8989_p4), %s10544_s12, 4096, %s10542_s15, %s10551_s21, %s8917_s11, %s8917_s11, %s8918_s13  }
 0x46b PF: > { %p8701_p2 = scmp.ge.s32.totalorder %s8913_s23, 2  ;;  %s7347_s14 = sand.u32 1, %s8893_s18  }
 0x46c   : > { %s7348_s16 = scalar_lea.sflag [#allocation5], %s7347_s14 }
 0x46d   : > { %p8698_p3 = pnand %p8701_p2, %p8996_p8 }
 0x46f   : > { %8888 = dma.done.wait (!%p8698_p3), %s7348_s16, 4096  }
 0x470   : > { %8890 = vsyncadd (!%p8698_p3), %s7348_s16, 4294963200  ;;  %s18_s23 = sadd.s32 1, %s8913_s23   ;;  %s10645_s18 = smov %s8897_s19 }
 0x471   : > { %p15_p5 = scmp.ge.s32.totalorder %s18_s23, 4   ;;  %s10646_s19 = smov %s8901_s20 }
 0x472   : > { %s10647_s20 = smov %s9002_s6  ;;  %s10648_s21 = smov %s8909_s22 }
 0x473   : > { %s10649_s22 = smov %s10651_s26  ;;  %17 = sbr.rel (!%p15_p5) target bundleno = 4 (0x4), region = 86 }
 0x47a   :  { %7353 = vsyncpa [#allocation5], 1 }
 0x47b   :  { %7355 = vsyncpa [#allocation5 + $0x1], 1 }

</bundles_post_ra>
